<compile_context>
chip_gen: v5e
topology: v5e:2x2
jax: 0.10.0
libtpu: 0.0.40
codegen_flags: <defaults>
</compile_context>

<pallas_src>
import jax
import jax.numpy as jnp
from jax import lax
from jax.experimental import pallas as pl
from jax.experimental.pallas import tpu as pltpu


# ----------------------------- padding helpers -------------------------------
def _round_up(x, m):
    return (x + m - 1) // m * m


def _pad_gate_cols(w, H, Hp):
    """(rows, 3H) -> (rows, 3*Hp): torch gate blocks [r|z|n] re-based at
    lane-aligned offsets g*Hp; padded lanes are zero (keeps padded hidden = 0)."""
    rows = w.shape[0]
    out = jnp.zeros((rows, 3 * Hp), w.dtype)
    for g in range(3):
        out = out.at[:, g * Hp:g * Hp + H].set(w[:, g * H:(g + 1) * H])
    return out


def _pad_rows(w, rows_p):
    return jnp.pad(w, ((0, rows_p - w.shape[0]), (0, 0)))


def _fold_bias_rz(bih, bhh, H, Hp):
    """Fold b_hr / b_hz into b_ir / b_iz (exact: those gates sum gi+gh).
    Returns ((1, 3Hp) folded input-side bias, (1, Hp) n-gate hidden bias)."""
    bih = jnp.asarray(bih, jnp.float32)
    bhh = jnp.asarray(bhh, jnp.float32)
    folded = jnp.concatenate([bih[:2 * H] + bhh[:2 * H], bih[2 * H:]])
    bih_p = _pad_gate_cols(folded.reshape(1, 3 * H), H, Hp).astype(jnp.float32)
    bhh_n = jnp.zeros((1, Hp), jnp.float32).at[:, :H].set(bhh[2 * H:][None, :])
    return bih_p, bhh_n


# --------------------------------- kernel ------------------------------------
def _fused_encoder_kernel(ax_ref, cx_ref,
                          a_wih_ref, a_whh_ref, a_bih_ref, a_bhhn_ref,
                          c_wih_tok_ref, c_wih_anc_ref, c_whh_ref,
                          c_bih_ref, c_bhhn_ref,
                          a_len_ref, c_len_ref,
                          a_emb_ref, c_emb_ref,
                          gi_a_scr, gi_c_scr):
    Ta, Bp, _ = gi_a_scr.shape
    Tc = gi_c_scr.shape[0]
    Hp = a_whh_ref.shape[0]
    bf16 = jnp.bfloat16

    def run_gru(T, gi_scr, whh, bhhn_row, lens_col, h0):
        # Hoisted broadcasts (JAX does not CSE broadcast_in_dim inside loops).
        bhhn = jnp.broadcast_to(bhhn_row, (Bp, Hp))            # n-gate hidden bias
        lens = jnp.broadcast_to(lens_col, (Bp, Hp))            # int32
        # Full unroll only for short sequences; bounded factor beyond that
        # (steps are serially dependent, so more unroll adds no throughput).
        unroll = True if T <= 32 else 8

        def step(t, carry):
            h, acc = carry
            gi = gi_scr[t].astype(jnp.float32)                 # (Bp, 3Hp), precomputed
            # bf16 MXU recurrent matmul, f32 accumulate (serial critical path).
            gh = jnp.dot(h.astype(bf16), whh, preferred_element_type=jnp.float32)
            r = jax.nn.sigmoid(gi[:, 0:Hp] + gh[:, 0:Hp])              # b_hr folded into gi
            z = jax.nn.sigmoid(gi[:, Hp:2 * Hp] + gh[:, Hp:2 * Hp])    # b_hz folded into gi
            n = jnp.tanh(gi[:, 2 * Hp:3 * Hp] + r * (gh[:, 2 * Hp:3 * Hp] + bhhn))
            h_new = (1.0 - z) * n + z * h
            valid = lens > t                                   # pack_padded freeze
            h = jnp.where(valid, h_new, h)
            acc = acc + jnp.where(valid, h, 0.0)               # masked-mean accumulator
            return h, acc

        h, acc = lax.fori_loop(
            0, T, step, (h0, jnp.zeros((Bp, Hp), jnp.float32)), unroll=unroll)
        inv = 1.0 / jnp.maximum(lens_col, 1).astype(jnp.float32)  # (Bp, 1)
        return h, acc * inv                                       # fixedSizeMethod='mean'

    # ---- Phase 1: anchor GRU ------------------------------------------------
    # Hoisted input projection: one large bf16 MXU matmul over all timesteps.
    gi_a = jnp.dot(ax_ref[...], a_wih_ref[...],
                   preferred_element_type=jnp.float32) + a_bih_ref[...]
    gi_a_scr[...] = gi_a.reshape(Ta, Bp, 3 * Hp).astype(gi_a_scr.dtype)

    zero_h = jnp.zeros((Bp, Hp), jnp.float32)
    a_hidden, a_emb = run_gru(Ta, gi_a_scr, a_whh_ref[...],
                              a_bhhn_ref[...], a_len_ref[...], zero_h)
    a_emb_ref[...] = a_emb

    # ---- Phase 2: candidate GRU ---------------------------------------------
    gi_c = jnp.dot(cx_ref[...], c_wih_tok_ref[...],
                   preferred_element_type=jnp.float32) + c_bih_ref[...]
    # Replicated anchor is time-invariant: compute its gate contribution once
    # (bf16 MXU, f32 acc) and fold it into the gi scratch at write time, so the
    # per-step recurrence carries no extra adds.
    anc_add = jnp.dot(a_emb.astype(bf16), c_wih_anc_ref[...],
                      preferred_element_type=jnp.float32)
    gi_c_scr[...] = (gi_c.reshape(Tc, Bp, 3 * Hp)
                     + anc_add[None]).astype(gi_c_scr.dtype)

    _, c_emb = run_gru(Tc, gi_c_scr, c_whh_ref[...],
                       c_bhhn_ref[...], c_len_ref[...], a_hidden)
    c_emb_ref[...] = c_emb


# --------------------------------- wrapper ------------------------------------
def replicated_emb_encoder_forward(params, anchorInput, anchorLength,
                                   candidateInput, candidateLength,
                                   gi_scratch_dtype=jnp.float32):
    """Mirror of ReplicatedEmbEncoder.forward (gru, 1 layer, unidirectional,
    fixedSizeMethod='mean', dropout=0.0). Returns (anchorEmb, candidateEmb)."""
    E = params["embedding"]
    B, Ta = anchorInput.shape
    _, Tc = candidateInput.shape
    Demb = E.shape[1]
    H = params["anchor_whh_t"].shape[0]

    Bp = _round_up(B, 8)       # sublane tile
    Hp = _round_up(H, 128)     # lane tile: gate slices & output stores vreg-aligned
    Dp = _round_up(Demb, 128)

    f32, bf16 = jnp.float32, jnp.bfloat16

    # TODO(synk): embedding gather stays in XLA; an in-kernel gather via
    # PrefetchScalarGridSpec + pl.Element row-gather would also fuse this
    # (T,B,Demb) HBM round-trip (biggest relative win on v5e's ~0.8 TB/s HBM).
    def prep_x(ids):
        T = ids.shape[1]
        x = E[ids]                                    # (B, T, Demb) gather (glue)
        x = jnp.transpose(x, (1, 0, 2))               # time-major (T, B, Demb)
        x = jnp.pad(x, ((0, 0), (0, Bp - B), (0, Dp - Demb)))
        return x.reshape(T * Bp, Dp).astype(bf16)     # flat for one big MXU matmul

    ax = prep_x(anchorInput)                          # (Ta*Bp, Dp) bf16
    cx = prep_x(candidateInput)                       # (Tc*Bp, Dp) bf16

    # Anchor GRU (input Demb -> H); torch gate order [r, z, n], gate blocks padded.
    a_wih = _pad_rows(_pad_gate_cols(params["anchor_wih_t"], H, Hp), Dp).astype(bf16)
    a_whh = _pad_rows(_pad_gate_cols(params["anchor_whh_t"], H, Hp), Hp).astype(bf16)
    a_bih, a_bhhn = _fold_bias_rz(params["anchor_bih"], params["anchor_bhh"], H, Hp)

    # Candidate GRU (input Demb+H -> H): split weight rows into token part and
    # replicated-anchor part (the latter is applied once inside the kernel).
    c_wih = params["cand_wih_t"]                      # (Demb+H, 3H)
    c_wih_tok = _pad_rows(_pad_gate_cols(c_wih[:Demb], H, Hp), Dp).astype(bf16)
    c_wih_anc = _pad_rows(_pad_gate_cols(c_wih[Demb:Demb + H], H, Hp), Hp).astype(bf16)
    c_whh = _pad_rows(_pad_gate_cols(params["cand_whh_t"], H, Hp), Hp).astype(bf16)
    c_bih, c_bhhn = _fold_bias_rz(params["cand_bih"], params["cand_bhh"], H, Hp)

    # Tiny per-row length vectors (mask built in-kernel; no (T,B,1) mask DMA).
    a_len = jnp.pad(anchorLength.astype(jnp.int32), (0, Bp - B)).reshape(Bp, 1)
    c_len = jnp.pad(candidateLength.astype(jnp.int32), (0, Bp - B)).reshape(Bp, 1)

    inputs = (ax, cx, a_wih, a_whh, a_bih, a_bhhn,
              c_wih_tok, c_wih_anc, c_whh, c_bih, c_bhhn, a_len, c_len)

    # Explicit VMEM budget & cost hint: everything is fully VMEM-resident, so
    # size the scoped limit from actual residency instead of the 16/32 MiB
    # default (which is what breaks first as T/B grow).
    gi_itemsize = jnp.dtype(gi_scratch_dtype).itemsize
    in_bytes = sum(int(x.size) * x.dtype.itemsize for x in inputs)
    scratch_bytes = (Ta + Tc) * Bp * 3 * Hp * gi_itemsize
    out_bytes = 2 * Bp * Hp * 4
    vmem_limit = min(max(int(1.5 * (in_bytes + scratch_bytes + out_bytes)) + (4 << 20),
                         32 << 20), 100 << 20)
    flops = (2 * (Ta + Tc) * Bp * Dp * 3 * Hp          # hoisted input projections
             + 2 * (Ta + Tc) * Bp * Hp * 3 * Hp        # recurrent h @ Whh
             + 2 * Bp * Hp * 3 * Hp                    # one-shot anchor gate fold
             + 12 * (Ta + Tc) * Bp * Hp)               # gate elementwise
    transcendentals = 3 * (Ta + Tc) * Bp * Hp          # 2 sigmoid + 1 tanh / step / elem
    cost = pl.CostEstimate(flops=flops, transcendentals=transcendentals,
                           bytes_accessed=in_bytes + out_bytes)

    vmem = pl.BlockSpec(memory_space=pltpu.MemorySpace.VMEM)
    # TODO(synk): on v7x (64 MiB VMEM) pass gi_scratch_dtype=jnp.bfloat16 and,
    # for very long sequences, switch to a time-gridded / emit_pipeline streamed
    # gi path; also shard the batch across the two TensorCores with a leading
    # "parallel" grid axis once B spans >=2 sublane groups. At these sizes the
    # single-program fully resident form is cheapest on v5e/v6e.
    a_emb_p, c_emb_p = pl.pallas_call(
        _fused_encoder_kernel,
        out_shape=(jax.ShapeDtypeStruct((Bp, Hp), f32),
                   jax.ShapeDtypeStruct((Bp, Hp), f32)),
        in_specs=[vmem] * len(inputs),
        out_specs=(vmem, vmem),
        scratch_shapes=[pltpu.VMEM((Ta, Bp, 3 * Hp), gi_scratch_dtype),   # anchor gi
                        pltpu.VMEM((Tc, Bp, 3 * Hp), gi_scratch_dtype)],  # candidate gi
        compiler_params=pltpu.CompilerParams(vmem_limit_bytes=vmem_limit),
        cost_estimate=cost,
    )(*inputs)

    # TODO(synk): dropout>0, LSTM, multi-layer and bidirectional variants of the
    # original module are not exercised by this configuration.
    return a_emb_p[:B, :H], c_emb_p[:B, :H]


# ------------------------- pure-JAX reference (for checking) -----------------
def _ref_gru(x_btd, lengths, h0, wih_t, whh_t, bih, bhh):
    B, T, _ = x_btd.shape
    H = h0.shape[1]
    h = h0.astype(jnp.float32)
    acc = jnp.zeros((B, H), jnp.float32)
    for t in range(T):
        x_t = x_btd[:, t, :].astype(jnp.float32)
        gi = x_t @ wih_t + bih
        gh = h @ whh_t + bhh
        r = jax.nn.sigmoid(gi[:, :H] + gh[:, :H])
        z = jax.nn.sigmoid(gi[:, H:2 * H] + gh[:, H:2 * H])
        n = jnp.tanh(gi[:, 2 * H:] + r * gh[:, 2 * H:])
        h_new = (1.0 - z) * n + z * h
        m = (t < lengths).astype(jnp.float32)[:, None]
        h = m * h_new + (1.0 - m) * h
        acc = acc + m * h
    return acc / jnp.maximum(lengths, 1).astype(jnp.float32)[:, None], h


def _ref_forward(params, aIn, aLen, cIn, cLen):
    E = params["embedding"]
    B, Tc = cIn.shape
    H = params["anchor_whh_t"].shape[0]
    aEmb, aHid = _ref_gru(E[aIn], aLen, jnp.zeros((B, H), jnp.float32),
                          params["anchor_wih_t"], params["anchor_whh_t"],
                          params["anchor_bih"], params["anchor_bhh"])
    cand_x = jnp.concatenate(
        [E[cIn], jnp.broadcast_to(aEmb[:, None, :], (B, Tc, H))], axis=2)
    cEmb, _ = _ref_gru(cand_x, cLen, aHid,
                       params["cand_wih_t"], params["cand_whh_t"],
                       params["cand_bih"], params["cand_bhh"])
    return aEmb, cEmb


if __name__ == "__main__":
    # Small shapes consistent with the module's forward signature.
    B, Ta, Tc = 2, 8, 8          # batch, anchor seq len, candidate seq len
    V, Demb, H = 50, 32, 32      # vocab, embedding size, hiddenSize

    key = jax.random.PRNGKey(0)
    ks = jax.random.split(key, 12)
    scale = 1.0 / (H ** 0.5)

    def u(k, shape):
        return jax.random.uniform(k, shape, jnp.float32, -scale, scale)

    emb = jax.random.normal(ks[0], (V, Demb), jnp.float32) * 0.1
    emb = emb.at[0].set(0.0)  # padding_idx = 0

    params = dict(
        embedding=emb,
        # anchor GRU: input Demb -> hidden H   (torch gate order [r, z, n])
        anchor_wih_t=u(ks[1], (Demb, 3 * H)),
        anchor_whh_t=u(ks[2], (H, 3 * H)),
        anchor_bih=u(ks[3], (3 * H,)),
        anchor_bhh=u(ks[4], (3 * H,)),
        # candidate GRU: input (Demb + H) -> hidden H
        cand_wih_t=u(ks[5], (Demb + H, 3 * H)),
        cand_whh_t=u(ks[6], (H, 3 * H)),
        cand_bih=u(ks[7], (3 * H,)),
        cand_bhh=u(ks[8], (3 * H,)),
    )

    anchorLength = jnp.array([Ta, 5], jnp.int32)
    candidateLength = jnp.array([6, Tc], jnp.int32)
    anchorInput = jax.random.randint(ks[9], (B, Ta), 1, V, jnp.int32)
    candidateInput = jax.random.randint(ks[10], (B, Tc), 1, V, jnp.int32)
    # pad positions beyond each length with the padding index (0)
    anchorInput = jnp.where(jnp.arange(Ta)[None, :] < anchorLength[:, None], anchorInput, 0)
    candidateInput = jnp.where(jnp.arange(Tc)[None, :] < candidateLength[:, None], candidateInput, 0)

    fwd = jax.jit(replicated_emb_encoder_forward)
    anchorEmb, candidateEmb = fwd(params, anchorInput, anchorLength,
                                  candidateInput, candidateLength)
    jax.block_until_ready((anchorEmb, candidateEmb))

    ref_a, ref_c = _ref_forward(params, anchorInput, anchorLength,
                                candidateInput, candidateLength)
    assert anchorEmb.shape == (B, H) and candidateEmb.shape == (B, H)
    # bf16 now enters the recurrence itself (h @ Whh and the anchor gate fold),
    # not just the one-shot input projection, so the tolerance vs the pure-f32
    # reference is relaxed to 1e-2 (per the review's re-validation note).
    assert jnp.allclose(anchorEmb, ref_a, atol=1e-2, rtol=1e-2)
    assert jnp.allclose(candidateEmb, ref_c, atol=1e-2, rtol=1e-2)

    print("KERNEL_OK")
</pallas_src>

<mosaic_0001>
module attributes {stable_mosaic.version = 11 : i64} {
  func.func @_fused_encoder_kernel(%arg0: memref<64x128xbf16, #tpu.memory_space<vmem>>, %arg1: memref<64x128xbf16, #tpu.memory_space<vmem>>, %arg2: memref<128x384xbf16, #tpu.memory_space<vmem>>, %arg3: memref<128x384xbf16, #tpu.memory_space<vmem>>, %arg4: memref<1x384xf32, #tpu.memory_space<vmem>>, %arg5: memref<1x128xf32, #tpu.memory_space<vmem>>, %arg6: memref<128x384xbf16, #tpu.memory_space<vmem>>, %arg7: memref<128x384xbf16, #tpu.memory_space<vmem>>, %arg8: memref<128x384xbf16, #tpu.memory_space<vmem>>, %arg9: memref<1x384xf32, #tpu.memory_space<vmem>>, %arg10: memref<1x128xf32, #tpu.memory_space<vmem>>, %arg11: memref<8x1xi32, #tpu.memory_space<vmem>>, %arg12: memref<8x1xi32, #tpu.memory_space<vmem>>, %arg13: memref<8x128xf32, #tpu.memory_space<vmem>>, %arg14: memref<8x128xf32, #tpu.memory_space<vmem>>, %arg15: memref<8x8x384xf32, #tpu.memory_space<vmem>>, %arg16: memref<8x8x384xf32, #tpu.memory_space<vmem>>) attributes {dimension_semantics = [], scalar_prefetch = 0 : i64, scratch_operands = 2 : i64, tpu.core_type = #tpu.core_type<tc>} {
    %c0 = arith.constant 0 : index
    %c0_0 = arith.constant 0 : index
    %0 = vector.load %arg0[%c0, %c0_0] : memref<64x128xbf16, #tpu.memory_space<vmem>>, vector<64x128xbf16>
    %c0_1 = arith.constant 0 : index
    %c0_2 = arith.constant 0 : index
    %1 = vector.load %arg2[%c0_1, %c0_2] : memref<128x384xbf16, #tpu.memory_space<vmem>>, vector<128x384xbf16>
    %cst = arith.constant dense<0.000000e+00> : vector<64x384xf32>
    %2 = tpu.matmul %0, %1, %cst {dimension_numbers = #tpu.dot_dimension_numbers<[1], [0], [0], [1], [0, 0, 1, 1], [], []>} : vector<64x128xbf16>, vector<128x384xbf16>, vector<64x384xf32> -> vector<64x384xf32>
    %c0_3 = arith.constant 0 : index
    %c0_4 = arith.constant 0 : index
    %3 = vector.load %arg4[%c0_3, %c0_4] : memref<1x384xf32, #tpu.memory_space<vmem>>, vector<1x384xf32>
    %4 = vector.broadcast %3 : vector<1x384xf32> to vector<64x384xf32>
    %5 = arith.addf %2, %4 : vector<64x384xf32>
    %6 = vector.shape_cast %5 : vector<64x384xf32> to vector<8x8x384xf32>
    %c0_5 = arith.constant 0 : index
    %c0_6 = arith.constant 0 : index
    %c0_7 = arith.constant 0 : index
    %7 = vector.load %arg15[%c0_5, %c0_6, %c0_7] : memref<8x8x384xf32, #tpu.memory_space<vmem>>, vector<8x8x384xf32>
    tpu.vector_store %arg15[%c0_5, %c0_6, %c0_7], %6 {strides = array<i32>} : memref<8x8x384xf32, #tpu.memory_space<vmem>>, vector<8x8x384xf32>,
    %cst_8 = arith.constant 0.000000e+00 : f32
    %8 = vector.broadcast %cst_8 : f32 to vector<8x128xf32>
    %c0_9 = arith.constant 0 : index
    %c0_10 = arith.constant 0 : index
    %9 = vector.load %arg3[%c0_9, %c0_10] : memref<128x384xbf16, #tpu.memory_space<vmem>>, vector<128x384xbf16>
    %c0_11 = arith.constant 0 : index
    %c0_12 = arith.constant 0 : index
    %10 = vector.load %arg5[%c0_11, %c0_12] : memref<1x128xf32, #tpu.memory_space<vmem>>, vector<1x128xf32>
    %c0_13 = arith.constant 0 : index
    %c0_14 = arith.constant 0 : index
    %11 = vector.load %arg11[%c0_13, %c0_14] : memref<8x1xi32, #tpu.memory_space<vmem>>, vector<8x1xi32>
    %12 = vector.shape_cast %10 : vector<1x128xf32> to vector<1x128xf32>
    %13 = vector.broadcast %12 : vector<1x128xf32> to vector<8x128xf32>
    %14 = vector.shape_cast %11 : vector<8x1xi32> to vector<8x1xi32>
    %15 = vector.broadcast %14 : vector<8x1xi32> to vector<8x128xi32>
    %cst_15 = arith.constant 0.000000e+00 : f32
    %16 = vector.broadcast %cst_15 : f32 to vector<8x128xf32>
    %c0_i32 = arith.constant 0 : i32
    %17 = arith.index_cast %c0_i32 : i32 to index
    %c0_16 = arith.constant 0 : index
    %c0_17 = arith.constant 0 : index
    %18 = vector.load %arg15[%17, %c0_16, %c0_17] : memref<8x8x384xf32, #tpu.memory_space<vmem>>, vector<1x8x384xf32>
    %19 = vector.shape_cast %18 : vector<1x8x384xf32> to vector<8x384xf32>
    %20 = arith.truncf %8 : vector<8x128xf32> to vector<8x128xbf16>
    %cst_18 = arith.constant dense<0.000000e+00> : vector<8x384xf32>
    %21 = tpu.matmul %20, %9, %cst_18 {dimension_numbers = #tpu.dot_dimension_numbers<[1], [0], [0], [1], [0, 0, 1, 1], [], []>} : vector<8x128xbf16>, vector<128x384xbf16>, vector<8x384xf32> -> vector<8x384xf32>
    %22 = vector.extract_strided_slice %19 {offsets = [0, 0], sizes = [8, 128], strides = [1, 1]} : vector<8x384xf32> to vector<8x128xf32>
    %23 = vector.extract_strided_slice %21 {offsets = [0, 0], sizes = [8, 128], strides = [1, 1]} : vector<8x384xf32> to vector<8x128xf32>
    %24 = arith.addf %22, %23 : vector<8x128xf32>
    %25 = arith.negf %24 : vector<8x128xf32>
    %26 = math.exp %25 : vector<8x128xf32>
    %cst_19 = arith.constant 1.000000e+00 : f32
    %27 = vector.broadcast %cst_19 : f32 to vector<8x128xf32>
    %28 = arith.addf %27, %26 : vector<8x128xf32>
    %29 = arith.divf %27, %28 : vector<8x128xf32>
    %30 = vector.extract_strided_slice %19 {offsets = [0, 128], sizes = [8, 128], strides = [1, 1]} : vector<8x384xf32> to vector<8x128xf32>
    %31 = vector.extract_strided_slice %21 {offsets = [0, 128], sizes = [8, 128], strides = [1, 1]} : vector<8x384xf32> to vector<8x128xf32>
    %32 = arith.addf %30, %31 : vector<8x128xf32>
    %33 = arith.negf %32 : vector<8x128xf32>
    %34 = math.exp %33 : vector<8x128xf32>
    %cst_20 = arith.constant 1.000000e+00 : f32
    %35 = vector.broadcast %cst_20 : f32 to vector<8x128xf32>
    %36 = arith.addf %35, %34 : vector<8x128xf32>
    %37 = arith.divf %35, %36 : vector<8x128xf32>
    %38 = vector.extract_strided_slice %19 {offsets = [0, 256], sizes = [8, 128], strides = [1, 1]} : vector<8x384xf32> to vector<8x128xf32>
    %39 = vector.extract_strided_slice %21 {offsets = [0, 256], sizes = [8, 128], strides = [1, 1]} : vector<8x384xf32> to vector<8x128xf32>
    %40 = arith.addf %39, %13 : vector<8x128xf32>
    %41 = arith.mulf %29, %40 : vector<8x128xf32>
    %42 = arith.addf %38, %41 : vector<8x128xf32>
    %43 = math.tanh %42 : vector<8x128xf32>
    %cst_21 = arith.constant 1.000000e+00 : f32
    %44 = vector.broadcast %cst_21 : f32 to vector<8x128xf32>
    %45 = arith.subf %44, %37 : vector<8x128xf32>
    %46 = arith.mulf %45, %43 : vector<8x128xf32>
    %47 = arith.mulf %37, %8 : vector<8x128xf32>
    %48 = arith.addf %46, %47 : vector<8x128xf32>
    %49 = vector.broadcast %c0_i32 : i32 to vector<8x128xi32>
    %50 = arith.cmpi sgt, %15, %49 : vector<8x128xi32>
    %51 = arith.select %50, %48, %8 : vector<8x128xi1>, vector<8x128xf32>
    %cst_22 = arith.constant 0.000000e+00 : f32
    %52 = vector.broadcast %cst_22 : f32 to vector<8x128xf32>
    %53 = arith.select %50, %51, %52 : vector<8x128xi1>, vector<8x128xf32>
    %54 = arith.addf %16, %53 : vector<8x128xf32>
    %c1_i32 = arith.constant 1 : i32
    %55 = arith.index_cast %c1_i32 : i32 to index
    %c0_23 = arith.constant 0 : index
    %c0_24 = arith.constant 0 : index
    %56 = vector.load %arg15[%55, %c0_23, %c0_24] : memref<8x8x384xf32, #tpu.memory_space<vmem>>, vector<1x8x384xf32>
    %57 = vector.shape_cast %56 : vector<1x8x384xf32> to vector<8x384xf32>
    %58 = arith.truncf %51 : vector<8x128xf32> to vector<8x128xbf16>
    %cst_25 = arith.constant dense<0.000000e+00> : vector<8x384xf32>
    %59 = tpu.matmul %58, %9, %cst_25 {dimension_numbers = #tpu.dot_dimension_numbers<[1], [0], [0], [1], [0, 0, 1, 1], [], []>} : vector<8x128xbf16>, vector<128x384xbf16>, vector<8x384xf32> -> vector<8x384xf32>
    %60 = vector.extract_strided_slice %57 {offsets = [0, 0], sizes = [8, 128], strides = [1, 1]} : vector<8x384xf32> to vector<8x128xf32>
    %61 = vector.extract_strided_slice %59 {offsets = [0, 0], sizes = [8, 128], strides = [1, 1]} : vector<8x384xf32> to vector<8x128xf32>
    %62 = arith.addf %60, %61 : vector<8x128xf32>
    %63 = arith.negf %62 : vector<8x128xf32>
    %64 = math.exp %63 : vector<8x128xf32>
    %cst_26 = arith.constant 1.000000e+00 : f32
    %65 = vector.broadcast %cst_26 : f32 to vector<8x128xf32>
    %66 = arith.addf %65, %64 : vector<8x128xf32>
    %67 = arith.divf %65, %66 : vector<8x128xf32>
    %68 = vector.extract_strided_slice %57 {offsets = [0, 128], sizes = [8, 128], strides = [1, 1]} : vector<8x384xf32> to vector<8x128xf32>
    %69 = vector.extract_strided_slice %59 {offsets = [0, 128], sizes = [8, 128], strides = [1, 1]} : vector<8x384xf32> to vector<8x128xf32>
    %70 = arith.addf %68, %69 : vector<8x128xf32>
    %71 = arith.negf %70 : vector<8x128xf32>
    %72 = math.exp %71 : vector<8x128xf32>
    %cst_27 = arith.constant 1.000000e+00 : f32
    %73 = vector.broadcast %cst_27 : f32 to vector<8x128xf32>
    %74 = arith.addf %73, %72 : vector<8x128xf32>
    %75 = arith.divf %73, %74 : vector<8x128xf32>
    %76 = vector.extract_strided_slice %57 {offsets = [0, 256], sizes = [8, 128], strides = [1, 1]} : vector<8x384xf32> to vector<8x128xf32>
    %77 = vector.extract_strided_slice %59 {offsets = [0, 256], sizes = [8, 128], strides = [1, 1]} : vector<8x384xf32> to vector<8x128xf32>
    %78 = arith.addf %77, %13 : vector<8x128xf32>
    %79 = arith.mulf %67, %78 : vector<8x128xf32>
    %80 = arith.addf %76, %79 : vector<8x128xf32>
    %81 = math.tanh %80 : vector<8x128xf32>
    %cst_28 = arith.constant 1.000000e+00 : f32
    %82 = vector.broadcast %cst_28 : f32 to vector<8x128xf32>
    %83 = arith.subf %82, %75 : vector<8x128xf32>
    %84 = arith.mulf %83, %81 : vector<8x128xf32>
    %85 = arith.mulf %75, %51 : vector<8x128xf32>
    %86 = arith.addf %84, %85 : vector<8x128xf32>
    %87 = vector.broadcast %c1_i32 : i32 to vector<8x128xi32>
    %88 = arith.cmpi sgt, %15, %87 : vector<8x128xi32>
    %89 = arith.select %88, %86, %51 : vector<8x128xi1>, vector<8x128xf32>
    %cst_29 = arith.constant 0.000000e+00 : f32
    %90 = vector.broadcast %cst_29 : f32 to vector<8x128xf32>
    %91 = arith.select %88, %89, %90 : vector<8x128xi1>, vector<8x128xf32>
    %92 = arith.addf %54, %91 : vector<8x128xf32>
    %c2_i32 = arith.constant 2 : i32
    %93 = arith.index_cast %c2_i32 : i32 to index
    %c0_30 = arith.constant 0 : index
    %c0_31 = arith.constant 0 : index
    %94 = vector.load %arg15[%93, %c0_30, %c0_31] : memref<8x8x384xf32, #tpu.memory_space<vmem>>, vector<1x8x384xf32>
    %95 = vector.shape_cast %94 : vector<1x8x384xf32> to vector<8x384xf32>
    %96 = arith.truncf %89 : vector<8x128xf32> to vector<8x128xbf16>
    %cst_32 = arith.constant dense<0.000000e+00> : vector<8x384xf32>
    %97 = tpu.matmul %96, %9, %cst_32 {dimension_numbers = #tpu.dot_dimension_numbers<[1], [0], [0], [1], [0, 0, 1, 1], [], []>} : vector<8x128xbf16>, vector<128x384xbf16>, vector<8x384xf32> -> vector<8x384xf32>
    %98 = vector.extract_strided_slice %95 {offsets = [0, 0], sizes = [8, 128], strides = [1, 1]} : vector<8x384xf32> to vector<8x128xf32>
    %99 = vector.extract_strided_slice %97 {offsets = [0, 0], sizes = [8, 128], strides = [1, 1]} : vector<8x384xf32> to vector<8x128xf32>
    %100 = arith.addf %98, %99 : vector<8x128xf32>
    %101 = arith.negf %100 : vector<8x128xf32>
    %102 = math.exp %101 : vector<8x128xf32>
    %cst_33 = arith.constant 1.000000e+00 : f32
    %103 = vector.broadcast %cst_33 : f32 to vector<8x128xf32>
    %104 = arith.addf %103, %102 : vector<8x128xf32>
    %105 = arith.divf %103, %104 : vector<8x128xf32>
    %106 = vector.extract_strided_slice %95 {offsets = [0, 128], sizes = [8, 128], strides = [1, 1]} : vector<8x384xf32> to vector<8x128xf32>
    %107 = vector.extract_strided_slice %97 {offsets = [0, 128], sizes = [8, 128], strides = [1, 1]} : vector<8x384xf32> to vector<8x128xf32>
    %108 = arith.addf %106, %107 : vector<8x128xf32>
    %109 = arith.negf %108 : vector<8x128xf32>
    %110 = math.exp %109 : vector<8x128xf32>
    %cst_34 = arith.constant 1.000000e+00 : f32
    %111 = vector.broadcast %cst_34 : f32 to vector<8x128xf32>
    %112 = arith.addf %111, %110 : vector<8x128xf32>
    %113 = arith.divf %111, %112 : vector<8x128xf32>
    %114 = vector.extract_strided_slice %95 {offsets = [0, 256], sizes = [8, 128], strides = [1, 1]} : vector<8x384xf32> to vector<8x128xf32>
    %115 = vector.extract_strided_slice %97 {offsets = [0, 256], sizes = [8, 128], strides = [1, 1]} : vector<8x384xf32> to vector<8x128xf32>
    %116 = arith.addf %115, %13 : vector<8x128xf32>
    %117 = arith.mulf %105, %116 : vector<8x128xf32>
    %118 = arith.addf %114, %117 : vector<8x128xf32>
    %119 = math.tanh %118 : vector<8x128xf32>
    %cst_35 = arith.constant 1.000000e+00 : f32
    %120 = vector.broadcast %cst_35 : f32 to vector<8x128xf32>
    %121 = arith.subf %120, %113 : vector<8x128xf32>
    %122 = arith.mulf %121, %119 : vector<8x128xf32>
    %123 = arith.mulf %113, %89 : vector<8x128xf32>
    %124 = arith.addf %122, %123 : vector<8x128xf32>
    %125 = vector.broadcast %c2_i32 : i32 to vector<8x128xi32>
    %126 = arith.cmpi sgt, %15, %125 : vector<8x128xi32>
    %127 = arith.select %126, %124, %89 : vector<8x128xi1>, vector<8x128xf32>
    %cst_36 = arith.constant 0.000000e+00 : f32
    %128 = vector.broadcast %cst_36 : f32 to vector<8x128xf32>
    %129 = arith.select %126, %127, %128 : vector<8x128xi1>, vector<8x128xf32>
    %130 = arith.addf %92, %129 : vector<8x128xf32>
    %c3_i32 = arith.constant 3 : i32
    %131 = arith.index_cast %c3_i32 : i32 to index
    %c0_37 = arith.constant 0 : index
    %c0_38 = arith.constant 0 : index
    %132 = vector.load %arg15[%131, %c0_37, %c0_38] : memref<8x8x384xf32, #tpu.memory_space<vmem>>, vector<1x8x384xf32>
    %133 = vector.shape_cast %132 : vector<1x8x384xf32> to vector<8x384xf32>
    %134 = arith.truncf %127 : vector<8x128xf32> to vector<8x128xbf16>
    %cst_39 = arith.constant dense<0.000000e+00> : vector<8x384xf32>
    %135 = tpu.matmul %134, %9, %cst_39 {dimension_numbers = #tpu.dot_dimension_numbers<[1], [0], [0], [1], [0, 0, 1, 1], [], []>} : vector<8x128xbf16>, vector<128x384xbf16>, vector<8x384xf32> -> vector<8x384xf32>
    %136 = vector.extract_strided_slice %133 {offsets = [0, 0], sizes = [8, 128], strides = [1, 1]} : vector<8x384xf32> to vector<8x128xf32>
    %137 = vector.extract_strided_slice %135 {offsets = [0, 0], sizes = [8, 128], strides = [1, 1]} : vector<8x384xf32> to vector<8x128xf32>
    %138 = arith.addf %136, %137 : vector<8x128xf32>
    %139 = arith.negf %138 : vector<8x128xf32>
    %140 = math.exp %139 : vector<8x128xf32>
    %cst_40 = arith.constant 1.000000e+00 : f32
    %141 = vector.broadcast %cst_40 : f32 to vector<8x128xf32>
    %142 = arith.addf %141, %140 : vector<8x128xf32>
    %143 = arith.divf %141, %142 : vector<8x128xf32>
    %144 = vector.extract_strided_slice %133 {offsets = [0, 128], sizes = [8, 128], strides = [1, 1]} : vector<8x384xf32> to vector<8x128xf32>
    %145 = vector.extract_strided_slice %135 {offsets = [0, 128], sizes = [8, 128], strides = [1, 1]} : vector<8x384xf32> to vector<8x128xf32>
    %146 = arith.addf %144, %145 : vector<8x128xf32>
    %147 = arith.negf %146 : vector<8x128xf32>
    %148 = math.exp %147 : vector<8x128xf32>
    %cst_41 = arith.constant 1.000000e+00 : f32
    %149 = vector.broadcast %cst_41 : f32 to vector<8x128xf32>
    %150 = arith.addf %149, %148 : vector<8x128xf32>
    %151 = arith.divf %149, %150 : vector<8x128xf32>
    %152 = vector.extract_strided_slice %133 {offsets = [0, 256], sizes = [8, 128], strides = [1, 1]} : vector<8x384xf32> to vector<8x128xf32>
    %153 = vector.extract_strided_slice %135 {offsets = [0, 256], sizes = [8, 128], strides = [1, 1]} : vector<8x384xf32> to vector<8x128xf32>
    %154 = arith.addf %153, %13 : vector<8x128xf32>
    %155 = arith.mulf %143, %154 : vector<8x128xf32>
    %156 = arith.addf %152, %155 : vector<8x128xf32>
    %157 = math.tanh %156 : vector<8x128xf32>
    %cst_42 = arith.constant 1.000000e+00 : f32
    %158 = vector.broadcast %cst_42 : f32 to vector<8x128xf32>
    %159 = arith.subf %158, %151 : vector<8x128xf32>
    %160 = arith.mulf %159, %157 : vector<8x128xf32>
    %161 = arith.mulf %151, %127 : vector<8x128xf32>
    %162 = arith.addf %160, %161 : vector<8x128xf32>
    %163 = vector.broadcast %c3_i32 : i32 to vector<8x128xi32>
    %164 = arith.cmpi sgt, %15, %163 : vector<8x128xi32>
    %165 = arith.select %164, %162, %127 : vector<8x128xi1>, vector<8x128xf32>
    %cst_43 = arith.constant 0.000000e+00 : f32
    %166 = vector.broadcast %cst_43 : f32 to vector<8x128xf32>
    %167 = arith.select %164, %165, %166 : vector<8x128xi1>, vector<8x128xf32>
    %168 = arith.addf %130, %167 : vector<8x128xf32>
    %c4_i32 = arith.constant 4 : i32
    %169 = arith.index_cast %c4_i32 : i32 to index
    %c0_44 = arith.constant 0 : index
    %c0_45 = arith.constant 0 : index
    %170 = vector.load %arg15[%169, %c0_44, %c0_45] : memref<8x8x384xf32, #tpu.memory_space<vmem>>, vector<1x8x384xf32>
    %171 = vector.shape_cast %170 : vector<1x8x384xf32> to vector<8x384xf32>
    %172 = arith.truncf %165 : vector<8x128xf32> to vector<8x128xbf16>
    %cst_46 = arith.constant dense<0.000000e+00> : vector<8x384xf32>
    %173 = tpu.matmul %172, %9, %cst_46 {dimension_numbers = #tpu.dot_dimension_numbers<[1], [0], [0], [1], [0, 0, 1, 1], [], []>} : vector<8x128xbf16>, vector<128x384xbf16>, vector<8x384xf32> -> vector<8x384xf32>
    %174 = vector.extract_strided_slice %171 {offsets = [0, 0], sizes = [8, 128], strides = [1, 1]} : vector<8x384xf32> to vector<8x128xf32>
    %175 = vector.extract_strided_slice %173 {offsets = [0, 0], sizes = [8, 128], strides = [1, 1]} : vector<8x384xf32> to vector<8x128xf32>
    %176 = arith.addf %174, %175 : vector<8x128xf32>
    %177 = arith.negf %176 : vector<8x128xf32>
    %178 = math.exp %177 : vector<8x128xf32>
    %cst_47 = arith.constant 1.000000e+00 : f32
    %179 = vector.broadcast %cst_47 : f32 to vector<8x128xf32>
    %180 = arith.addf %179, %178 : vector<8x128xf32>
    %181 = arith.divf %179, %180 : vector<8x128xf32>
    %182 = vector.extract_strided_slice %171 {offsets = [0, 128], sizes = [8, 128], strides = [1, 1]} : vector<8x384xf32> to vector<8x128xf32>
    %183 = vector.extract_strided_slice %173 {offsets = [0, 128], sizes = [8, 128], strides = [1, 1]} : vector<8x384xf32> to vector<8x128xf32>
    %184 = arith.addf %182, %183 : vector<8x128xf32>
    %185 = arith.negf %184 : vector<8x128xf32>
    %186 = math.exp %185 : vector<8x128xf32>
    %cst_48 = arith.constant 1.000000e+00 : f32
    %187 = vector.broadcast %cst_48 : f32 to vector<8x128xf32>
    %188 = arith.addf %187, %186 : vector<8x128xf32>
    %189 = arith.divf %187, %188 : vector<8x128xf32>
    %190 = vector.extract_strided_slice %171 {offsets = [0, 256], sizes = [8, 128], strides = [1, 1]} : vector<8x384xf32> to vector<8x128xf32>
    %191 = vector.extract_strided_slice %173 {offsets = [0, 256], sizes = [8, 128], strides = [1, 1]} : vector<8x384xf32> to vector<8x128xf32>
    %192 = arith.addf %191, %13 : vector<8x128xf32>
    %193 = arith.mulf %181, %192 : vector<8x128xf32>
    %194 = arith.addf %190, %193 : vector<8x128xf32>
    %195 = math.tanh %194 : vector<8x128xf32>
    %cst_49 = arith.constant 1.000000e+00 : f32
    %196 = vector.broadcast %cst_49 : f32 to vector<8x128xf32>
    %197 = arith.subf %196, %189 : vector<8x128xf32>
    %198 = arith.mulf %197, %195 : vector<8x128xf32>
    %199 = arith.mulf %189, %165 : vector<8x128xf32>
    %200 = arith.addf %198, %199 : vector<8x128xf32>
    %201 = vector.broadcast %c4_i32 : i32 to vector<8x128xi32>
    %202 = arith.cmpi sgt, %15, %201 : vector<8x128xi32>
    %203 = arith.select %202, %200, %165 : vector<8x128xi1>, vector<8x128xf32>
    %cst_50 = arith.constant 0.000000e+00 : f32
    %204 = vector.broadcast %cst_50 : f32 to vector<8x128xf32>
    %205 = arith.select %202, %203, %204 : vector<8x128xi1>, vector<8x128xf32>
    %206 = arith.addf %168, %205 : vector<8x128xf32>
    %c5_i32 = arith.constant 5 : i32
    %207 = arith.index_cast %c5_i32 : i32 to index
    %c0_51 = arith.constant 0 : index
    %c0_52 = arith.constant 0 : index
    %208 = vector.load %arg15[%207, %c0_51, %c0_52] : memref<8x8x384xf32, #tpu.memory_space<vmem>>, vector<1x8x384xf32>
    %209 = vector.shape_cast %208 : vector<1x8x384xf32> to vector<8x384xf32>
    %210 = arith.truncf %203 : vector<8x128xf32> to vector<8x128xbf16>
    %cst_53 = arith.constant dense<0.000000e+00> : vector<8x384xf32>
    %211 = tpu.matmul %210, %9, %cst_53 {dimension_numbers = #tpu.dot_dimension_numbers<[1], [0], [0], [1], [0, 0, 1, 1], [], []>} : vector<8x128xbf16>, vector<128x384xbf16>, vector<8x384xf32> -> vector<8x384xf32>
    %212 = vector.extract_strided_slice %209 {offsets = [0, 0], sizes = [8, 128], strides = [1, 1]} : vector<8x384xf32> to vector<8x128xf32>
    %213 = vector.extract_strided_slice %211 {offsets = [0, 0], sizes = [8, 128], strides = [1, 1]} : vector<8x384xf32> to vector<8x128xf32>
    %214 = arith.addf %212, %213 : vector<8x128xf32>
    %215 = arith.negf %214 : vector<8x128xf32>
    %216 = math.exp %215 : vector<8x128xf32>
    %cst_54 = arith.constant 1.000000e+00 : f32
    %217 = vector.broadcast %cst_54 : f32 to vector<8x128xf32>
    %218 = arith.addf %217, %216 : vector<8x128xf32>
    %219 = arith.divf %217, %218 : vector<8x128xf32>
    %220 = vector.extract_strided_slice %209 {offsets = [0, 128], sizes = [8, 128], strides = [1, 1]} : vector<8x384xf32> to vector<8x128xf32>
    %221 = vector.extract_strided_slice %211 {offsets = [0, 128], sizes = [8, 128], strides = [1, 1]} : vector<8x384xf32> to vector<8x128xf32>
    %222 = arith.addf %220, %221 : vector<8x128xf32>
    %223 = arith.negf %222 : vector<8x128xf32>
    %224 = math.exp %223 : vector<8x128xf32>
    %cst_55 = arith.constant 1.000000e+00 : f32
    %225 = vector.broadcast %cst_55 : f32 to vector<8x128xf32>
    %226 = arith.addf %225, %224 : vector<8x128xf32>
    %227 = arith.divf %225, %226 : vector<8x128xf32>
    %228 = vector.extract_strided_slice %209 {offsets = [0, 256], sizes = [8, 128], strides = [1, 1]} : vector<8x384xf32> to vector<8x128xf32>
    %229 = vector.extract_strided_slice %211 {offsets = [0, 256], sizes = [8, 128], strides = [1, 1]} : vector<8x384xf32> to vector<8x128xf32>
    %230 = arith.addf %229, %13 : vector<8x128xf32>
    %231 = arith.mulf %219, %230 : vector<8x128xf32>
    %232 = arith.addf %228, %231 : vector<8x128xf32>
    %233 = math.tanh %232 : vector<8x128xf32>
    %cst_56 = arith.constant 1.000000e+00 : f32
    %234 = vector.broadcast %cst_56 : f32 to vector<8x128xf32>
    %235 = arith.subf %234, %227 : vector<8x128xf32>
    %236 = arith.mulf %235, %233 : vector<8x128xf32>
    %237 = arith.mulf %227, %203 : vector<8x128xf32>
    %238 = arith.addf %236, %237 : vector<8x128xf32>
    %239 = vector.broadcast %c5_i32 : i32 to vector<8x128xi32>
    %240 = arith.cmpi sgt, %15, %239 : vector<8x128xi32>
    %241 = arith.select %240, %238, %203 : vector<8x128xi1>, vector<8x128xf32>
    %cst_57 = arith.constant 0.000000e+00 : f32
    %242 = vector.broadcast %cst_57 : f32 to vector<8x128xf32>
    %243 = arith.select %240, %241, %242 : vector<8x128xi1>, vector<8x128xf32>
    %244 = arith.addf %206, %243 : vector<8x128xf32>
    %c6_i32 = arith.constant 6 : i32
    %245 = arith.index_cast %c6_i32 : i32 to index
    %c0_58 = arith.constant 0 : index
    %c0_59 = arith.constant 0 : index
    %246 = vector.load %arg15[%245, %c0_58, %c0_59] : memref<8x8x384xf32, #tpu.memory_space<vmem>>, vector<1x8x384xf32>
    %247 = vector.shape_cast %246 : vector<1x8x384xf32> to vector<8x384xf32>
    %248 = arith.truncf %241 : vector<8x128xf32> to vector<8x128xbf16>
    %cst_60 = arith.constant dense<0.000000e+00> : vector<8x384xf32>
    %249 = tpu.matmul %248, %9, %cst_60 {dimension_numbers = #tpu.dot_dimension_numbers<[1], [0], [0], [1], [0, 0, 1, 1], [], []>} : vector<8x128xbf16>, vector<128x384xbf16>, vector<8x384xf32> -> vector<8x384xf32>
    %250 = vector.extract_strided_slice %247 {offsets = [0, 0], sizes = [8, 128], strides = [1, 1]} : vector<8x384xf32> to vector<8x128xf32>
    %251 = vector.extract_strided_slice %249 {offsets = [0, 0], sizes = [8, 128], strides = [1, 1]} : vector<8x384xf32> to vector<8x128xf32>
    %252 = arith.addf %250, %251 : vector<8x128xf32>
    %253 = arith.negf %252 : vector<8x128xf32>
    %254 = math.exp %253 : vector<8x128xf32>
    %cst_61 = arith.constant 1.000000e+00 : f32
    %255 = vector.broadcast %cst_61 : f32 to vector<8x128xf32>
    %256 = arith.addf %255, %254 : vector<8x128xf32>
    %257 = arith.divf %255, %256 : vector<8x128xf32>
    %258 = vector.extract_strided_slice %247 {offsets = [0, 128], sizes = [8, 128], strides = [1, 1]} : vector<8x384xf32> to vector<8x128xf32>
    %259 = vector.extract_strided_slice %249 {offsets = [0, 128], sizes = [8, 128], strides = [1, 1]} : vector<8x384xf32> to vector<8x128xf32>
    %260 = arith.addf %258, %259 : vector<8x128xf32>
    %261 = arith.negf %260 : vector<8x128xf32>
    %262 = math.exp %261 : vector<8x128xf32>
    %cst_62 = arith.constant 1.000000e+00 : f32
    %263 = vector.broadcast %cst_62 : f32 to vector<8x128xf32>
    %264 = arith.addf %263, %262 : vector<8x128xf32>
    %265 = arith.divf %263, %264 : vector<8x128xf32>
    %266 = vector.extract_strided_slice %247 {offsets = [0, 256], sizes = [8, 128], strides = [1, 1]} : vector<8x384xf32> to vector<8x128xf32>
    %267 = vector.extract_strided_slice %249 {offsets = [0, 256], sizes = [8, 128], strides = [1, 1]} : vector<8x384xf32> to vector<8x128xf32>
    %268 = arith.addf %267, %13 : vector<8x128xf32>
    %269 = arith.mulf %257, %268 : vector<8x128xf32>
    %270 = arith.addf %266, %269 : vector<8x128xf32>
    %271 = math.tanh %270 : vector<8x128xf32>
    %cst_63 = arith.constant 1.000000e+00 : f32
    %272 = vector.broadcast %cst_63 : f32 to vector<8x128xf32>
    %273 = arith.subf %272, %265 : vector<8x128xf32>
    %274 = arith.mulf %273, %271 : vector<8x128xf32>
    %275 = arith.mulf %265, %241 : vector<8x128xf32>
    %276 = arith.addf %274, %275 : vector<8x128xf32>
    %277 = vector.broadcast %c6_i32 : i32 to vector<8x128xi32>
    %278 = arith.cmpi sgt, %15, %277 : vector<8x128xi32>
    %279 = arith.select %278, %276, %241 : vector<8x128xi1>, vector<8x128xf32>
    %cst_64 = arith.constant 0.000000e+00 : f32
    %280 = vector.broadcast %cst_64 : f32 to vector<8x128xf32>
    %281 = arith.select %278, %279, %280 : vector<8x128xi1>, vector<8x128xf32>
    %282 = arith.addf %244, %281 : vector<8x128xf32>
    %c7_i32 = arith.constant 7 : i32
    %283 = arith.index_cast %c7_i32 : i32 to index
    %c0_65 = arith.constant 0 : index
    %c0_66 = arith.constant 0 : index
    %284 = vector.load %arg15[%283, %c0_65, %c0_66] : memref<8x8x384xf32, #tpu.memory_space<vmem>>, vector<1x8x384xf32>
    %285 = vector.shape_cast %284 : vector<1x8x384xf32> to vector<8x384xf32>
    %286 = arith.truncf %279 : vector<8x128xf32> to vector<8x128xbf16>
    %cst_67 = arith.constant dense<0.000000e+00> : vector<8x384xf32>
    %287 = tpu.matmul %286, %9, %cst_67 {dimension_numbers = #tpu.dot_dimension_numbers<[1], [0], [0], [1], [0, 0, 1, 1], [], []>} : vector<8x128xbf16>, vector<128x384xbf16>, vector<8x384xf32> -> vector<8x384xf32>
    %288 = vector.extract_strided_slice %285 {offsets = [0, 0], sizes = [8, 128], strides = [1, 1]} : vector<8x384xf32> to vector<8x128xf32>
    %289 = vector.extract_strided_slice %287 {offsets = [0, 0], sizes = [8, 128], strides = [1, 1]} : vector<8x384xf32> to vector<8x128xf32>
    %290 = arith.addf %288, %289 : vector<8x128xf32>
    %291 = arith.negf %290 : vector<8x128xf32>
    %292 = math.exp %291 : vector<8x128xf32>
    %cst_68 = arith.constant 1.000000e+00 : f32
    %293 = vector.broadcast %cst_68 : f32 to vector<8x128xf32>
    %294 = arith.addf %293, %292 : vector<8x128xf32>
    %295 = arith.divf %293, %294 : vector<8x128xf32>
    %296 = vector.extract_strided_slice %285 {offsets = [0, 128], sizes = [8, 128], strides = [1, 1]} : vector<8x384xf32> to vector<8x128xf32>
    %297 = vector.extract_strided_slice %287 {offsets = [0, 128], sizes = [8, 128], strides = [1, 1]} : vector<8x384xf32> to vector<8x128xf32>
    %298 = arith.addf %296, %297 : vector<8x128xf32>
    %299 = arith.negf %298 : vector<8x128xf32>
    %300 = math.exp %299 : vector<8x128xf32>
    %cst_69 = arith.constant 1.000000e+00 : f32
    %301 = vector.broadcast %cst_69 : f32 to vector<8x128xf32>
    %302 = arith.addf %301, %300 : vector<8x128xf32>
    %303 = arith.divf %301, %302 : vector<8x128xf32>
    %304 = vector.extract_strided_slice %285 {offsets = [0, 256], sizes = [8, 128], strides = [1, 1]} : vector<8x384xf32> to vector<8x128xf32>
    %305 = vector.extract_strided_slice %287 {offsets = [0, 256], sizes = [8, 128], strides = [1, 1]} : vector<8x384xf32> to vector<8x128xf32>
    %306 = arith.addf %305, %13 : vector<8x128xf32>
    %307 = arith.mulf %295, %306 : vector<8x128xf32>
    %308 = arith.addf %304, %307 : vector<8x128xf32>
    %309 = math.tanh %308 : vector<8x128xf32>
    %cst_70 = arith.constant 1.000000e+00 : f32
    %310 = vector.broadcast %cst_70 : f32 to vector<8x128xf32>
    %311 = arith.subf %310, %303 : vector<8x128xf32>
    %312 = arith.mulf %311, %309 : vector<8x128xf32>
    %313 = arith.mulf %303, %279 : vector<8x128xf32>
    %314 = arith.addf %312, %313 : vector<8x128xf32>
    %315 = vector.broadcast %c7_i32 : i32 to vector<8x128xi32>
    %316 = arith.cmpi sgt, %15, %315 : vector<8x128xi32>
    %317 = arith.select %316, %314, %279 : vector<8x128xi1>, vector<8x128xf32>
    %cst_71 = arith.constant 0.000000e+00 : f32
    %318 = vector.broadcast %cst_71 : f32 to vector<8x128xf32>
    %319 = arith.select %316, %317, %318 : vector<8x128xi1>, vector<8x128xf32>
    %320 = arith.addf %282, %319 : vector<8x128xf32>
    %c8_i32 = arith.constant 8 : i32
    %c1_i32_72 = arith.constant 1 : i32
    %321 = vector.broadcast %c1_i32_72 : i32 to vector<8x1xi32>
    %322 = arith.maxsi %11, %321 : vector<8x1xi32>
    %323 = arith.sitofp %322 : vector<8x1xi32> to vector<8x1xf32>
    %cst_73 = arith.constant 1.000000e+00 : f32
    %324 = vector.broadcast %cst_73 : f32 to vector<8x1xf32>
    %325 = arith.divf %324, %323 : vector<8x1xf32>
    %326 = vector.broadcast %325 : vector<8x1xf32> to vector<8x128xf32>
    %327 = arith.mulf %320, %326 : vector<8x128xf32>
    %c0_74 = arith.constant 0 : index
    %c0_75 = arith.constant 0 : index
    %328 = vector.load %arg13[%c0_74, %c0_75] : memref<8x128xf32, #tpu.memory_space<vmem>>, vector<8x128xf32>
    tpu.vector_store %arg13[%c0_74, %c0_75], %327 {strides = array<i32>} : memref<8x128xf32, #tpu.memory_space<vmem>>, vector<8x128xf32>,
    %c0_76 = arith.constant 0 : index
    %c0_77 = arith.constant 0 : index
    %329 = vector.load %arg1[%c0_76, %c0_77] : memref<64x128xbf16, #tpu.memory_space<vmem>>, vector<64x128xbf16>
    %c0_78 = arith.constant 0 : index
    %c0_79 = arith.constant 0 : index
    %330 = vector.load %arg6[%c0_78, %c0_79] : memref<128x384xbf16, #tpu.memory_space<vmem>>, vector<128x384xbf16>
    %cst_80 = arith.constant dense<0.000000e+00> : vector<64x384xf32>
    %331 = tpu.matmul %329, %330, %cst_80 {dimension_numbers = #tpu.dot_dimension_numbers<[1], [0], [0], [1], [0, 0, 1, 1], [], []>} : vector<64x128xbf16>, vector<128x384xbf16>, vector<64x384xf32> -> vector<64x384xf32>
    %c0_81 = arith.constant 0 : index
    %c0_82 = arith.constant 0 : index
    %332 = vector.load %arg9[%c0_81, %c0_82] : memref<1x384xf32, #tpu.memory_space<vmem>>, vector<1x384xf32>
    %333 = vector.broadcast %332 : vector<1x384xf32> to vector<64x384xf32>
    %334 = arith.addf %331, %333 : vector<64x384xf32>
    %335 = arith.truncf %327 : vector<8x128xf32> to vector<8x128xbf16>
    %c0_83 = arith.constant 0 : index
    %c0_84 = arith.constant 0 : index
    %336 = vector.load %arg7[%c0_83, %c0_84] : memref<128x384xbf16, #tpu.memory_space<vmem>>, vector<128x384xbf16>
    %cst_85 = arith.constant dense<0.000000e+00> : vector<8x384xf32>
    %337 = tpu.matmul %335, %336, %cst_85 {dimension_numbers = #tpu.dot_dimension_numbers<[1], [0], [0], [1], [0, 0, 1, 1], [], []>} : vector<8x128xbf16>, vector<128x384xbf16>, vector<8x384xf32> -> vector<8x384xf32>
    %338 = vector.shape_cast %334 : vector<64x384xf32> to vector<8x8x384xf32>
    %339 = vector.shape_cast %337 : vector<8x384xf32> to vector<1x8x384xf32>
    %340 = vector.broadcast %339 : vector<1x8x384xf32> to vector<8x8x384xf32>
    %341 = arith.addf %338, %340 : vector<8x8x384xf32>
    %c0_86 = arith.constant 0 : index
    %c0_87 = arith.constant 0 : index
    %c0_88 = arith.constant 0 : index
    %342 = vector.load %arg16[%c0_86, %c0_87, %c0_88] : memref<8x8x384xf32, #tpu.memory_space<vmem>>, vector<8x8x384xf32>
    tpu.vector_store %arg16[%c0_86, %c0_87, %c0_88], %341 {strides = array<i32>} : memref<8x8x384xf32, #tpu.memory_space<vmem>>, vector<8x8x384xf32>,
    %c0_89 = arith.constant 0 : index
    %c0_90 = arith.constant 0 : index
    %343 = vector.load %arg8[%c0_89, %c0_90] : memref<128x384xbf16, #tpu.memory_space<vmem>>, vector<128x384xbf16>
    %c0_91 = arith.constant 0 : index
    %c0_92 = arith.constant 0 : index
    %344 = vector.load %arg10[%c0_91, %c0_92] : memref<1x128xf32, #tpu.memory_space<vmem>>, vector<1x128xf32>
    %c0_93 = arith.constant 0 : index
    %c0_94 = arith.constant 0 : index
    %345 = vector.load %arg12[%c0_93, %c0_94] : memref<8x1xi32, #tpu.memory_space<vmem>>, vector<8x1xi32>
    %346 = vector.shape_cast %344 : vector<1x128xf32> to vector<1x128xf32>
    %347 = vector.broadcast %346 : vector<1x128xf32> to vector<8x128xf32>
    %348 = vector.shape_cast %345 : vector<8x1xi32> to vector<8x1xi32>
    %349 = vector.broadcast %348 : vector<8x1xi32> to vector<8x128xi32>
    %cst_95 = arith.constant 0.000000e+00 : f32
    %350 = vector.broadcast %cst_95 : f32 to vector<8x128xf32>
    %c0_i32_96 = arith.constant 0 : i32
    %351 = arith.index_cast %c0_i32_96 : i32 to index
    %c0_97 = arith.constant 0 : index
    %c0_98 = arith.constant 0 : index
    %352 = vector.load %arg16[%351, %c0_97, %c0_98] : memref<8x8x384xf32, #tpu.memory_space<vmem>>, vector<1x8x384xf32>
    %353 = vector.shape_cast %352 : vector<1x8x384xf32> to vector<8x384xf32>
    %354 = arith.truncf %317 : vector<8x128xf32> to vector<8x128xbf16>
    %cst_99 = arith.constant dense<0.000000e+00> : vector<8x384xf32>
    %355 = tpu.matmul %354, %343, %cst_99 {dimension_numbers = #tpu.dot_dimension_numbers<[1], [0], [0], [1], [0, 0, 1, 1], [], []>} : vector<8x128xbf16>, vector<128x384xbf16>, vector<8x384xf32> -> vector<8x384xf32>
    %356 = vector.extract_strided_slice %353 {offsets = [0, 0], sizes = [8, 128], strides = [1, 1]} : vector<8x384xf32> to vector<8x128xf32>
    %357 = vector.extract_strided_slice %355 {offsets = [0, 0], sizes = [8, 128], strides = [1, 1]} : vector<8x384xf32> to vector<8x128xf32>
    %358 = arith.addf %356, %357 : vector<8x128xf32>
    %359 = arith.negf %358 : vector<8x128xf32>
    %360 = math.exp %359 : vector<8x128xf32>
    %cst_100 = arith.constant 1.000000e+00 : f32
    %361 = vector.broadcast %cst_100 : f32 to vector<8x128xf32>
    %362 = arith.addf %361, %360 : vector<8x128xf32>
    %363 = arith.divf %361, %362 : vector<8x128xf32>
    %364 = vector.extract_strided_slice %353 {offsets = [0, 128], sizes = [8, 128], strides = [1, 1]} : vector<8x384xf32> to vector<8x128xf32>
    %365 = vector.extract_strided_slice %355 {offsets = [0, 128], sizes = [8, 128], strides = [1, 1]} : vector<8x384xf32> to vector<8x128xf32>
    %366 = arith.addf %364, %365 : vector<8x128xf32>
    %367 = arith.negf %366 : vector<8x128xf32>
    %368 = math.exp %367 : vector<8x128xf32>
    %cst_101 = arith.constant 1.000000e+00 : f32
    %369 = vector.broadcast %cst_101 : f32 to vector<8x128xf32>
    %370 = arith.addf %369, %368 : vector<8x128xf32>
    %371 = arith.divf %369, %370 : vector<8x128xf32>
    %372 = vector.extract_strided_slice %353 {offsets = [0, 256], sizes = [8, 128], strides = [1, 1]} : vector<8x384xf32> to vector<8x128xf32>
    %373 = vector.extract_strided_slice %355 {offsets = [0, 256], sizes = [8, 128], strides = [1, 1]} : vector<8x384xf32> to vector<8x128xf32>
    %374 = arith.addf %373, %347 : vector<8x128xf32>
    %375 = arith.mulf %363, %374 : vector<8x128xf32>
    %376 = arith.addf %372, %375 : vector<8x128xf32>
    %377 = math.tanh %376 : vector<8x128xf32>
    %cst_102 = arith.constant 1.000000e+00 : f32
    %378 = vector.broadcast %cst_102 : f32 to vector<8x128xf32>
    %379 = arith.subf %378, %371 : vector<8x128xf32>
    %380 = arith.mulf %379, %377 : vector<8x128xf32>
    %381 = arith.mulf %371, %317 : vector<8x128xf32>
    %382 = arith.addf %380, %381 : vector<8x128xf32>
    %383 = vector.broadcast %c0_i32_96 : i32 to vector<8x128xi32>
    %384 = arith.cmpi sgt, %349, %383 : vector<8x128xi32>
    %385 = arith.select %384, %382, %317 : vector<8x128xi1>, vector<8x128xf32>
    %cst_103 = arith.constant 0.000000e+00 : f32
    %386 = vector.broadcast %cst_103 : f32 to vector<8x128xf32>
    %387 = arith.select %384, %385, %386 : vector<8x128xi1>, vector<8x128xf32>
    %388 = arith.addf %350, %387 : vector<8x128xf32>
    %c1_i32_104 = arith.constant 1 : i32
    %389 = arith.index_cast %c1_i32_104 : i32 to index
    %c0_105 = arith.constant 0 : index
    %c0_106 = arith.constant 0 : index
    %390 = vector.load %arg16[%389, %c0_105, %c0_106] : memref<8x8x384xf32, #tpu.memory_space<vmem>>, vector<1x8x384xf32>
    %391 = vector.shape_cast %390 : vector<1x8x384xf32> to vector<8x384xf32>
    %392 = arith.truncf %385 : vector<8x128xf32> to vector<8x128xbf16>
    %cst_107 = arith.constant dense<0.000000e+00> : vector<8x384xf32>
    %393 = tpu.matmul %392, %343, %cst_107 {dimension_numbers = #tpu.dot_dimension_numbers<[1], [0], [0], [1], [0, 0, 1, 1], [], []>} : vector<8x128xbf16>, vector<128x384xbf16>, vector<8x384xf32> -> vector<8x384xf32>
    %394 = vector.extract_strided_slice %391 {offsets = [0, 0], sizes = [8, 128], strides = [1, 1]} : vector<8x384xf32> to vector<8x128xf32>
    %395 = vector.extract_strided_slice %393 {offsets = [0, 0], sizes = [8, 128], strides = [1, 1]} : vector<8x384xf32> to vector<8x128xf32>
    %396 = arith.addf %394, %395 : vector<8x128xf32>
    %397 = arith.negf %396 : vector<8x128xf32>
    %398 = math.exp %397 : vector<8x128xf32>
    %cst_108 = arith.constant 1.000000e+00 : f32
    %399 = vector.broadcast %cst_108 : f32 to vector<8x128xf32>
    %400 = arith.addf %399, %398 : vector<8x128xf32>
    %401 = arith.divf %399, %400 : vector<8x128xf32>
    %402 = vector.extract_strided_slice %391 {offsets = [0, 128], sizes = [8, 128], strides = [1, 1]} : vector<8x384xf32> to vector<8x128xf32>
    %403 = vector.extract_strided_slice %393 {offsets = [0, 128], sizes = [8, 128], strides = [1, 1]} : vector<8x384xf32> to vector<8x128xf32>
    %404 = arith.addf %402, %403 : vector<8x128xf32>
    %405 = arith.negf %404 : vector<8x128xf32>
    %406 = math.exp %405 : vector<8x128xf32>
    %cst_109 = arith.constant 1.000000e+00 : f32
    %407 = vector.broadcast %cst_109 : f32 to vector<8x128xf32>
    %408 = arith.addf %407, %406 : vector<8x128xf32>
    %409 = arith.divf %407, %408 : vector<8x128xf32>
    %410 = vector.extract_strided_slice %391 {offsets = [0, 256], sizes = [8, 128], strides = [1, 1]} : vector<8x384xf32> to vector<8x128xf32>
    %411 = vector.extract_strided_slice %393 {offsets = [0, 256], sizes = [8, 128], strides = [1, 1]} : vector<8x384xf32> to vector<8x128xf32>
    %412 = arith.addf %411, %347 : vector<8x128xf32>
    %413 = arith.mulf %401, %412 : vector<8x128xf32>
    %414 = arith.addf %410, %413 : vector<8x128xf32>
    %415 = math.tanh %414 : vector<8x128xf32>
    %cst_110 = arith.constant 1.000000e+00 : f32
    %416 = vector.broadcast %cst_110 : f32 to vector<8x128xf32>
    %417 = arith.subf %416, %409 : vector<8x128xf32>
    %418 = arith.mulf %417, %415 : vector<8x128xf32>
    %419 = arith.mulf %409, %385 : vector<8x128xf32>
    %420 = arith.addf %418, %419 : vector<8x128xf32>
    %421 = vector.broadcast %c1_i32_104 : i32 to vector<8x128xi32>
    %422 = arith.cmpi sgt, %349, %421 : vector<8x128xi32>
    %423 = arith.select %422, %420, %385 : vector<8x128xi1>, vector<8x128xf32>
    %cst_111 = arith.constant 0.000000e+00 : f32
    %424 = vector.broadcast %cst_111 : f32 to vector<8x128xf32>
    %425 = arith.select %422, %423, %424 : vector<8x128xi1>, vector<8x128xf32>
    %426 = arith.addf %388, %425 : vector<8x128xf32>
    %c2_i32_112 = arith.constant 2 : i32
    %427 = arith.index_cast %c2_i32_112 : i32 to index
    %c0_113 = arith.constant 0 : index
    %c0_114 = arith.constant 0 : index
    %428 = vector.load %arg16[%427, %c0_113, %c0_114] : memref<8x8x384xf32, #tpu.memory_space<vmem>>, vector<1x8x384xf32>
    %429 = vector.shape_cast %428 : vector<1x8x384xf32> to vector<8x384xf32>
    %430 = arith.truncf %423 : vector<8x128xf32> to vector<8x128xbf16>
    %cst_115 = arith.constant dense<0.000000e+00> : vector<8x384xf32>
    %431 = tpu.matmul %430, %343, %cst_115 {dimension_numbers = #tpu.dot_dimension_numbers<[1], [0], [0], [1], [0, 0, 1, 1], [], []>} : vector<8x128xbf16>, vector<128x384xbf16>, vector<8x384xf32> -> vector<8x384xf32>
    %432 = vector.extract_strided_slice %429 {offsets = [0, 0], sizes = [8, 128], strides = [1, 1]} : vector<8x384xf32> to vector<8x128xf32>
    %433 = vector.extract_strided_slice %431 {offsets = [0, 0], sizes = [8, 128], strides = [1, 1]} : vector<8x384xf32> to vector<8x128xf32>
    %434 = arith.addf %432, %433 : vector<8x128xf32>
    %435 = arith.negf %434 : vector<8x128xf32>
    %436 = math.exp %435 : vector<8x128xf32>
    %cst_116 = arith.constant 1.000000e+00 : f32
    %437 = vector.broadcast %cst_116 : f32 to vector<8x128xf32>
    %438 = arith.addf %437, %436 : vector<8x128xf32>
    %439 = arith.divf %437, %438 : vector<8x128xf32>
    %440 = vector.extract_strided_slice %429 {offsets = [0, 128], sizes = [8, 128], strides = [1, 1]} : vector<8x384xf32> to vector<8x128xf32>
    %441 = vector.extract_strided_slice %431 {offsets = [0, 128], sizes = [8, 128], strides = [1, 1]} : vector<8x384xf32> to vector<8x128xf32>
    %442 = arith.addf %440, %441 : vector<8x128xf32>
    %443 = arith.negf %442 : vector<8x128xf32>
    %444 = math.exp %443 : vector<8x128xf32>
    %cst_117 = arith.constant 1.000000e+00 : f32
    %445 = vector.broadcast %cst_117 : f32 to vector<8x128xf32>
    %446 = arith.addf %445, %444 : vector<8x128xf32>
    %447 = arith.divf %445, %446 : vector<8x128xf32>
    %448 = vector.extract_strided_slice %429 {offsets = [0, 256], sizes = [8, 128], strides = [1, 1]} : vector<8x384xf32> to vector<8x128xf32>
    %449 = vector.extract_strided_slice %431 {offsets = [0, 256], sizes = [8, 128], strides = [1, 1]} : vector<8x384xf32> to vector<8x128xf32>
    %450 = arith.addf %449, %347 : vector<8x128xf32>
    %451 = arith.mulf %439, %450 : vector<8x128xf32>
    %452 = arith.addf %448, %451 : vector<8x128xf32>
    %453 = math.tanh %452 : vector<8x128xf32>
    %cst_118 = arith.constant 1.000000e+00 : f32
    %454 = vector.broadcast %cst_118 : f32 to vector<8x128xf32>
    %455 = arith.subf %454, %447 : vector<8x128xf32>
    %456 = arith.mulf %455, %453 : vector<8x128xf32>
    %457 = arith.mulf %447, %423 : vector<8x128xf32>
    %458 = arith.addf %456, %457 : vector<8x128xf32>
    %459 = vector.broadcast %c2_i32_112 : i32 to vector<8x128xi32>
    %460 = arith.cmpi sgt, %349, %459 : vector<8x128xi32>
    %461 = arith.select %460, %458, %423 : vector<8x128xi1>, vector<8x128xf32>
    %cst_119 = arith.constant 0.000000e+00 : f32
    %462 = vector.broadcast %cst_119 : f32 to vector<8x128xf32>
    %463 = arith.select %460, %461, %462 : vector<8x128xi1>, vector<8x128xf32>
    %464 = arith.addf %426, %463 : vector<8x128xf32>
    %c3_i32_120 = arith.constant 3 : i32
    %465 = arith.index_cast %c3_i32_120 : i32 to index
    %c0_121 = arith.constant 0 : index
    %c0_122 = arith.constant 0 : index
    %466 = vector.load %arg16[%465, %c0_121, %c0_122] : memref<8x8x384xf32, #tpu.memory_space<vmem>>, vector<1x8x384xf32>
    %467 = vector.shape_cast %466 : vector<1x8x384xf32> to vector<8x384xf32>
    %468 = arith.truncf %461 : vector<8x128xf32> to vector<8x128xbf16>
    %cst_123 = arith.constant dense<0.000000e+00> : vector<8x384xf32>
    %469 = tpu.matmul %468, %343, %cst_123 {dimension_numbers = #tpu.dot_dimension_numbers<[1], [0], [0], [1], [0, 0, 1, 1], [], []>} : vector<8x128xbf16>, vector<128x384xbf16>, vector<8x384xf32> -> vector<8x384xf32>
    %470 = vector.extract_strided_slice %467 {offsets = [0, 0], sizes = [8, 128], strides = [1, 1]} : vector<8x384xf32> to vector<8x128xf32>
    %471 = vector.extract_strided_slice %469 {offsets = [0, 0], sizes = [8, 128], strides = [1, 1]} : vector<8x384xf32> to vector<8x128xf32>
    %472 = arith.addf %470, %471 : vector<8x128xf32>
    %473 = arith.negf %472 : vector<8x128xf32>
    %474 = math.exp %473 : vector<8x128xf32>
    %cst_124 = arith.constant 1.000000e+00 : f32
    %475 = vector.broadcast %cst_124 : f32 to vector<8x128xf32>
    %476 = arith.addf %475, %474 : vector<8x128xf32>
    %477 = arith.divf %475, %476 : vector<8x128xf32>
    %478 = vector.extract_strided_slice %467 {offsets = [0, 128], sizes = [8, 128], strides = [1, 1]} : vector<8x384xf32> to vector<8x128xf32>
    %479 = vector.extract_strided_slice %469 {offsets = [0, 128], sizes = [8, 128], strides = [1, 1]} : vector<8x384xf32> to vector<8x128xf32>
    %480 = arith.addf %478, %479 : vector<8x128xf32>
    %481 = arith.negf %480 : vector<8x128xf32>
    %482 = math.exp %481 : vector<8x128xf32>
    %cst_125 = arith.constant 1.000000e+00 : f32
    %483 = vector.broadcast %cst_125 : f32 to vector<8x128xf32>
    %484 = arith.addf %483, %482 : vector<8x128xf32>
    %485 = arith.divf %483, %484 : vector<8x128xf32>
    %486 = vector.extract_strided_slice %467 {offsets = [0, 256], sizes = [8, 128], strides = [1, 1]} : vector<8x384xf32> to vector<8x128xf32>
    %487 = vector.extract_strided_slice %469 {offsets = [0, 256], sizes = [8, 128], strides = [1, 1]} : vector<8x384xf32> to vector<8x128xf32>
    %488 = arith.addf %487, %347 : vector<8x128xf32>
    %489 = arith.mulf %477, %488 : vector<8x128xf32>
    %490 = arith.addf %486, %489 : vector<8x128xf32>
    %491 = math.tanh %490 : vector<8x128xf32>
    %cst_126 = arith.constant 1.000000e+00 : f32
    %492 = vector.broadcast %cst_126 : f32 to vector<8x128xf32>
    %493 = arith.subf %492, %485 : vector<8x128xf32>
    %494 = arith.mulf %493, %491 : vector<8x128xf32>
    %495 = arith.mulf %485, %461 : vector<8x128xf32>
    %496 = arith.addf %494, %495 : vector<8x128xf32>
    %497 = vector.broadcast %c3_i32_120 : i32 to vector<8x128xi32>
    %498 = arith.cmpi sgt, %349, %497 : vector<8x128xi32>
    %499 = arith.select %498, %496, %461 : vector<8x128xi1>, vector<8x128xf32>
    %cst_127 = arith.constant 0.000000e+00 : f32
    %500 = vector.broadcast %cst_127 : f32 to vector<8x128xf32>
    %501 = arith.select %498, %499, %500 : vector<8x128xi1>, vector<8x128xf32>
    %502 = arith.addf %464, %501 : vector<8x128xf32>
    %c4_i32_128 = arith.constant 4 : i32
    %503 = arith.index_cast %c4_i32_128 : i32 to index
    %c0_129 = arith.constant 0 : index
    %c0_130 = arith.constant 0 : index
    %504 = vector.load %arg16[%503, %c0_129, %c0_130] : memref<8x8x384xf32, #tpu.memory_space<vmem>>, vector<1x8x384xf32>
    %505 = vector.shape_cast %504 : vector<1x8x384xf32> to vector<8x384xf32>
    %506 = arith.truncf %499 : vector<8x128xf32> to vector<8x128xbf16>
    %cst_131 = arith.constant dense<0.000000e+00> : vector<8x384xf32>
    %507 = tpu.matmul %506, %343, %cst_131 {dimension_numbers = #tpu.dot_dimension_numbers<[1], [0], [0], [1], [0, 0, 1, 1], [], []>} : vector<8x128xbf16>, vector<128x384xbf16>, vector<8x384xf32> -> vector<8x384xf32>
    %508 = vector.extract_strided_slice %505 {offsets = [0, 0], sizes = [8, 128], strides = [1, 1]} : vector<8x384xf32> to vector<8x128xf32>
    %509 = vector.extract_strided_slice %507 {offsets = [0, 0], sizes = [8, 128], strides = [1, 1]} : vector<8x384xf32> to vector<8x128xf32>
    %510 = arith.addf %508, %509 : vector<8x128xf32>
    %511 = arith.negf %510 : vector<8x128xf32>
    %512 = math.exp %511 : vector<8x128xf32>
    %cst_132 = arith.constant 1.000000e+00 : f32
    %513 = vector.broadcast %cst_132 : f32 to vector<8x128xf32>
    %514 = arith.addf %513, %512 : vector<8x128xf32>
    %515 = arith.divf %513, %514 : vector<8x128xf32>
    %516 = vector.extract_strided_slice %505 {offsets = [0, 128], sizes = [8, 128], strides = [1, 1]} : vector<8x384xf32> to vector<8x128xf32>
    %517 = vector.extract_strided_slice %507 {offsets = [0, 128], sizes = [8, 128], strides = [1, 1]} : vector<8x384xf32> to vector<8x128xf32>
    %518 = arith.addf %516, %517 : vector<8x128xf32>
    %519 = arith.negf %518 : vector<8x128xf32>
    %520 = math.exp %519 : vector<8x128xf32>
    %cst_133 = arith.constant 1.000000e+00 : f32
    %521 = vector.broadcast %cst_133 : f32 to vector<8x128xf32>
    %522 = arith.addf %521, %520 : vector<8x128xf32>
    %523 = arith.divf %521, %522 : vector<8x128xf32>
    %524 = vector.extract_strided_slice %505 {offsets = [0, 256], sizes = [8, 128], strides = [1, 1]} : vector<8x384xf32> to vector<8x128xf32>
    %525 = vector.extract_strided_slice %507 {offsets = [0, 256], sizes = [8, 128], strides = [1, 1]} : vector<8x384xf32> to vector<8x128xf32>
    %526 = arith.addf %525, %347 : vector<8x128xf32>
    %527 = arith.mulf %515, %526 : vector<8x128xf32>
    %528 = arith.addf %524, %527 : vector<8x128xf32>
    %529 = math.tanh %528 : vector<8x128xf32>
    %cst_134 = arith.constant 1.000000e+00 : f32
    %530 = vector.broadcast %cst_134 : f32 to vector<8x128xf32>
    %531 = arith.subf %530, %523 : vector<8x128xf32>
    %532 = arith.mulf %531, %529 : vector<8x128xf32>
    %533 = arith.mulf %523, %499 : vector<8x128xf32>
    %534 = arith.addf %532, %533 : vector<8x128xf32>
    %535 = vector.broadcast %c4_i32_128 : i32 to vector<8x128xi32>
    %536 = arith.cmpi sgt, %349, %535 : vector<8x128xi32>
    %537 = arith.select %536, %534, %499 : vector<8x128xi1>, vector<8x128xf32>
    %cst_135 = arith.constant 0.000000e+00 : f32
    %538 = vector.broadcast %cst_135 : f32 to vector<8x128xf32>
    %539 = arith.select %536, %537, %538 : vector<8x128xi1>, vector<8x128xf32>
    %540 = arith.addf %502, %539 : vector<8x128xf32>
    %c5_i32_136 = arith.constant 5 : i32
    %541 = arith.index_cast %c5_i32_136 : i32 to index
    %c0_137 = arith.constant 0 : index
    %c0_138 = arith.constant 0 : index
    %542 = vector.load %arg16[%541, %c0_137, %c0_138] : memref<8x8x384xf32, #tpu.memory_space<vmem>>, vector<1x8x384xf32>
    %543 = vector.shape_cast %542 : vector<1x8x384xf32> to vector<8x384xf32>
    %544 = arith.truncf %537 : vector<8x128xf32> to vector<8x128xbf16>
    %cst_139 = arith.constant dense<0.000000e+00> : vector<8x384xf32>
    %545 = tpu.matmul %544, %343, %cst_139 {dimension_numbers = #tpu.dot_dimension_numbers<[1], [0], [0], [1], [0, 0, 1, 1], [], []>} : vector<8x128xbf16>, vector<128x384xbf16>, vector<8x384xf32> -> vector<8x384xf32>
    %546 = vector.extract_strided_slice %543 {offsets = [0, 0], sizes = [8, 128], strides = [1, 1]} : vector<8x384xf32> to vector<8x128xf32>
    %547 = vector.extract_strided_slice %545 {offsets = [0, 0], sizes = [8, 128], strides = [1, 1]} : vector<8x384xf32> to vector<8x128xf32>
    %548 = arith.addf %546, %547 : vector<8x128xf32>
    %549 = arith.negf %548 : vector<8x128xf32>
    %550 = math.exp %549 : vector<8x128xf32>
    %cst_140 = arith.constant 1.000000e+00 : f32
    %551 = vector.broadcast %cst_140 : f32 to vector<8x128xf32>
    %552 = arith.addf %551, %550 : vector<8x128xf32>
    %553 = arith.divf %551, %552 : vector<8x128xf32>
    %554 = vector.extract_strided_slice %543 {offsets = [0, 128], sizes = [8, 128], strides = [1, 1]} : vector<8x384xf32> to vector<8x128xf32>
    %555 = vector.extract_strided_slice %545 {offsets = [0, 128], sizes = [8, 128], strides = [1, 1]} : vector<8x384xf32> to vector<8x128xf32>
    %556 = arith.addf %554, %555 : vector<8x128xf32>
    %557 = arith.negf %556 : vector<8x128xf32>
    %558 = math.exp %557 : vector<8x128xf32>
    %cst_141 = arith.constant 1.000000e+00 : f32
    %559 = vector.broadcast %cst_141 : f32 to vector<8x128xf32>
    %560 = arith.addf %559, %558 : vector<8x128xf32>
    %561 = arith.divf %559, %560 : vector<8x128xf32>
    %562 = vector.extract_strided_slice %543 {offsets = [0, 256], sizes = [8, 128], strides = [1, 1]} : vector<8x384xf32> to vector<8x128xf32>
    %563 = vector.extract_strided_slice %545 {offsets = [0, 256], sizes = [8, 128], strides = [1, 1]} : vector<8x384xf32> to vector<8x128xf32>
    %564 = arith.addf %563, %347 : vector<8x128xf32>
    %565 = arith.mulf %553, %564 : vector<8x128xf32>
    %566 = arith.addf %562, %565 : vector<8x128xf32>
    %567 = math.tanh %566 : vector<8x128xf32>
    %cst_142 = arith.constant 1.000000e+00 : f32
    %568 = vector.broadcast %cst_142 : f32 to vector<8x128xf32>
    %569 = arith.subf %568, %561 : vector<8x128xf32>
    %570 = arith.mulf %569, %567 : vector<8x128xf32>
    %571 = arith.mulf %561, %537 : vector<8x128xf32>
    %572 = arith.addf %570, %571 : vector<8x128xf32>
    %573 = vector.broadcast %c5_i32_136 : i32 to vector<8x128xi32>
    %574 = arith.cmpi sgt, %349, %573 : vector<8x128xi32>
    %575 = arith.select %574, %572, %537 : vector<8x128xi1>, vector<8x128xf32>
    %cst_143 = arith.constant 0.000000e+00 : f32
    %576 = vector.broadcast %cst_143 : f32 to vector<8x128xf32>
    %577 = arith.select %574, %575, %576 : vector<8x128xi1>, vector<8x128xf32>
    %578 = arith.addf %540, %577 : vector<8x128xf32>
    %c6_i32_144 = arith.constant 6 : i32
    %579 = arith.index_cast %c6_i32_144 : i32 to index
    %c0_145 = arith.constant 0 : index
    %c0_146 = arith.constant 0 : index
    %580 = vector.load %arg16[%579, %c0_145, %c0_146] : memref<8x8x384xf32, #tpu.memory_space<vmem>>, vector<1x8x384xf32>
    %581 = vector.shape_cast %580 : vector<1x8x384xf32> to vector<8x384xf32>
    %582 = arith.truncf %575 : vector<8x128xf32> to vector<8x128xbf16>
    %cst_147 = arith.constant dense<0.000000e+00> : vector<8x384xf32>
    %583 = tpu.matmul %582, %343, %cst_147 {dimension_numbers = #tpu.dot_dimension_numbers<[1], [0], [0], [1], [0, 0, 1, 1], [], []>} : vector<8x128xbf16>, vector<128x384xbf16>, vector<8x384xf32> -> vector<8x384xf32>
    %584 = vector.extract_strided_slice %581 {offsets = [0, 0], sizes = [8, 128], strides = [1, 1]} : vector<8x384xf32> to vector<8x128xf32>
    %585 = vector.extract_strided_slice %583 {offsets = [0, 0], sizes = [8, 128], strides = [1, 1]} : vector<8x384xf32> to vector<8x128xf32>
    %586 = arith.addf %584, %585 : vector<8x128xf32>
    %587 = arith.negf %586 : vector<8x128xf32>
    %588 = math.exp %587 : vector<8x128xf32>
    %cst_148 = arith.constant 1.000000e+00 : f32
    %589 = vector.broadcast %cst_148 : f32 to vector<8x128xf32>
    %590 = arith.addf %589, %588 : vector<8x128xf32>
    %591 = arith.divf %589, %590 : vector<8x128xf32>
    %592 = vector.extract_strided_slice %581 {offsets = [0, 128], sizes = [8, 128], strides = [1, 1]} : vector<8x384xf32> to vector<8x128xf32>
    %593 = vector.extract_strided_slice %583 {offsets = [0, 128], sizes = [8, 128], strides = [1, 1]} : vector<8x384xf32> to vector<8x128xf32>
    %594 = arith.addf %592, %593 : vector<8x128xf32>
    %595 = arith.negf %594 : vector<8x128xf32>
    %596 = math.exp %595 : vector<8x128xf32>
    %cst_149 = arith.constant 1.000000e+00 : f32
    %597 = vector.broadcast %cst_149 : f32 to vector<8x128xf32>
    %598 = arith.addf %597, %596 : vector<8x128xf32>
    %599 = arith.divf %597, %598 : vector<8x128xf32>
    %600 = vector.extract_strided_slice %581 {offsets = [0, 256], sizes = [8, 128], strides = [1, 1]} : vector<8x384xf32> to vector<8x128xf32>
    %601 = vector.extract_strided_slice %583 {offsets = [0, 256], sizes = [8, 128], strides = [1, 1]} : vector<8x384xf32> to vector<8x128xf32>
    %602 = arith.addf %601, %347 : vector<8x128xf32>
    %603 = arith.mulf %591, %602 : vector<8x128xf32>
    %604 = arith.addf %600, %603 : vector<8x128xf32>
    %605 = math.tanh %604 : vector<8x128xf32>
    %cst_150 = arith.constant 1.000000e+00 : f32
    %606 = vector.broadcast %cst_150 : f32 to vector<8x128xf32>
    %607 = arith.subf %606, %599 : vector<8x128xf32>
    %608 = arith.mulf %607, %605 : vector<8x128xf32>
    %609 = arith.mulf %599, %575 : vector<8x128xf32>
    %610 = arith.addf %608, %609 : vector<8x128xf32>
    %611 = vector.broadcast %c6_i32_144 : i32 to vector<8x128xi32>
    %612 = arith.cmpi sgt, %349, %611 : vector<8x128xi32>
    %613 = arith.select %612, %610, %575 : vector<8x128xi1>, vector<8x128xf32>
    %cst_151 = arith.constant 0.000000e+00 : f32
    %614 = vector.broadcast %cst_151 : f32 to vector<8x128xf32>
    %615 = arith.select %612, %613, %614 : vector<8x128xi1>, vector<8x128xf32>
    %616 = arith.addf %578, %615 : vector<8x128xf32>
    %c7_i32_152 = arith.constant 7 : i32
    %617 = arith.index_cast %c7_i32_152 : i32 to index
    %c0_153 = arith.constant 0 : index
    %c0_154 = arith.constant 0 : index
    %618 = vector.load %arg16[%617, %c0_153, %c0_154] : memref<8x8x384xf32, #tpu.memory_space<vmem>>, vector<1x8x384xf32>
    %619 = vector.shape_cast %618 : vector<1x8x384xf32> to vector<8x384xf32>
    %620 = arith.truncf %613 : vector<8x128xf32> to vector<8x128xbf16>
    %cst_155 = arith.constant dense<0.000000e+00> : vector<8x384xf32>
    %621 = tpu.matmul %620, %343, %cst_155 {dimension_numbers = #tpu.dot_dimension_numbers<[1], [0], [0], [1], [0, 0, 1, 1], [], []>} : vector<8x128xbf16>, vector<128x384xbf16>, vector<8x384xf32> -> vector<8x384xf32>
    %622 = vector.extract_strided_slice %619 {offsets = [0, 0], sizes = [8, 128], strides = [1, 1]} : vector<8x384xf32> to vector<8x128xf32>
    %623 = vector.extract_strided_slice %621 {offsets = [0, 0], sizes = [8, 128], strides = [1, 1]} : vector<8x384xf32> to vector<8x128xf32>
    %624 = arith.addf %622, %623 : vector<8x128xf32>
    %625 = arith.negf %624 : vector<8x128xf32>
    %626 = math.exp %625 : vector<8x128xf32>
    %cst_156 = arith.constant 1.000000e+00 : f32
    %627 = vector.broadcast %cst_156 : f32 to vector<8x128xf32>
    %628 = arith.addf %627, %626 : vector<8x128xf32>
    %629 = arith.divf %627, %628 : vector<8x128xf32>
    %630 = vector.extract_strided_slice %619 {offsets = [0, 128], sizes = [8, 128], strides = [1, 1]} : vector<8x384xf32> to vector<8x128xf32>
    %631 = vector.extract_strided_slice %621 {offsets = [0, 128], sizes = [8, 128], strides = [1, 1]} : vector<8x384xf32> to vector<8x128xf32>
    %632 = arith.addf %630, %631 : vector<8x128xf32>
    %633 = arith.negf %632 : vector<8x128xf32>
    %634 = math.exp %633 : vector<8x128xf32>
    %cst_157 = arith.constant 1.000000e+00 : f32
    %635 = vector.broadcast %cst_157 : f32 to vector<8x128xf32>
    %636 = arith.addf %635, %634 : vector<8x128xf32>
    %637 = arith.divf %635, %636 : vector<8x128xf32>
    %638 = vector.extract_strided_slice %619 {offsets = [0, 256], sizes = [8, 128], strides = [1, 1]} : vector<8x384xf32> to vector<8x128xf32>
    %639 = vector.extract_strided_slice %621 {offsets = [0, 256], sizes = [8, 128], strides = [1, 1]} : vector<8x384xf32> to vector<8x128xf32>
    %640 = arith.addf %639, %347 : vector<8x128xf32>
    %641 = arith.mulf %629, %640 : vector<8x128xf32>
    %642 = arith.addf %638, %641 : vector<8x128xf32>
    %643 = math.tanh %642 : vector<8x128xf32>
    %cst_158 = arith.constant 1.000000e+00 : f32
    %644 = vector.broadcast %cst_158 : f32 to vector<8x128xf32>
    %645 = arith.subf %644, %637 : vector<8x128xf32>
    %646 = arith.mulf %645, %643 : vector<8x128xf32>
    %647 = arith.mulf %637, %613 : vector<8x128xf32>
    %648 = arith.addf %646, %647 : vector<8x128xf32>
    %649 = vector.broadcast %c7_i32_152 : i32 to vector<8x128xi32>
    %650 = arith.cmpi sgt, %349, %649 : vector<8x128xi32>
    %651 = arith.select %650, %648, %613 : vector<8x128xi1>, vector<8x128xf32>
    %cst_159 = arith.constant 0.000000e+00 : f32
    %652 = vector.broadcast %cst_159 : f32 to vector<8x128xf32>
    %653 = arith.select %650, %651, %652 : vector<8x128xi1>, vector<8x128xf32>
    %654 = arith.addf %616, %653 : vector<8x128xf32>
    %c8_i32_160 = arith.constant 8 : i32
    %c1_i32_161 = arith.constant 1 : i32
    %655 = vector.broadcast %c1_i32_161 : i32 to vector<8x1xi32>
    %656 = arith.maxsi %345, %655 : vector<8x1xi32>
    %657 = arith.sitofp %656 : vector<8x1xi32> to vector<8x1xf32>
    %cst_162 = arith.constant 1.000000e+00 : f32
    %658 = vector.broadcast %cst_162 : f32 to vector<8x1xf32>
    %659 = arith.divf %658, %657 : vector<8x1xf32>
    %660 = vector.broadcast %659 : vector<8x1xf32> to vector<8x128xf32>
    %661 = arith.mulf %654, %660 : vector<8x128xf32>
    %c0_163 = arith.constant 0 : index
    %c0_164 = arith.constant 0 : index
    %662 = vector.load %arg14[%c0_163, %c0_164] : memref<8x128xf32, #tpu.memory_space<vmem>>, vector<8x128xf32>
    tpu.vector_store %arg14[%c0_163, %c0_164], %661 {strides = array<i32>} : memref<8x128xf32, #tpu.memory_space<vmem>>, vector<8x128xf32>,
    return
  }
}

</mosaic_0001>

<bundles_post_ra>
// kernel: replicated_emb_encoder_forward.1
= control target key start
LH: loop header
LB: loop body
LE: loop exit
PB: predicated region body
PF: predicated region fallthrough
CT: control target
= control target key end

     0   :  { %v3670_v28 = vmov 0   ;;  %s5402_s2 = inlined_call_operand.vmem [shape: bf16[128,384], index: 2, kind: input, shape index: {}]   ;;  %s5403_s3 = inlined_call_operand.vmem [shape: bf16[128,384], index: 3, kind: input, shape index: {}]   ;;  %s5404_s0 = inlined_call_operand.vmem [shape: bf16[64,128], index: 0, kind: input, shape index: {}]   ;;  %s5405_s11 = inlined_call_operand.vmem [shape: s32[8,1], index: 11, kind: input, shape index: {}]   ;;  %s5406_s5 = inlined_call_operand.vmem [shape: f32[1,128], index: 5, kind: input, shape index: {}]   ;;  %s5407_s4 = inlined_call_operand.vmem [shape: f32[1,384], index: 4, kind: input, shape index: {}]   ;;  %s5408_s6 = inlined_call_operand.vmem [shape: bf16[128,384], index: 6, kind: input, shape index: {}]   ;;  %s5409_s8 = inlined_call_operand.vmem [shape: bf16[128,384], index: 8, kind: input, shape index: {}]   ;;  %s5410_s1 = inlined_call_operand.vmem [shape: bf16[64,128], index: 1, kind: input, shape index: {}]   ;;  %s5411_s7 = inlined_call_operand.vmem [shape: bf16[128,384], index: 7, kind: input, shape index: {}]   ;;  %s5412_s13 = inlined_call_operand.vmem [shape: f32[8,128], index: 13, kind: output, shape index: {0}]   ;;  %s5413_s12 = inlined_call_operand.vmem [shape: s32[8,1], index: 12, kind: input, shape index: {}]   ;;  %s5414_s10 = inlined_call_operand.vmem [shape: f32[1,128], index: 10, kind: input, shape index: {}]   ;;  %s5415_s9 = inlined_call_operand.vmem [shape: f32[1,384], index: 9, kind: input, shape index: {}]   ;;  %s5416_s14 = inlined_call_operand.vmem [shape: f32[8,128], index: 14, kind: output, shape index: {1}]  }
   0x1   :  { %v2920_v0 = vld [vmem:[%s5402_s2 + $0xa8] sm:$0xf]  ;;  %v3397_v1 = vld [vmem:[%s5402_s2 + $0xb0] sm:$0xf0]  ;;  %v2908_v5 = vld [vmem:[%s5402_s2 + $0x90] sm:$0xf]  ;;  %3500 = vset.pattern.permute.xlu0 %v3670_v28  ;;  %3501 = vset.pattern.permute.xlu1 %v3670_v28 }
   0x2   :  { %v3016_v2 = vld [vmem:[%s5403_s3 + $0xa8] sm:$0xf]  ;;  %v2921_v3 = vor.u32 %v3397_v1, %v2920_v0  ;;  %v3421_v4 = vld [vmem:[%s5403_s3 + $0xb0] sm:$0xf0]  ;;  %v3394_v6 = vld [vmem:[%s5402_s2 + $0x98] sm:$0xf0] }
   0x3   :  { %v3764_v7 = vor.u32 %v3421_v4, %v3016_v2  ;;  %v3004_v8 = vld [vmem:[%s5403_s3 + $0x90] sm:$0xf]  ;;  %v3418_v9 = vld [vmem:[%s5403_s3 + $0x98] sm:$0xf0]  ;;  %v2909_v10 = vor.u32 %v3394_v6, %v2908_v5  ;;  %v2896_v12 = vld [vmem:[%s5402_s2 + $0x78] sm:$0xf] }
   0x4   :  { %247 = vmatpush.bf16.msra.mxu0 %v2921_v3  ;;  %v3773_v11 = vor.u32 %v3418_v9, %v3004_v8  ;;  %v3391_v13 = vld [vmem:[%s5402_s2 + $0x80] sm:$0xf0]  ;;  %v2992_v14 = vld [vmem:[%s5403_s3 + $0x78] sm:$0xf]  ;;  %v2884_v18 = vld [vmem:[%s5402_s2 + $0x60] sm:$0xf] }
   0x5   :  { %529 = vmatpush.bf16.msra.mxu3 %v3764_v7  ;;  %v3415_v15 = vld [vmem:[%s5403_s3 + $0x80] sm:$0xf0]  ;;  %v2897_v16 = vor.u32 %v3391_v13, %v2896_v12  ;;  %v3388_v19 = vld [vmem:[%s5402_s2 + $0x68] sm:$0xf0]  ;;  %v2980_v20 = vld [vmem:[%s5403_s3 + $0x60] sm:$0xf] }
   0x6   :  { %v3788_v17 = vor.u32 %v3415_v15, %v2992_v14  ;;  %v3412_v21 = vld [vmem:[%s5403_s3 + $0x68] sm:$0xf0]  ;;  %v2885_v22 = vor.u32 %v3388_v19, %v2884_v18  ;;  %v2872_v23 = vld [vmem:[%s5402_s2 + $0x48] sm:$0xf]  ;;  %v3385_v25 = vld [vmem:[%s5402_s2 + $0x50] sm:$0xf0] }
   0x7   :  { %v3806_v24 = vor.u32 %v3412_v21, %v2980_v20  ;;  %v3396_v26 = vld [vmem:[%s5402_s2 + $0xac] sm:$0xf]  ;;  %v2922_v27 = vld [vmem:[%s5402_s2 + $0xb4] sm:$0xf0]  ;;  %v2968_v29 = vld [vmem:[%s5403_s3 + $0x48] sm:$0xf]  ;;  %v2873_v34 = vor.u32 %v3385_v25, %v2872_v23 }
   0x8   :  { %248 = vmatpush.bf16.msra.mxu0 %v2909_v10  ;;  %v3409_v30 = vld [vmem:[%s5403_s3 + $0x50] sm:$0xf0]  ;;  %v2925_v31 = vor.u32 %v3396_v26, %v2922_v27  ;;  %v2910_v33 = vld [vmem:[%s5402_s2 + $0x9c] sm:$0xf0]  ;;  %v2860_v35 = vld [vmem:[%s5402_s2 + $0x30] sm:$0xf] }
   0x9   :  { %530 = vmatpush.bf16.msra.mxu3 %v3773_v11  ;;  %v3393_v32 = vld [vmem:[%s5402_s2 + $0x94] sm:$0xf]  ;;  %v3835_v37 = vor.u32 %v3409_v30, %v2968_v29  ;;  %v3382_v38 = vld [vmem:[%s5402_s2 + $0x38] sm:$0xf0]  ;;  %v2898_v40 = vld [vmem:[%s5402_s2 + $0x84] sm:$0xf0] }
   0xa   :  { %276 = vmatpush.bf16.msra.mxu1 %v2925_v31  ;;  %v2913_v36 = vor.u32 %v3393_v32, %v2910_v33  ;;  %v3390_v39 = vld [vmem:[%s5402_s2 + $0x7c] sm:$0xf]  ;;  %v2956_v41 = vld [vmem:[%s5403_s3 + $0x30] sm:$0xf]  ;;  %v2861_v43 = vor.u32 %v3382_v38, %v2860_v35  ;;  %v2848_v44 = vld [vmem:[%s5402_s2 + $0x18] sm:$0xf] }
   0xb   :  { %v3406_v42 = vld [vmem:[%s5403_s3 + $0x38] sm:$0xf0]  ;;  %v3379_v45 = vld [vmem:[%s5402_s2 + $0x20] sm:$0xf0]  ;;  %v2901_v46 = vor.u32 %v3390_v39, %v2898_v40  ;;  %v2944_v48 = vld [vmem:[%s5403_s3 + $0x18] sm:$0xf] }
   0xc   :  { %249 = vmatpush.bf16.msra.mxu0 %v2897_v16  ;;  %v3859_v47 = vor.u32 %v3406_v42, %v2956_v41  ;;  %v3387_v49 = vld [vmem:[%s5402_s2 + $0x64] sm:$0xf]  ;;  %v2886_v50 = vld [vmem:[%s5402_s2 + $0x6c] sm:$0xf0]  ;;  %v3398_v53 = vld [vmem:[%s5402_s2 + $0xb8] sm:$0xf0]  ;;  %v2849_v55 = vor.u32 %v3379_v45, %v2848_v44 }
   0xd   :  { %531 = vmatpush.bf16.msra.mxu3 %v3788_v17  ;;  %v3403_v51 = vld [vmem:[%s5403_s3 + $0x20] sm:$0xf0]  ;;  %v2928_v52 = vld [vmem:[%s5402_s2 + $0xb0] sm:$0xf]  ;;  %v2836_v56 = vld [vmem:[%s5402_s2] sm:$0xf]  ;;  %v2889_v59 = vor.u32 %v3387_v49, %v2886_v50 }
   0xe   :  { %277 = vmatpush.bf16.msra.mxu1 %v2913_v36  ;;  %v2929_v54 = vor.u32 %v3398_v53, %v2928_v52  ;;  %v3376_v57 = vld [vmem:[%s5402_s2 + $0x8] sm:$0xf0]  ;;  %v2932_v58 = vld [vmem:[%s5403_s3] sm:$0xf]  ;;  %v3889_v60 = vor.u32 %v3403_v51, %v2944_v48  ;;  %v2874_v63 = vld [vmem:[%s5402_s2 + $0x54] sm:$0xf0] }
   0xf   :  { %v3400_v61 = vld [vmem:[%s5403_s3 + $0x8] sm:$0xf0]  ;;  %v3024_v0 = vld [vmem:[%s5403_s3 + $0xb0] sm:$0xf]  ;;  %v3422_v1 = vld [vmem:[%s5403_s3 + $0xb8] sm:$0xf0]  ;;  %v2837_v6 = vor.u32 %v3376_v57, %v2836_v56 }
  0x10   :  { %250 = vmatpush.bf16.msra.mxu0 %v2885_v22  ;;  %v3384_v62 = vld [vmem:[%s5402_s2 + $0x4c] sm:$0xf]  ;;  %305 = vmatpush.bf16.msra.mxu2 %v2929_v54  ;;  %v2916_v2 = vld [vmem:[%s5402_s2 + $0x98] sm:$0xf]  ;;  %v3395_v5 = vld [vmem:[%s5402_s2 + $0xa0] sm:$0xf0]  ;;  %v3919_v10 = vor.u32 %v3400_v61, %v2932_v58  ;;  %v3921_v12 = vor.u32 %v3422_v1, %v3024_v0 }
  0x11   :  { %532 = vmatpush.bf16.msra.mxu3 %v3806_v24  ;;  %v3420_v3 = vld [vmem:[%s5403_s3 + $0xac] sm:$0xf]  ;;  %v3018_v4 = vld [vmem:[%s5403_s3 + $0xb4] sm:$0xf0]  ;;  %v2877_v8 = vor.u32 %v3384_v62, %v2874_v63  ;;  %v2917_v9 = vor.u32 %v3395_v5, %v2916_v2  ;;  %v3381_v14 = vld [vmem:[%s5402_s2 + $0x34] sm:$0xf] }
  0x12   :  { %278 = vmatpush.bf16.msra.mxu1 %v2901_v46  ;;  %v3012_v13 = vld [vmem:[%s5403_s3 + $0x98] sm:$0xf]  ;;  %v2862_v15 = vld [vmem:[%s5402_s2 + $0x3c] sm:$0xf0]  ;;  %v3932_v16 = vor.u32 %v3420_v3, %v3018_v4  ;;  %v3419_v18 = vld [vmem:[%s5403_s3 + $0xa0] sm:$0xf0] }
  0x13   :  { %v2904_v19 = vld [vmem:[%s5402_s2 + $0x80] sm:$0xf]  ;;  %v3392_v20 = vld [vmem:[%s5402_s2 + $0x88] sm:$0xf0]  ;;  %v3417_v22 = vld [vmem:[%s5403_s3 + $0x94] sm:$0xf]  ;;  %v2865_v26 = vor.u32 %v3381_v14, %v2862_v15  ;;  %v3956_v27 = vor.u32 %v3419_v18, %v3012_v13 }
  0x14   :  { %251 = vmatpush.bf16.msra.mxu0 %v2873_v34  ;;  %306 = vmatpush.bf16.msra.mxu2 %v2917_v9  ;;  %v3946_v21 = vld [vmem:[%s5404_s0] sm:$0xff]  ;;  %v2905_v25 = vor.u32 %v3392_v20, %v2904_v19  ;;  %v3378_v30 = vld [vmem:[%s5402_s2 + $0x1c] sm:$0xf]  ;;  %v2850_v31 = vld [vmem:[%s5402_s2 + $0x24] sm:$0xf0] }
  0x15   :  { %533 = vmatpush.bf16.msra.mxu3 %v3835_v37  ;;  %v3006_v23 = vld [vmem:[%s5403_s3 + $0x9c] sm:$0xf0]  ;;  %v3416_v33 = vld [vmem:[%s5403_s3 + $0x88] sm:$0xf0]  ;;  %v2892_v34 = vld [vmem:[%s5402_s2 + $0x68] sm:$0xf]  ;;  %v2853_v41 = vor.u32 %v3378_v30, %v2850_v31 }
  0x16   :  { %279 = vmatpush.bf16.msra.mxu1 %v2889_v59  ;;  %v3000_v29 = vld [vmem:[%s5403_s3 + $0x80] sm:$0xf]  ;;  %v3968_v32 = vor.u32 %v3417_v22, %v3006_v23  ;;  %v3389_v35 = vld [vmem:[%s5402_s2 + $0x70] sm:$0xf0]  ;;  %v3414_v36 = vld [vmem:[%s5403_s3 + $0x7c] sm:$0xf] }
  0x17   :  { %v2994_v38 = vld [vmem:[%s5403_s3 + $0x84] sm:$0xf0]  ;;  %v2893_v39 = vor.u32 %v3389_v35, %v2892_v34  ;;  %v2880_v40 = vld [vmem:[%s5402_s2 + $0x50] sm:$0xf]  ;;  %v3386_v42 = vld [vmem:[%s5402_s2 + $0x58] sm:$0xf0] }
  0x18   :  { %252 = vmatpush.bf16.msra.mxu0 %v2861_v43  ;;  %307 = vmatpush.bf16.msra.mxu2 %v2905_v25  ;;  %v3994_v43 = vor.u32 %v3416_v33, %v3000_v29  ;;  %v3375_v44 = vld [vmem:[%s5402_s2 + $0x4] sm:$0xf]  ;;  %v2838_v45 = vld [vmem:[%s5402_s2 + $0xc] sm:$0xf0]  ;;  %v4003_v46 = vor.u32 %v3414_v36, %v2994_v38  ;;  %v2988_v49 = vld [vmem:[%s5403_s3 + $0x68] sm:$0xf]  ;;  %v2881_v51 = vor.u32 %v3386_v42, %v2880_v40 }
  0x19   :  { %534 = vmatpush.bf16.msra.mxu3 %v3859_v47  ;;  %v3411_v48 = vld [vmem:[%s5403_s3 + $0x64] sm:$0xf]  ;;  %v3413_v50 = vld [vmem:[%s5403_s3 + $0x70] sm:$0xf0]  ;;  %v2982_v52 = vld [vmem:[%s5403_s3 + $0x6c] sm:$0xf0] }
  0x1a   :  { %280 = vmatpush.bf16.msra.mxu1 %v2877_v8  ;;  %v2868_v53 = vld [vmem:[%s5402_s2 + $0x38] sm:$0xf]  ;;  %v3383_v54 = vld [vmem:[%s5402_s2 + $0x40] sm:$0xf0]  ;;  %v4024_v56 = vor.u32 %v3413_v50, %v2988_v49  ;;  %v4027_v57 = vor.u32 %v3411_v48, %v2982_v52  ;;  %v3408_v58 = vld [vmem:[%s5403_s3 + $0x4c] sm:$0xf] }
  0x1b   :  { %v2976_v59 = vld [vmem:[%s5403_s3 + $0x50] sm:$0xf]  ;;  %v3410_v61 = vld [vmem:[%s5403_s3 + $0x58] sm:$0xf0]  ;;  %v2869_v62 = vor.u32 %v3383_v54, %v2868_v53  ;;  %v2970_v63 = vld [vmem:[%s5403_s3 + $0x54] sm:$0xf0] }
  0x1c   :  { %253 = vmatpush.bf16.msra.mxu0 %v2849_v55  ;;  %308 = vmatpush.bf16.msra.mxu2 %v2893_v39  ;;  %v2841_v55 = vor.u32 %v3375_v44, %v2838_v45  ;;  %v2856_v0 = vld [vmem:[%s5402_s2 + $0x20] sm:$0xf]  ;;  %v3380_v1 = vld [vmem:[%s5402_s2 + $0x28] sm:$0xf0]  ;;  %v4048_v2 = vor.u32 %v3410_v61, %v2976_v59  ;;  %v4052_v3 = vor.u32 %v3408_v58, %v2970_v63  ;;  %v2964_v4 = vld [vmem:[%s5403_s3 + $0x38] sm:$0xf] }
  0x1d   :  { %535 = vmatpush.bf16.msra.mxu3 %v3889_v60  ;;  %v3407_v5 = vld [vmem:[%s5403_s3 + $0x40] sm:$0xf0]  ;;  %v3372_v8 = vld [vmem:[%s5404_s0 + $0x8] sm:$0xff]  ;;  %v3405_v9 = vld [vmem:[%s5403_s3 + $0x34] sm:$0xf] }
  0x1e   :  { %281 = vmatpush.bf16.msra.mxu1 %v2865_v26  ;;  %v2958_v13 = vld [vmem:[%s5403_s3 + $0x3c] sm:$0xf0]  ;;  %v4071_v14 = vor.u32 %v3407_v5, %v2964_v4  ;;  %v3402_v18 = vld [vmem:[%s5403_s3 + $0x1c] sm:$0xf]  ;;  %v2844_v19 = vld [vmem:[%s5402_s2 + $0x8] sm:$0xf] }
  0x1f   :  { %v4075_v15 = vor.u32 %v3405_v9, %v2958_v13  ;;  %v3377_v20 = vld [vmem:[%s5402_s2 + $0x10] sm:$0xf0]  ;;  %v2946_v22 = vld [vmem:[%s5403_s3 + $0x24] sm:$0xf0]  ;;  %v2952_v23 = vld [vmem:[%s5403_s3 + $0x20] sm:$0xf] }
  0x20   :  { %254 = vmatpush.bf16.msra.mxu0 %v2837_v6  ;;  %309 = vmatpush.bf16.msra.mxu2 %v2881_v51  ;;  %v2857_v6 = vor.u32 %v3380_v1, %v2856_v0  ;;  %v3404_v25 = vld [vmem:[%s5403_s3 + $0x28] sm:$0xf0]  ;;  %v2845_v26 = vor.u32 %v3377_v20, %v2844_v19  ;;  %v4100_v30 = vor.u32 %v3402_v18, %v2946_v22  ;;  %v2940_v31 = vld [vmem:[%s5403_s3 + $0x8] sm:$0xf]  ;;  %v3401_v33 = vld [vmem:[%s5403_s3 + $0x10] sm:$0xf0] }
  0x21   :  { %536 = vmatpush.bf16.msra.mxu3 %v3919_v10  ;;  %v4096_v29 = vor.u32 %v3404_v25, %v2952_v23  ;;  %v3399_v34 = vld [vmem:[%s5403_s3 + $0x4] sm:$0xf]  ;;  %v2934_v35 = vld [vmem:[%s5403_s3 + $0xc] sm:$0xf0]  ;;  %v4117_v36 = vor.u32 %v3401_v33, %v2940_v31  ;;  %v3374_v44 = vld [vmem:[%s5404_s0 + $0x18] sm:$0xff] }
  0x22   :  { %282 = vmatpush.bf16.msra.mxu1 %v2853_v41  ;;  %v4120_v38 = vor.u32 %v3399_v34, %v2934_v35  ;;  %v391_v39 = vld [vmem:[%s5405_s11] sm:$0xff] }
  0x23   :  { %255 = vmatmul.bf16.vlgmr.msra.gmra.mxu0 %v3946_v21  ;;  %396 = vperm.xlu0 %3500, %v391_v39   ;;  %vm1291_vm0 = vcmp.gt.s32.totalorder %v391_v39, 1  ;;  %v87_v59 = vld [vmem:[%s5407_s4] sm:$0x7] }
  0x24   :  { %555 = vmatpush.bf16.msrb.mxu0 %v3921_v12  ;;  %537 = vmatmul.bf16.vlgmr.msra.gmra.mxu3 %v3670_v28  ;;  %v1292_v40 = vsel %vm1291_vm0, %v391_v39, 1  ;;  %v4208_v9 = vperm.slane %v87_v59, 1 }
  0x25   :  { %542 = vmatpush.bf16.msrb.mxu3 %v3932_v16  ;;  %310 = vmatpush.bf16.msra.mxu2 %v2869_v62  ;;  %v1293_v41 = vcvt.s32.f32 %v1292_v40  ;;  %v4200_v62 = vperm.slane %v87_v59, 0 }
  0x26   :  { %283 = vmatpush.bf16.msra.mxu1 %v2841_v55 }
  0x27   :  { %3504 = vrcp.f32 %v1293_v41  ;;  %v1305_v48 = vand.u32 2147483648, %v1293_v41  ;;  %vm1299_vm1 = vweird.f32 %v1293_v41  ;;  %v1303_v50 = vand.u32 2147483647, %v1293_v41 }
  0x28   :  { %556 = vmatpush.bf16.msrb.mxu0 %v3956_v27 }
  0x29   :  { %543 = vmatpush.bf16.msrb.mxu3 %v3968_v32  ;;  %284 = vmatmul.bf16.vlgmr.msra.gmra.mxu1 %v3946_v21  ;;  %v1306_v52 = vor.u32 1.1754944e-38, %v1305_v48  ;;  %vm1304_vm4 = vcmp.eq.f32.partialorder %v1303_v50, 8.507059e+37 }
  0x2a   :  { %624 = vmatpush.bf16.msrb.mxu1 %v3764_v7  ;;  %311 = vmatpush.bf16.msra.mxu2 %v2857_v6 }
  0x2c   :  { %557 = vmatpush.bf16.msrb.mxu0 %v3994_v43 }
  0x2d   :  { %544 = vmatpush.bf16.msrb.mxu3 %v4003_v46  ;;  %v3505_v42 = vpop.eup %3504 }
  0x2e   :  { %625 = vmatpush.bf16.msrb.mxu1 %v3773_v11  ;;  %312 = vmatpush.bf16.msra.mxu2 %v2845_v26  ;;  %v1295_v45 = vmul.f32 %v3505_v42, %v1293_v41  ;;  %vm1300_vm2 = vweird.f32 %v3505_v42 }
  0x2f   :  { %vm1301_vm3 = vmor %vm1299_vm1, %vm1300_vm2 }
  0x30   :  { %558 = vmatpush.bf16.msrb.mxu0 %v4024_v56  ;;  %v1296_v49 = vsub.f32 1.0, %v1295_v45 }
  0x31   :  { %545 = vmatpush.bf16.msrb.mxu3 %v4027_v57  ;;  %313 = vmatmul.bf16.vlgmr.msra.gmra.mxu2 %v3946_v21  ;;  %v3373_v21 = vld [vmem:[%s5404_s0 + $0x10] sm:$0xff] }
  0x32   :  { %626 = vmatpush.bf16.msrb.mxu1 %v3788_v17  ;;  %637 = vmatpush.bf16.msrb.mxu2 %v3932_v16  ;;  %v1297_v51 = vmul.f32 %v3505_v42, %v1296_v49  ;;  %v4221_v49 = vperm.slane %v87_v59, 2 }
  0x33   :  { %260 = vmatmul.bf16.gmra.mxu0 %v3372_v8 }
  0x34   :  { %559 = vmatpush.bf16.msrb.mxu0 %v4048_v2  ;;  %v1298_v53 = vadd.f32 %v3505_v42, %v1297_v51 }
  0x35   :  { %546 = vmatpush.bf16.msrb.mxu3 %v4052_v3 }
  0x36   :  { %627 = vmatpush.bf16.msrb.mxu1 %v3806_v24  ;;  %638 = vmatpush.bf16.msrb.mxu2 %v3968_v32  ;;  %v1302_v54 = vsel %vm1301_vm3, %v3505_v42, %v1298_v53 }
  0x37   :  { %v1307_v55 = vsel %vm1304_vm4, %v1306_v52, %v1302_v54 }
  0x38   :  { %560 = vmatpush.bf16.msrb.mxu0 %v4071_v14  ;;  %1311 = vperm.xlu0 %3500, %v1307_v55  }
  0x39   :  { %547 = vmatpush.bf16.msrb.mxu3 %v4075_v15  ;;  %289 = vmatmul.bf16.gmra.mxu1 %v3372_v8 }
  0x3a   :  { %628 = vmatpush.bf16.msrb.mxu1 %v3835_v37  ;;  %639 = vmatpush.bf16.msrb.mxu2 %v4003_v46 }
  0x3c   :  { %561 = vmatpush.bf16.msrb.mxu0 %v4096_v29 }
  0x3d   :  { %548 = vmatpush.bf16.msrb.mxu3 %v4100_v30 }
  0x3e   :  { %629 = vmatpush.bf16.msrb.mxu1 %v3859_v47  ;;  %640 = vmatpush.bf16.msrb.mxu2 %v4027_v57 }
  0x40   :  { %562 = vmatpush.bf16.msrb.mxu0 %v4117_v36 }
  0x41   :  { %549 = vmatpush.bf16.msrb.mxu3 %v4120_v38  ;;  %318 = vmatmul.bf16.gmra.mxu2 %v3372_v8 }
  0x42   :  { %630 = vmatpush.bf16.msrb.mxu1 %v3889_v60  ;;  %641 = vmatpush.bf16.msrb.mxu2 %v4052_v3 }
  0x43   :  { %265 = vmatmul.bf16.gmra.mxu0 %v3373_v21 }
  0x44   :  { %720 = vmatpush.bf16.msra.mxu0 %v3764_v7  ;;  %550 = vmatmul.bf16.vlgmr.msrb.gmra.mxu3 %v3670_v28 }
  0x45   :  { %650 = vmatpush.bf16.msra.mxu3 %v3921_v12 }
  0x46   :  { %631 = vmatpush.bf16.msrb.mxu1 %v3919_v10  ;;  %642 = vmatpush.bf16.msrb.mxu2 %v4075_v15 }
  0x48   :  { %721 = vmatpush.bf16.msra.mxu0 %v3773_v11 }
  0x49   :  { %651 = vmatpush.bf16.msra.mxu3 %v3956_v27  ;;  %294 = vmatmul.bf16.gmra.mxu1 %v3373_v21 }
  0x4a   :  { %733 = vmatpush.bf16.msra.mxu1 %v3932_v16  ;;  %643 = vmatpush.bf16.msrb.mxu2 %v4100_v30 }
  0x4c   :  { %722 = vmatpush.bf16.msra.mxu0 %v3788_v17 }
  0x4d   :  { %652 = vmatpush.bf16.msra.mxu3 %v3994_v43 }
  0x4e   :  { %734 = vmatpush.bf16.msra.mxu1 %v3968_v32  ;;  %644 = vmatpush.bf16.msrb.mxu2 %v4120_v38 }
  0x50   :  { %723 = vmatpush.bf16.msra.mxu0 %v3806_v24 }
  0x51   :  { %653 = vmatpush.bf16.msra.mxu3 %v4024_v56  ;;  %323 = vmatmul.bf16.gmra.mxu2 %v3373_v21 }
  0x52   :  { %746 = vmatpush.bf16.msra.mxu2 %v3921_v12  ;;  %735 = vmatpush.bf16.msra.mxu1 %v4003_v46 }
  0x53   :  { %270 = vmatmul.bf16.gmra.mxu0 %v3374_v44 }
  0x54   :  { %724 = vmatpush.bf16.msra.mxu0 %v3835_v37 }
  0x55   :  { %654 = vmatpush.bf16.msra.mxu3 %v4048_v2 }
  0x56   :  { %747 = vmatpush.bf16.msra.mxu2 %v3956_v27  ;;  %736 = vmatpush.bf16.msra.mxu1 %v4027_v57 }
  0x58   :  { %725 = vmatpush.bf16.msra.mxu0 %v3859_v47 }
  0x59   :  { %655 = vmatpush.bf16.msra.mxu3 %v4071_v14  ;;  %299 = vmatmul.bf16.gmra.mxu1 %v3374_v44 }
  0x5a   :  { %748 = vmatpush.bf16.msra.mxu2 %v3994_v43  ;;  %737 = vmatpush.bf16.msra.mxu1 %v4052_v3 }
  0x5c   :  { %726 = vmatpush.bf16.msra.mxu0 %v3889_v60 }
  0x5d   :  { %656 = vmatpush.bf16.msra.mxu3 %v4096_v29 }
  0x5e   :  { %749 = vmatpush.bf16.msra.mxu2 %v4024_v56  ;;  %738 = vmatpush.bf16.msra.mxu1 %v4075_v15 }
  0x60   :  { %727 = vmatpush.bf16.msra.mxu0 %v3919_v10 }
  0x61   :  { %657 = vmatpush.bf16.msra.mxu3 %v4117_v36  ;;  %328 = vmatmul.bf16.gmra.mxu2 %v3374_v44 }
  0x62   :  { %750 = vmatpush.bf16.msra.mxu2 %v4048_v2  ;;  %739 = vmatpush.bf16.msra.mxu1 %v4100_v30 }
  0x63   :  { %563 = vmatmul.bf16.vlgmr.msrb.gmra.mxu0 %v3670_v28 }
  0x64   :  { %829 = vmatpush.bf16.msrb.mxu0 %v3932_v16 }
  0x65   :  { %816 = vmatpush.bf16.msrb.mxu3 %v3764_v7 }
  0x66   :  { %751 = vmatpush.bf16.msra.mxu2 %v4071_v14  ;;  %740 = vmatpush.bf16.msra.mxu1 %v4120_v38 }
  0x68   :  { %830 = vmatpush.bf16.msrb.mxu0 %v3968_v32 }
  0x69   :  { %817 = vmatpush.bf16.msrb.mxu3 %v3773_v11 }
  0x6a   :  { %752 = vmatpush.bf16.msra.mxu2 %v4096_v29 }
  0x6c   :  { %831 = vmatpush.bf16.msrb.mxu0 %v4003_v46 }
  0x6d   :  { %818 = vmatpush.bf16.msrb.mxu3 %v3788_v17 }
  0x6e   :  { %753 = vmatpush.bf16.msra.mxu2 %v4117_v36 }
  0x70   :  { %832 = vmatpush.bf16.msrb.mxu0 %v4027_v57 }
  0x71   :  { %819 = vmatpush.bf16.msrb.mxu3 %v3806_v24 }
  0x74   :  { %833 = vmatpush.bf16.msrb.mxu0 %v4052_v3 }
  0x75   :  { %820 = vmatpush.bf16.msrb.mxu3 %v3835_v37 }
  0x78   :  { %834 = vmatpush.bf16.msrb.mxu0 %v4075_v15 }
  0x79   :  { %821 = vmatpush.bf16.msrb.mxu3 %v3859_v47 }
  0x7c   :  { %835 = vmatpush.bf16.msrb.mxu0 %v4100_v30 }
  0x7d   :  { %822 = vmatpush.bf16.msrb.mxu3 %v3889_v60 }
  0x80   :  { %836 = vmatpush.bf16.msrb.mxu0 %v4120_v38 }
  0x81   :  { %823 = vmatpush.bf16.msrb.mxu3 %v3919_v10 }
  0xa0   :  { %v256_v28 = vpop.f32.mrf.mxu0 }
  0xa1   :  { %v257_v63 = vadd.f32 %v256_v28, %v4200_v62 }
  0xa6   :  { %v285_v13 = vpop.f32.mrf.mxu1 }
  0xa7   :  { %v538_v58 = vpop.f32.mrf.mxu3  ;;  %v286_v22 = vadd.f32 %v285_v13, %v4208_v9 }
  0xa8   :  { %v4198_v61 = vpop.f32.mrf.mxu0  ;;  %v568_v4 = vadd.f32 %v538_v58, %v257_v63 }
  0xaa   :  { %v3026_v6 = vmul.f32 -1.442695, %v568_v4 }
  0xac   :  { %3506 = vpow2.f32 %v3026_v6 }
  0xaf   :  { %v540_v0 = vpop.f32.mrf.mxu3 }
  0xb0   :  { %v261_v1 = vpop.f32.mrf.mxu0  ;;  %v4231_v0 = vld [vmem:[%s5406_s5] ss:$0 sm:$0xff] }
  0xb1   :  { %v4204_v5 = vadd.f32 %v261_v1, %v4200_v62 }
  0xb2   :  { %v3507_v18 = vpop.eup %3506 }
  0xb3   :  { %v572_v23 = vadd.f32 1.0, %v3507_v18 }
  0xb4   :  { %v314_v25 = vpop.f32.mrf.mxu2 }
  0xb5   :  { %3508 = vrcp.f32 %v572_v23  ;;  %v584_v63 = vand.u32 2147483648, %v572_v23  ;;  %vm578_vm6 = vweird.f32 %v572_v23  ;;  %v582_v59 = vand.u32 2147483647, %v572_v23 }
  0xb7   :  { %v585_v18 = vor.u32 1.1754944e-38, %v584_v63  ;;  %vm583_vm8 = vcmp.eq.f32.partialorder %v582_v59, 8.507059e+37 }
  0xb8   :  { %v4206_v8 = vpop.f32.mrf.mxu0 }
  0xbb   :  { %v3509_v35 = vpop.eup %3508 }
  0xbc   :  { %v4216_v39 = vpop.f32.mrf.mxu2  ;;  %v574_v41 = vmul.f32 %v3509_v35, %v572_v23  ;;  %vm579_vm5 = vweird.f32 %v3509_v35 }
  0xbd   :  { %vm580_vm7 = vmor %vm578_vm6, %vm579_vm5 }
  0xbe   :  { %v575_v48 = vsub.f32 1.0, %v574_v41 }
  0xc0   :  { %v266_v19 = vpop.f32.mrf.mxu0  ;;  %v576_v52 = vmul.f32 %v3509_v35, %v575_v48 }
  0xc1   :  { %v4211_v20 = vadd.f32 %v266_v19, %v4200_v62  ;;  %v315_v19 = vadd.f32 %v314_v25, %v4221_v49 }
  0xc2   :  { %v577_v58 = vadd.f32 %v3509_v35, %v576_v52 }
  0xc4   :  { %v319_v50 = vpop.f32.mrf.mxu2  ;;  %v581_v6 = vsel %vm580_vm7, %v3509_v35, %v577_v58 }
  0xc5   :  { %v4224_v51 = vadd.f32 %v319_v50, %v4221_v49 }
  0xc7   :  { %v551_v26 = vpop.f32.mrf.mxu3 }
  0xc8   :  { %v588_v31 = vadd.f32 %v551_v26, %v286_v22  ;;  %v4214_v34 = vpop.f32.mrf.mxu0  ;;  %v586_v26 = vsel %vm583_vm8, %v585_v18, %v581_v6  ;;  %v287_v18 = vpop.f32.mrf.mxu1 }
  0xca   :  { %v3027_v33 = vmul.f32 -1.442695, %v588_v31 }
  0xcc   :  { %3510 = vpow2.f32 %v3027_v33  ;;  %v4233_v1 = vpop.f32.mrf.mxu2 }
  0xcf   :  { %v553_v21 = vpop.f32.mrf.mxu3 }
  0xd0   :  { %v271_v44 = vpop.f32.mrf.mxu0 }
  0xd1   :  { %v4219_v45 = vadd.f32 %v271_v44, %v4200_v62 }
  0xd2   :  { %v3511_v40 = vpop.eup %3510 }
  0xd3   :  { %v592_v42 = vadd.f32 1.0, %v3511_v40  ;;  %5425 = vst [vmem:[#allocation4_spill] sm:$0xff] %v4219_v45 }
  0xd4   :  { %v324_v41 = vpop.f32.mrf.mxu2 }
  0xd5   :  { %3512 = vrcp.f32 %v592_v42  ;;  %vm598_vm9 = vweird.f32 %v592_v42  ;;  %v604_v21 = vand.u32 2147483648, %v592_v42  ;;  %v602_v40 = vand.u32 2147483647, %v592_v42 }
  0xd6   :  { %v4238_v35 = vadd.f32 %v324_v41, %v4221_v49 }
  0xd7   :  { %v605_v48 = vor.u32 1.1754944e-38, %v604_v21  ;;  %vm603_vm12 = vcmp.eq.f32.partialorder %v602_v40, 8.507059e+37 }
  0xd8   :  { %v4226_v54 = vpop.f32.mrf.mxu0 }
  0xd9   :  { %5426 = vst [vmem:[#allocation5_spill] sm:$0xff] %v4226_v54 }
  0xdb   :  { %v3513_v53 = vpop.eup %3512 }
  0xdc   :  { %v594_v55 = vmul.f32 %v3513_v53, %v592_v42  ;;  %vm599_vm10 = vweird.f32 %v3513_v53  ;;  %v4242_v58 = vpop.f32.mrf.mxu2 }
  0xdd   :  { %vm600_vm11 = vmor %vm598_vm9, %vm599_vm10 }
  0xde   :  { %v595_v28 = vsub.f32 1.0, %v594_v55 }
  0xe0   :  { %v596_v4 = vmul.f32 %v3513_v53, %v595_v28  ;;  %v564_v13 = vpop.f32.mrf.mxu0  ;;  %v4240_v28 = vpop.permute.xlu0 %396 }
  0xe1   :  { %v608_v22 = vadd.f32 %v4231_v0, %v564_v13  ;;  %vm616_vm13 = vcmp.gt.s32.totalorder %v4240_v28, 0  ;;  %vm711_vm7 = vcmp.gt.s32.totalorder %v4240_v28, 1 }
  0xe2   :  { %v597_v31 = vadd.f32 %v3513_v53, %v596_v4  ;;  %vm3028_vm14 = vmpackc.low %vm616_vm13, %vm616_vm13 }
  0xe3   :  { %v609_v33 = vmul.f32 %v608_v22, %v586_v26 }
  0xe4   :  { %v601_v44 = vsel %vm600_vm11, %v3513_v53, %v597_v31  ;;  %v329_v6 = vpop.f32.mrf.mxu2 }
  0xe5   :  { %v610_v23 = vadd.f32 %v609_v33, %v315_v19  ;;  %v606_v50 = vsel %vm603_vm12, %v605_v48, %v601_v44  ;;  %v4249_v13 = vadd.f32 %v329_v6, %v4221_v49  ;;  %v4274_v19 = vpop.f32.mrf.mxu1 }
  0xe6   :  { %v612_v52 = vsub.f32 1.0, %v606_v50  ;;  %v614_v42 = vmul.f32 0.0, %v606_v50 }
  0xe7   :  { %3514 = vtanh.f32 %v610_v23  ;;  %5427 = vst [vmem:[#allocation6_spill] sm:$0xff] %v4249_v13  ;;  %v259_v23 = vadd.f32 %v4198_v61, %v4200_v62 }
  0xe8   :  { %v566_v25 = vpop.f32.mrf.mxu0 }
  0xe9   :  { %v288_v25 = vadd.f32 %v287_v18, %v4208_v9 }
  0xec   :  { %v4286_v40 = vpop.f32.mrf.mxu2 }
  0xed   :  { %v3515_v55 = vpop.eup %3514  ;;  %v4276_v22 = vpop.f32.mrf.mxu1  ;;  %5430 = vst [vmem:[#allocation9_spill] sm:$0xff] %v4286_v40 }
  0xee   :  { %v613_v63 = vmul.f32 %v3515_v55, %v612_v52 }
  0xf0   :  { %v615_v59 = vadd.f32 %v614_v42, %v613_v63 }
  0xf2   :  { %v4245_v53 = vsel %vm616_vm13, %v615_v59, 0.0  ;;  %v3029_v4 = vpack.c.bf16 %v615_v59, %v615_v59 }
  0xf4   :  { %3030 = vmatmul.msk.bf16.vlgmr.msrb.gmra.mxu1 %vm3028_vm14, %v3029_v4  ;;  %3033 = vmatmul.msk.bf16.vlgmr.msrb.gmra.mxu2 %vm3028_vm14, %v3029_v4 }
  0xf5   :  { %3036 = vmatmul.msk.bf16.vlgmr.msra.gmra.mxu3 %vm3028_vm14, %v3029_v4  ;;  %842 = vmatpush.bf16.msrb.mxu1 %v3921_v12  ;;  %v4278_v26 = vpop.f32.mrf.mxu1 }
  0xf6   :  { %912 = vmatpush.bf16.msrb.mxu2 %v3764_v7  ;;  %925 = vmatpush.bf16.msra.mxu3 %v3932_v16 }
  0xf9   :  { %843 = vmatpush.bf16.msrb.mxu1 %v3956_v27 }
  0xfa   :  { %913 = vmatpush.bf16.msrb.mxu2 %v3773_v11  ;;  %926 = vmatpush.bf16.msra.mxu3 %v3968_v32 }
  0xfd   :  { %844 = vmatpush.bf16.msrb.mxu1 %v3994_v43  ;;  %v4280_v31 = vpop.f32.mrf.mxu1 }
  0xfe   :  { %914 = vmatpush.bf16.msrb.mxu2 %v3788_v17  ;;  %927 = vmatpush.bf16.msra.mxu3 %v4003_v46 }
 0x101   :  { %845 = vmatpush.bf16.msrb.mxu1 %v4024_v56 }
 0x102   :  { %915 = vmatpush.bf16.msrb.mxu2 %v3806_v24  ;;  %928 = vmatpush.bf16.msra.mxu3 %v4027_v57 }
 0x105   :  { %846 = vmatpush.bf16.msrb.mxu1 %v4048_v2  ;;  %v4282_v33 = vpop.f32.mrf.mxu1 }
 0x106   :  { %916 = vmatpush.bf16.msrb.mxu2 %v3835_v37  ;;  %929 = vmatpush.bf16.msra.mxu3 %v4052_v3  ;;  %5428 = vst [vmem:[#allocation7_spill] sm:$0xff] %v4282_v33 }
 0x109   :  { %847 = vmatpush.bf16.msrb.mxu1 %v4071_v14 }
 0x10a   :  { %917 = vmatpush.bf16.msrb.mxu2 %v3859_v47  ;;  %930 = vmatpush.bf16.msra.mxu3 %v4075_v15 }
 0x10d   :  { %848 = vmatpush.bf16.msrb.mxu1 %v4096_v29  ;;  %v4284_v21 = vpop.f32.mrf.mxu1 }
 0x10e   :  { %918 = vmatpush.bf16.msrb.mxu2 %v3889_v60  ;;  %931 = vmatpush.bf16.msra.mxu3 %v4100_v30  ;;  %5429 = vst [vmem:[#allocation8_spill] sm:$0xff] %v4284_v21 }
 0x111   :  { %849 = vmatpush.bf16.msrb.mxu1 %v4117_v36 }
 0x112   :  { %919 = vmatpush.bf16.msrb.mxu2 %v3919_v10  ;;  %932 = vmatpush.bf16.msra.mxu3 %v4120_v38 }
 0x171   :  { %v633_v41 = vpop.f32.mrf.mxu1 }
 0x172   :  { %v663_v44 = vadd.f32 %v633_v41, %v259_v23 }
 0x174   :  { %v3037_v48 = vmul.f32 -1.442695, %v663_v44 }
 0x176   :  { %3516 = vpow2.f32 %v3037_v48 }
 0x177   :  { %v646_v50 = vpop.f32.mrf.mxu2 }
 0x178   :  { %v683_v52 = vadd.f32 %v646_v50, %v288_v25  ;;  %v659_v55 = vpop.f32.mrf.mxu3 }
 0x179   :  { %v635_v63 = vpop.f32.mrf.mxu1 }
 0x17a   :  { %v3038_v42 = vmul.f32 -1.442695, %v683_v52 }
 0x17c   :  { %v3517_v59 = vpop.eup %3516  ;;  %3518 = vpow2.f32 %v3038_v42 }
 0x17d   :  { %v667_v4 = vadd.f32 1.0, %v3517_v59 }
 0x17f   :  { %3520 = vrcp.f32 %v667_v4  ;;  %v648_v6 = vpop.f32.mrf.mxu2  ;;  %v679_v44 = vand.u32 2147483648, %v667_v4  ;;  %v677_v48 = vand.u32 2147483647, %v667_v4  ;;  %vm673_vm0 = vweird.f32 %v667_v4 }
 0x180   :  { %v661_v40 = vpop.f32.mrf.mxu3 }
 0x181   :  { %v680_v52 = vor.u32 1.1754944e-38, %v679_v44  ;;  %vm678_vm2 = vcmp.eq.f32.partialorder %v677_v48, 8.507059e+37  ;;  %v703_v40 = vadd.f32 %v4231_v0, %v659_v55 }
 0x182   :  { %v3519_v54 = vpop.eup %3518 }
 0x183   :  { %v687_v21 = vadd.f32 1.0, %v3519_v54  ;;  %v317_v54 = vadd.f32 %v4216_v39, %v4221_v49 }
 0x185   :  { %v3521_v61 = vpop.eup %3520  ;;  %3522 = vrcp.f32 %v687_v21  ;;  %v697_v45 = vand.u32 2147483647, %v687_v21  ;;  %vm693_vm4 = vweird.f32 %v687_v21 }
 0x186   :  { %v669_v23 = vmul.f32 %v3521_v61, %v667_v4  ;;  %vm674_vm15 = vweird.f32 %v3521_v61 }
 0x187   :  { %vm675_vm1 = vmor %vm673_vm0, %vm674_vm15  ;;  %vm698_vm6 = vcmp.eq.f32.partialorder %v697_v45, 8.507059e+37  ;;  %v291_v45 = vadd.f32 %v4274_v19, %v4208_v9  ;;  %vm807_vm0 = vcmp.gt.s32.totalorder %v4240_v28, 2 }
 0x188   :  { %v670_v41 = vsub.f32 1.0, %v669_v23 }
 0x18a   :  { %v671_v18 = vmul.f32 %v3521_v61, %v670_v41  ;;  %v699_v41 = vand.u32 2147483648, %v687_v21 }
 0x18b   :  { %v3523_v25 = vpop.eup %3522 }
 0x18c   :  { %v689_v50 = vmul.f32 %v3523_v25, %v687_v21  ;;  %v672_v63 = vadd.f32 %v3521_v61, %v671_v18  ;;  %vm694_vm3 = vweird.f32 %v3523_v25  ;;  %v700_v4 = vor.u32 1.1754944e-38, %v699_v41 }
 0x18d   :  { %vm695_vm5 = vmor %vm693_vm4, %vm694_vm3 }
 0x18e   :  { %v690_v42 = vsub.f32 1.0, %v689_v50  ;;  %v676_v59 = vsel %vm675_vm1, %v3521_v61, %v672_v63 }
 0x18f   :  { %v681_v6 = vsel %vm678_vm2, %v680_v52, %v676_v59 }
 0x190   :  { %v691_v23 = vmul.f32 %v3523_v25, %v690_v42  ;;  %v704_v13 = vmul.f32 %v703_v40, %v681_v6 }
 0x192   :  { %v692_v33 = vadd.f32 %v3523_v25, %v691_v23  ;;  %v705_v18 = vadd.f32 %v704_v13, %v317_v54 }
 0x194   :  { %v696_v44 = vsel %vm695_vm5, %v3523_v25, %v692_v33  ;;  %3524 = vtanh.f32 %v705_v18 }
 0x195   :  { %v701_v61 = vsel %vm698_vm6, %v700_v4, %v696_v44 }
 0x196   :  { %v707_v48 = vsub.f32 1.0, %v701_v61  ;;  %v709_v39 = vmul.f32 %v701_v61, %v4245_v53 }
 0x19a   :  { %v3525_v55 = vpop.eup %3524 }
 0x19b   :  { %v708_v50 = vmul.f32 %v3525_v55, %v707_v48 }
 0x19d   :  { %v710_v63 = vadd.f32 %v709_v39, %v708_v50 }
 0x19f   :  { %v4297_v52 = vsel %vm711_vm7, %v710_v63, %v4245_v53  ;;  %v713_v42 = vsel %vm711_vm7, %v710_v63, 0.0 }
 0x1a0   :  { %v4300_v13 = vadd.f32 %v713_v42, %v4245_v53  ;;  %v719_v33 = vpack.c.bf16 %v4297_v52, %v4297_v52 }
 0x1a2   :  { %728 = vmatmul.bf16.vlgmr.msra.gmra.mxu0 %v719_v33  ;;  %741 = vmatmul.bf16.vlgmr.msra.gmra.mxu1 %v719_v33 }
 0x1a3   :  { %754 = vmatmul.bf16.vlgmr.msra.gmra.mxu2 %v719_v33  ;;  %938 = vmatpush.bf16.msra.mxu0 %v3921_v12 }
 0x1a4   :  { %1008 = vmatpush.bf16.msra.mxu1 %v3764_v7  ;;  %1021 = vmatpush.bf16.msra.mxu2 %v3932_v16 }
 0x1a7   :  { %939 = vmatpush.bf16.msra.mxu0 %v3956_v27 }
 0x1a8   :  { %1009 = vmatpush.bf16.msra.mxu1 %v3773_v11  ;;  %1022 = vmatpush.bf16.msra.mxu2 %v3968_v32 }
 0x1ab   :  { %940 = vmatpush.bf16.msra.mxu0 %v3994_v43 }
 0x1ac   :  { %1010 = vmatpush.bf16.msra.mxu1 %v3788_v17  ;;  %1023 = vmatpush.bf16.msra.mxu2 %v4003_v46 }
 0x1af   :  { %941 = vmatpush.bf16.msra.mxu0 %v4024_v56 }
 0x1b0   :  { %1011 = vmatpush.bf16.msra.mxu1 %v3806_v24  ;;  %1024 = vmatpush.bf16.msra.mxu2 %v4027_v57 }
 0x1b3   :  { %942 = vmatpush.bf16.msra.mxu0 %v4048_v2 }
 0x1b4   :  { %1012 = vmatpush.bf16.msra.mxu1 %v3835_v37  ;;  %1025 = vmatpush.bf16.msra.mxu2 %v4052_v3 }
 0x1b7   :  { %943 = vmatpush.bf16.msra.mxu0 %v4071_v14 }
 0x1b8   :  { %1013 = vmatpush.bf16.msra.mxu1 %v3859_v47  ;;  %1026 = vmatpush.bf16.msra.mxu2 %v4075_v15 }
 0x1bb   :  { %944 = vmatpush.bf16.msra.mxu0 %v4096_v29 }
 0x1bc   :  { %1014 = vmatpush.bf16.msra.mxu1 %v3889_v60  ;;  %1027 = vmatpush.bf16.msra.mxu2 %v4100_v30 }
 0x1bf   :  { %945 = vmatpush.bf16.msra.mxu0 %v4117_v36 }
 0x1c0   :  { %1015 = vmatpush.bf16.msra.mxu1 %v3919_v10  ;;  %1028 = vmatpush.bf16.msra.mxu2 %v4120_v38 }
 0x21f   :  { %v729_v53 = vpop.f32.mrf.mxu0  ;;  %v742_v21 = vpop.f32.mrf.mxu1 }
 0x220   :  { %v759_v25 = vadd.f32 %v729_v53, %v4204_v5  ;;  %v779_v59 = vadd.f32 %v742_v21, %v291_v45 }
 0x222   :  { %v3039_v40 = vmul.f32 -1.442695, %v759_v25  ;;  %v3040_v54 = vmul.f32 -1.442695, %v779_v59 }
 0x224   :  { %3526 = vpow2.f32 %v3039_v40 }
 0x225   :  { %3528 = vpow2.f32 %v3040_v54 }
 0x226   :  { %v755_v6 = vpop.f32.mrf.mxu2 }
 0x227   :  { %v731_v23 = vpop.f32.mrf.mxu0  ;;  %v744_v41 = vpop.f32.mrf.mxu1  ;;  %v799_v40 = vadd.f32 %v4231_v0, %v755_v6 }
 0x22a   :  { %v3527_v18 = vpop.eup %3526 }
 0x22b   :  { %v3529_v4 = vpop.eup %3528  ;;  %v763_v44 = vadd.f32 1.0, %v3527_v18 }
 0x22c   :  { %v783_v61 = vadd.f32 1.0, %v3529_v4 }
 0x22d   :  { %3530 = vrcp.f32 %v763_v44  ;;  %v775_v42 = vand.u32 2147483648, %v763_v44  ;;  %v773_v45 = vand.u32 2147483647, %v763_v44  ;;  %vm769_vm9 = vweird.f32 %v763_v44 }
 0x22e   :  { %3532 = vrcp.f32 %v783_v61  ;;  %v757_v48 = vpop.f32.mrf.mxu2  ;;  %v795_v41 = vand.u32 2147483648, %v783_v61  ;;  %vm789_vm13 = vweird.f32 %v783_v61  ;;  %v793_v4 = vand.u32 2147483647, %v783_v61 }
 0x22f   :  { %v776_v25 = vor.u32 1.1754944e-38, %v775_v42  ;;  %vm774_vm11 = vcmp.eq.f32.partialorder %v773_v45, 8.507059e+37 }
 0x230   :  { %vm794_vm15 = vcmp.eq.f32.partialorder %v793_v4, 8.507059e+37 }
 0x233   :  { %v3531_v19 = vpop.eup %3530 }
 0x234   :  { %v3533_v55 = vpop.eup %3532  ;;  %v765_v50 = vmul.f32 %v3531_v19, %v763_v44  ;;  %vm770_vm8 = vweird.f32 %v3531_v19 }
 0x235   :  { %v785_v39 = vmul.f32 %v3533_v55, %v783_v61  ;;  %vm771_vm10 = vmor %vm769_vm9, %vm770_vm8  ;;  %vm790_vm12 = vweird.f32 %v3533_v55  ;;  %vm903_vm9 = vcmp.gt.s32.totalorder %v4240_v28, 3 }
 0x236   :  { %v766_v5 = vsub.f32 1.0, %v765_v50  ;;  %vm791_vm14 = vmor %vm789_vm13, %vm790_vm12 }
 0x237   :  { %v786_v63 = vsub.f32 1.0, %v785_v39  ;;  %v796_v39 = vor.u32 1.1754944e-38, %v795_v41 }
 0x238   :  { %v767_v33 = vmul.f32 %v3531_v19, %v766_v5 }
 0x239   :  { %v787_v53 = vmul.f32 %v3533_v55, %v786_v63 }
 0x23a   :  { %v768_v21 = vadd.f32 %v3531_v19, %v767_v33 }
 0x23b   :  { %v788_v54 = vadd.f32 %v3533_v55, %v787_v53 }
 0x23c   :  { %v772_v59 = vsel %vm771_vm10, %v3531_v19, %v768_v21 }
 0x23d   :  { %v777_v23 = vsel %vm774_vm11, %v776_v25, %v772_v59  ;;  %v792_v50 = vsel %vm791_vm14, %v3533_v55, %v788_v54  ;;  %v264_v25 = vadd.f32 %v4206_v8, %v4200_v62 }
 0x23e   :  { %v800_v18 = vmul.f32 %v799_v40, %v777_v23  ;;  %v797_v44 = vsel %vm794_vm15, %v796_v39, %v792_v50 }
 0x23f   :  { %v803_v5 = vsub.f32 1.0, %v797_v44  ;;  %v805_v6 = vmul.f32 %v797_v44, %v4297_v52 }
 0x240   :  { %v801_v48 = vadd.f32 %v800_v18, %v4224_v51 }
 0x242   :  { %3534 = vtanh.f32 %v801_v48 }
 0x248   :  { %v3535_v19 = vpop.eup %3534 }
 0x249   :  { %v804_v63 = vmul.f32 %v3535_v19, %v803_v5 }
 0x24b   :  { %v806_v42 = vadd.f32 %v805_v6, %v804_v63 }
 0x24d   :  { %v4336_v33 = vsel %vm807_vm0, %v806_v42, %v4297_v52  ;;  %v809_v61 = vsel %vm807_vm0, %v806_v42, 0.0  ;;  %v293_v52 = vadd.f32 %v4276_v22, %v4208_v9 }
 0x24e   :  { %v4339_v45 = vadd.f32 %v809_v61, %v4300_v13  ;;  %v815_v51 = vpack.c.bf16 %v4336_v33, %v4336_v33 }
 0x250   :  { %824 = vmatmul.bf16.vlgmr.msrb.gmra.mxu3 %v815_v51  ;;  %837 = vmatmul.bf16.vlgmr.msrb.gmra.mxu0 %v815_v51 }
 0x251   :  { %850 = vmatmul.bf16.vlgmr.msrb.gmra.mxu1 %v815_v51  ;;  %1034 = vmatpush.bf16.msrb.mxu3 %v3921_v12 }
 0x252   :  { %1104 = vmatpush.bf16.msrb.mxu0 %v3764_v7  ;;  %1117 = vmatpush.bf16.msrb.mxu1 %v3932_v16 }
 0x255   :  { %1035 = vmatpush.bf16.msrb.mxu3 %v3956_v27 }
 0x256   :  { %1105 = vmatpush.bf16.msrb.mxu0 %v3773_v11  ;;  %1118 = vmatpush.bf16.msrb.mxu1 %v3968_v32 }
 0x259   :  { %1036 = vmatpush.bf16.msrb.mxu3 %v3994_v43 }
 0x25a   :  { %1106 = vmatpush.bf16.msrb.mxu0 %v3788_v17  ;;  %1119 = vmatpush.bf16.msrb.mxu1 %v4003_v46 }
 0x25d   :  { %1037 = vmatpush.bf16.msrb.mxu3 %v4024_v56 }
 0x25e   :  { %1107 = vmatpush.bf16.msrb.mxu0 %v3806_v24  ;;  %1120 = vmatpush.bf16.msrb.mxu1 %v4027_v57 }
 0x261   :  { %1038 = vmatpush.bf16.msrb.mxu3 %v4048_v2 }
 0x262   :  { %1108 = vmatpush.bf16.msrb.mxu0 %v3835_v37  ;;  %1121 = vmatpush.bf16.msrb.mxu1 %v4052_v3 }
 0x265   :  { %1039 = vmatpush.bf16.msrb.mxu3 %v4071_v14 }
 0x266   :  { %1109 = vmatpush.bf16.msrb.mxu0 %v3859_v47  ;;  %1122 = vmatpush.bf16.msrb.mxu1 %v4075_v15 }
 0x269   :  { %1040 = vmatpush.bf16.msrb.mxu3 %v4096_v29 }
 0x26a   :  { %1110 = vmatpush.bf16.msrb.mxu0 %v3889_v60  ;;  %1123 = vmatpush.bf16.msrb.mxu1 %v4100_v30 }
 0x26d   :  { %1041 = vmatpush.bf16.msrb.mxu3 %v4117_v36 }
 0x26e   :  { %1111 = vmatpush.bf16.msrb.mxu0 %v3919_v10  ;;  %1124 = vmatpush.bf16.msrb.mxu1 %v4120_v38 }
 0x2cd   :  { %v838_v13 = vpop.f32.mrf.mxu0 }
 0x2ce   :  { %v875_v55 = vadd.f32 %v838_v13, %v293_v52  ;;  %v851_v53 = vpop.f32.mrf.mxu1 }
 0x2d0   :  { %v3042_v21 = vmul.f32 -1.442695, %v875_v55  ;;  %v895_v55 = vadd.f32 %v4231_v0, %v851_v53 }
 0x2d2   :  { %3536 = vpow2.f32 %v3042_v21 }
 0x2d3   :  { %v825_v59 = vpop.f32.mrf.mxu3 }
 0x2d4   :  { %v855_v40 = vadd.f32 %v825_v59, %v264_v25 }
 0x2d5   :  { %v840_v54 = vpop.f32.mrf.mxu0 }
 0x2d6   :  { %v3041_v23 = vmul.f32 -1.442695, %v855_v40  ;;  %v853_v41 = vpop.f32.mrf.mxu1  ;;  %v322_v40 = vadd.f32 %v4233_v1, %v4221_v49 }
 0x2d8   :  { %v3537_v18 = vpop.eup %3536  ;;  %3538 = vpow2.f32 %v3041_v23 }
 0x2d9   :  { %v879_v4 = vadd.f32 1.0, %v3537_v18 }
 0x2db   :  { %v827_v48 = vpop.f32.mrf.mxu3  ;;  %3540 = vrcp.f32 %v879_v4  ;;  %v891_v54 = vand.u32 2147483648, %v879_v4  ;;  %vm885_vm6 = vweird.f32 %v879_v4  ;;  %v889_v41 = vand.u32 2147483647, %v879_v4 }
 0x2dd   :  { %vm890_vm8 = vcmp.eq.f32.partialorder %v889_v41, 8.507059e+37 }
 0x2de   :  { %v3539_v50 = vpop.eup %3538 }
 0x2df   :  { %v859_v22 = vadd.f32 1.0, %v3539_v50  ;;  %v892_v50 = vor.u32 1.1754944e-38, %v891_v54 }
 0x2e1   :  { %3542 = vrcp.f32 %v859_v22  ;;  %v3541_v39 = vpop.eup %3540  ;;  %v871_v6 = vand.u32 2147483648, %v859_v22  ;;  %v869_v61 = vand.u32 2147483647, %v859_v22  ;;  %vm865_vm2 = vweird.f32 %v859_v22 }
 0x2e2   :  { %v881_v44 = vmul.f32 %v3541_v39, %v879_v4  ;;  %vm886_vm5 = vweird.f32 %v3541_v39 }
 0x2e3   :  { %v872_v13 = vor.u32 1.1754944e-38, %v871_v6  ;;  %vm870_vm4 = vcmp.eq.f32.partialorder %v869_v61, 8.507059e+37  ;;  %vm887_vm7 = vmor %vm885_vm6, %vm886_vm5 }
 0x2e4   :  { %v882_v63 = vsub.f32 1.0, %v881_v44 }
 0x2e6   :  { %v883_v51 = vmul.f32 %v3541_v39, %v882_v63 }
 0x2e7   :  { %v3543_v5 = vpop.eup %3542 }
 0x2e8   :  { %v861_v19 = vmul.f32 %v3543_v5, %v859_v22  ;;  %vm866_vm1 = vweird.f32 %v3543_v5  ;;  %v884_v25 = vadd.f32 %v3541_v39, %v883_v51 }
 0x2e9   :  { %vm867_vm3 = vmor %vm865_vm2, %vm866_vm1  ;;  %vm999_vm2 = vcmp.gt.s32.totalorder %v4240_v28, 4 }
 0x2ea   :  { %v862_v8 = vsub.f32 1.0, %v861_v19  ;;  %v888_v48 = vsel %vm887_vm7, %v3541_v39, %v884_v25 }
 0x2eb   :  { %v893_v22 = vsel %vm890_vm8, %v892_v50, %v888_v48 }
 0x2ec   :  { %v863_v42 = vmul.f32 %v3543_v5, %v862_v8  ;;  %v899_v53 = vsub.f32 1.0, %v893_v22  ;;  %v901_v19 = vmul.f32 %v893_v22, %v4336_v33 }
 0x2ee   :  { %v864_v52 = vadd.f32 %v3543_v5, %v863_v42 }
 0x2f0   :  { %v868_v21 = vsel %vm867_vm3, %v3543_v5, %v864_v52 }
 0x2f1   :  { %v873_v59 = vsel %vm870_vm4, %v872_v13, %v868_v21 }
 0x2f2   :  { %v896_v23 = vmul.f32 %v895_v55, %v873_v59 }
 0x2f4   :  { %v897_v18 = vadd.f32 %v896_v23, %v322_v40 }
 0x2f6   :  { %3544 = vtanh.f32 %v897_v18 }
 0x2fc   :  { %v3545_v44 = vpop.eup %3544 }
 0x2fd   :  { %v900_v5 = vmul.f32 %v3545_v44, %v899_v53 }
 0x2ff   :  { %v902_v63 = vadd.f32 %v901_v19, %v900_v5 }
 0x301   :  { %v4377_v1 = vsel %vm903_vm9, %v902_v63, %v4336_v33  ;;  %v905_v8 = vsel %vm903_vm9, %v902_v63, 0.0 }
 0x302   :  { %v4380_v4 = vadd.f32 %v905_v8, %v4339_v45  ;;  %v911_v39 = vpack.c.bf16 %v4377_v1, %v4377_v1 }
 0x304   :  { %920 = vmatmul.bf16.vlgmr.msrb.gmra.mxu2 %v911_v39  ;;  %933 = vmatmul.bf16.vlgmr.msra.gmra.mxu3 %v911_v39 }
 0x305   :  { %946 = vmatmul.bf16.vlgmr.msra.gmra.mxu0 %v911_v39  ;;  %1130 = vmatpush.bf16.msrb.mxu2 %v3921_v12 }
 0x306   :  { %1200 = vmatpush.bf16.msra.mxu3 %v3764_v7  ;;  %1213 = vmatpush.bf16.msra.mxu0 %v3932_v16 }
 0x309   :  { %1131 = vmatpush.bf16.msrb.mxu2 %v3956_v27 }
 0x30a   :  { %1201 = vmatpush.bf16.msra.mxu3 %v3773_v11  ;;  %1214 = vmatpush.bf16.msra.mxu0 %v3968_v32  ;;  %v296_v11 = vadd.f32 %v4278_v26, %v4208_v9 }
 0x30d   :  { %1132 = vmatpush.bf16.msrb.mxu2 %v3994_v43 }
 0x30e   :  { %1202 = vmatpush.bf16.msra.mxu3 %v3788_v17  ;;  %1215 = vmatpush.bf16.msra.mxu0 %v4003_v46 }
 0x311   :  { %1133 = vmatpush.bf16.msrb.mxu2 %v4024_v56 }
 0x312   :  { %1203 = vmatpush.bf16.msra.mxu3 %v3806_v24  ;;  %1216 = vmatpush.bf16.msra.mxu0 %v4027_v57 }
 0x315   :  { %1134 = vmatpush.bf16.msrb.mxu2 %v4048_v2 }
 0x316   :  { %1204 = vmatpush.bf16.msra.mxu3 %v3835_v37  ;;  %1217 = vmatpush.bf16.msra.mxu0 %v4052_v3 }
 0x319   :  { %1135 = vmatpush.bf16.msrb.mxu2 %v4071_v14 }
 0x31a   :  { %1205 = vmatpush.bf16.msra.mxu3 %v3859_v47  ;;  %1218 = vmatpush.bf16.msra.mxu0 %v4075_v15 }
 0x31d   :  { %1136 = vmatpush.bf16.msrb.mxu2 %v4096_v29 }
 0x31e   :  { %1206 = vmatpush.bf16.msra.mxu3 %v3889_v60  ;;  %1219 = vmatpush.bf16.msra.mxu0 %v4100_v30 }
 0x321   :  { %1137 = vmatpush.bf16.msrb.mxu2 %v4117_v36 }
 0x322   :  { %1207 = vmatpush.bf16.msra.mxu3 %v3919_v10  ;;  %1220 = vmatpush.bf16.msra.mxu0 %v4120_v38 }
 0x382   :  { %v947_v7 = vpop.f32.mrf.mxu0 }
 0x383   :  { %v991_v21 = vadd.f32 %v4231_v0, %v947_v7 }
 0x387   :  { %v921_v17 = vpop.f32.mrf.mxu2  ;;  %v934_v24 = vpop.f32.mrf.mxu3 }
 0x388   :  { %v951_v37 = vadd.f32 %v921_v17, %v4211_v20  ;;  %v971_v47 = vadd.f32 %v934_v24, %v296_v11 }
 0x38a   :  { %v3043_v16 = vmul.f32 -1.442695, %v951_v37  ;;  %v3044_v32 = vmul.f32 -1.442695, %v971_v47  ;;  %v949_v60 = vpop.f32.mrf.mxu0 }
 0x38c   :  { %3546 = vpow2.f32 %v3043_v16 }
 0x38d   :  { %3548 = vpow2.f32 %v3044_v32 }
 0x38f   :  { %v923_v46 = vpop.f32.mrf.mxu2  ;;  %v936_v57 = vpop.f32.mrf.mxu3 }
 0x392   :  { %v3547_v3 = vpop.eup %3546 }
 0x393   :  { %v3549_v10 = vpop.eup %3548  ;;  %v955_v15 = vadd.f32 1.0, %v3547_v3 }
 0x394   :  { %v975_v30 = vadd.f32 1.0, %v3549_v10 }
 0x395   :  { %3550 = vrcp.f32 %v955_v15  ;;  %v967_v20 = vand.u32 2147483648, %v955_v15  ;;  %v965_v51 = vand.u32 2147483647, %v955_v15  ;;  %vm961_vm11 = vweird.f32 %v955_v15 }
 0x396   :  { %3552 = vrcp.f32 %v975_v30  ;;  %v987_v23 = vand.u32 2147483648, %v975_v30  ;;  %vm981_vm15 = vweird.f32 %v975_v30  ;;  %v985_v41 = vand.u32 2147483647, %v975_v30 }
 0x397   :  { %v968_v55 = vor.u32 1.1754944e-38, %v967_v20  ;;  %vm966_vm13 = vcmp.eq.f32.partialorder %v965_v51, 8.507059e+37 }
 0x398   :  { %v988_v50 = vor.u32 1.1754944e-38, %v987_v23  ;;  %vm986_vm1 = vcmp.eq.f32.partialorder %v985_v41, 8.507059e+37 }
 0x39b   :  { %v3551_v38 = vpop.eup %3550 }
 0x39c   :  { %v3553_v26 = vpop.eup %3552  ;;  %v957_v33 = vmul.f32 %v3551_v38, %v955_v15  ;;  %vm962_vm10 = vweird.f32 %v3551_v38 }
 0x39d   :  { %v977_v45 = vmul.f32 %v3553_v26, %v975_v30  ;;  %vm963_vm12 = vmor %vm961_vm11, %vm962_vm10  ;;  %vm982_vm14 = vweird.f32 %v3553_v26  ;;  %vm1095_vm11 = vcmp.gt.s32.totalorder %v4240_v28, 5 }
 0x39e   :  { %v958_v6 = vsub.f32 1.0, %v957_v33  ;;  %vm983_vm0 = vmor %vm981_vm15, %vm982_vm14 }
 0x39f   :  { %v978_v42 = vsub.f32 1.0, %v977_v45  ;;  %v327_v45 = vadd.f32 %v4242_v58, %v4221_v49 }
 0x3a0   :  { %v959_v61 = vmul.f32 %v3551_v38, %v958_v6 }
 0x3a1   :  { %v979_v52 = vmul.f32 %v3553_v26, %v978_v42 }
 0x3a2   :  { %v960_v13 = vadd.f32 %v3551_v38, %v959_v61 }
 0x3a3   :  { %v980_v40 = vadd.f32 %v3553_v26, %v979_v52 }
 0x3a4   :  { %v964_v25 = vsel %vm963_vm12, %v3551_v38, %v960_v13 }
 0x3a5   :  { %v969_v59 = vsel %vm966_vm13, %v968_v55, %v964_v25  ;;  %v984_v48 = vsel %vm983_vm0, %v3553_v26, %v980_v40 }
 0x3a6   :  { %v992_v54 = vmul.f32 %v991_v21, %v969_v59  ;;  %v989_v22 = vsel %vm986_vm1, %v988_v50, %v984_v48  ;;  %v5431_v50 = vld [vmem:[#allocation7_spill] sm:$0xff] }
 0x3a7   :  { %v995_v53 = vsub.f32 1.0, %v989_v22  ;;  %v997_v19 = vmul.f32 %v989_v22, %v4377_v1  ;;  %v301_v22 = vadd.f32 %v5431_v50, %v4208_v9  ;;  %v3441_v50 = vld [vmem:[%s5408_s6 + $0x70] sm:$0xf0] }
 0x3a8   :  { %v993_v18 = vadd.f32 %v992_v54, %v4238_v35 }
 0x3aa   :  { %3554 = vtanh.f32 %v993_v18 }
 0x3b0   :  { %v3555_v44 = vpop.eup %3554 }
 0x3b1   :  { %v996_v5 = vmul.f32 %v3555_v44, %v995_v53 }
 0x3b3   :  { %v998_v63 = vadd.f32 %v997_v19, %v996_v5  ;;  %v5432_v5 = vld [vmem:[#allocation4_spill] sm:$0xff] }
 0x3b5   :  { %v4416_v8 = vsel %vm999_vm2, %v998_v63, %v4377_v1  ;;  %v1001_v39 = vsel %vm999_vm2, %v998_v63, 0.0  ;;  %v269_v1 = vadd.f32 %v4214_v34, %v4200_v62 }
 0x3b6   :  { %v4419_v35 = vadd.f32 %v1001_v39, %v4380_v4  ;;  %v1007_v7 = vpack.c.bf16 %v4416_v8, %v4416_v8 }
 0x3b8   :  { %1016 = vmatmul.bf16.vlgmr.msra.gmra.mxu1 %v1007_v7  ;;  %1029 = vmatmul.bf16.vlgmr.msra.gmra.mxu2 %v1007_v7 }
 0x3b9   :  { %1042 = vmatmul.bf16.vlgmr.msrb.gmra.mxu3 %v1007_v7  ;;  %1226 = vmatpush.bf16.msra.mxu1 %v3921_v12 }
 0x3bd   :  { %1227 = vmatpush.bf16.msra.mxu1 %v3956_v27  ;;  %v298_v27 = vadd.f32 %v4280_v31, %v4208_v9 }
 0x3c1   :  { %1228 = vmatpush.bf16.msra.mxu1 %v3994_v43 }
 0x3c5   :  { %1229 = vmatpush.bf16.msra.mxu1 %v4024_v56 }
 0x3c9   :  { %1230 = vmatpush.bf16.msra.mxu1 %v4048_v2 }
 0x3cd   :  { %1231 = vmatpush.bf16.msra.mxu1 %v4071_v14 }
 0x3d1   :  { %1232 = vmatpush.bf16.msra.mxu1 %v4096_v29 }
 0x3d5   :  { %1233 = vmatpush.bf16.msra.mxu1 %v4117_v36 }
 0x435   :  { %v1017_v4 = vpop.f32.mrf.mxu1 }
 0x436   :  { %v1047_v11 = vadd.f32 %v1017_v4, %v269_v1 }
 0x438   :  { %v3045_v12 = vmul.f32 -1.442695, %v1047_v11 }
 0x43a   :  { %3556 = vpow2.f32 %v3045_v12 }
 0x43b   :  { %v1030_v43 = vpop.f32.mrf.mxu2 }
 0x43c   :  { %v1067_v56 = vadd.f32 %v1030_v43, %v298_v27  ;;  %v1043_v17 = vpop.f32.mrf.mxu3 }
 0x43d   :  { %v1019_v2 = vpop.f32.mrf.mxu1  ;;  %v1087_v33 = vadd.f32 %v4231_v0, %v1043_v17  ;;  %v3155_v17 = vld [vmem:[%s5408_s6 + $0xb4] sm:$0xf0] }
 0x43e   :  { %v3046_v24 = vmul.f32 -1.442695, %v1067_v56  ;;  %v3448_v56 = vld [vmem:[%s5408_s6 + $0xac] sm:$0xf]  ;;  %v3161_v2 = vld [vmem:[%s5408_s6 + $0xb0] sm:$0xf] }
 0x440   :  { %v3557_v14 = vpop.eup %3556  ;;  %3558 = vpow2.f32 %v3046_v24  ;;  %v3158_v24 = vor.u32 %v3448_v56, %v3155_v17  ;;  %v3113_v56 = vld [vmem:[%s5408_s6 + $0x50] sm:$0xf]  ;;  %v3438_v17 = vld [vmem:[%s5408_s6 + $0x58] sm:$0xf0] }
 0x441   :  { %v1051_v29 = vadd.f32 1.0, %v3557_v14  ;;  %v3450_v14 = vld [vmem:[%s5408_s6 + $0xb8] sm:$0xf0] }
 0x442   :  { %1545 = vmatpush.bf16.msrb.mxu3 %v3158_v24  ;;  %v3105_v24 = vld [vmem:[%s5408_s6 + $0x48] sm:$0xf] }
 0x443   :  { %3560 = vrcp.f32 %v1051_v29  ;;  %v1032_v36 = vpop.f32.mrf.mxu2  ;;  %v1063_v46 = vand.u32 2147483648, %v1051_v29  ;;  %v1061_v57 = vand.u32 2147483647, %v1051_v29  ;;  %vm1057_vm4 = vweird.f32 %v1051_v29 }
 0x444   :  { %v1045_v37 = vpop.f32.mrf.mxu3  ;;  %v3143_v36 = vld [vmem:[%s5408_s6 + $0x9c] sm:$0xf0] }
 0x445   :  { %v1064_v30 = vor.u32 1.1754944e-38, %v1063_v46  ;;  %vm1062_vm6 = vcmp.eq.f32.partialorder %v1061_v57, 8.507059e+37 }
 0x446   :  { %v3559_v47 = vpop.eup %3558 }
 0x447   :  { %v1071_v34 = vadd.f32 1.0, %v3559_v47  ;;  %v3162_v47 = vor.u32 %v3450_v14, %v3161_v2  ;;  %v3437_v14 = vld [vmem:[%s5408_s6 + $0x50] sm:$0xf0] }
 0x449   :  { %v3561_v16 = vpop.eup %3560  ;;  %3562 = vrcp.f32 %v1071_v34  ;;  %v1083_v42 = vand.u32 2147483648, %v1071_v34  ;;  %v1081_v51 = vand.u32 2147483647, %v1071_v34  ;;  %vm1077_vm8 = vweird.f32 %v1071_v34 }
 0x44a   :  { %v1053_v32 = vmul.f32 %v3561_v16, %v1051_v29  ;;  %vm1058_vm3 = vweird.f32 %v3561_v16  ;;  %v3445_v29 = vld [vmem:[%s5408_s6 + $0x94] sm:$0xf] }
 0x44b   :  { %vm1059_vm5 = vmor %vm1057_vm4, %vm1058_vm3  ;;  %v1084_v55 = vor.u32 1.1754944e-38, %v1083_v42  ;;  %vm1082_vm10 = vcmp.eq.f32.partialorder %v1081_v51, 8.507059e+37  ;;  %v3444_v42 = vld [vmem:[%s5408_s6 + $0x88] sm:$0xf0]  ;;  %vm1191_vm4 = vcmp.gt.s32.totalorder %v4240_v28, 6 }
 0x44c   :  { %v1054_v60 = vsub.f32 1.0, %v1053_v32  ;;  %v3149_v32 = vld [vmem:[%s5408_s6 + $0x98] sm:$0xf] }
 0x44e   :  { %v1055_v31 = vmul.f32 %v3561_v16, %v1054_v60 }
 0x44f   :  { %v3563_v3 = vpop.eup %3562 }
 0x450   :  { %v1073_v10 = vmul.f32 %v3563_v3, %v1071_v34  ;;  %v1056_v15 = vadd.f32 %v3561_v16, %v1055_v31  ;;  %vm1078_vm7 = vweird.f32 %v3563_v3  ;;  %v3153_v34 = vld [vmem:[%s5408_s6 + $0xa8] sm:$0xf]  ;;  %v3146_v31 = vor.u32 %v3445_v29, %v3143_v36  ;;  %v5435_v36 = vld [vmem:[#allocation6_spill] sm:$0xff]  ;;  %v3213_v29 = vld [vmem:[%s5411_s7 + $0x60] sm:$0xf] }
 0x451   :  { %vm1079_vm9 = vmor %vm1077_vm8, %vm1078_vm7 }
 0x452   :  { %v1074_v38 = vsub.f32 1.0, %v1073_v10  ;;  %v1060_v26 = vsel %vm1059_vm5, %v3561_v16, %v1056_v15  ;;  %v3449_v16 = vld [vmem:[%s5408_s6 + $0xb0] sm:$0xf0]  ;;  %v3442_v10 = vld [vmem:[%s5408_s6 + $0x7c] sm:$0xf]  ;;  %1546 = vmatpush.bf16.msrb.mxu3 %v3146_v31  ;;  %v3106_v31 = vor.u32 %v3437_v14, %v3105_v24 }
 0x453   :  { %v1065_v6 = vsel %vm1062_vm6, %v1064_v30, %v1060_v26  ;;  %v3154_v57 = vor.u32 %v3449_v16, %v3153_v34  ;;  %v3141_v26 = vld [vmem:[%s5408_s6 + $0x90] sm:$0xf]  ;;  %v3114_v34 = vor.u32 %v3438_v17, %v3113_v56  ;;  %v3433_v16 = vld [vmem:[%s5408_s6 + $0x34] sm:$0xf]  ;;  %v3424_v56 = vld [vmem:[%s5410_s1 + $0x8] sm:$0xff] }
 0x454   :  { %v1075_v20 = vmul.f32 %v3563_v3, %v1074_v38  ;;  %v1088_v61 = vmul.f32 %v1087_v33, %v1065_v6  ;;  %v3131_v38 = vld [vmem:[%s5408_s6 + $0x84] sm:$0xf0]  ;;  %v3446_v33 = vld [vmem:[%s5408_s6 + $0x98] sm:$0xf0]  ;;  %v3467_v24 = vld [vmem:[%s5411_s7 + $0x80] sm:$0xf0] }
 0x455   :  { %1516 = vmatpush.bf16.msra.mxu2 %v3154_v57  ;;  %v3142_v6 = vor.u32 %v3446_v33, %v3141_v26  ;;  %v3101_v57 = vld [vmem:[%s5408_s6 + $0x38] sm:$0xf]  ;;  %v3430_v26 = vld [vmem:[%s5408_s6 + $0x1c] sm:$0xf]  ;;  %v3083_v33 = vld [vmem:[%s5408_s6 + $0x24] sm:$0xf0] }
 0x456   :  { %v1076_v52 = vadd.f32 %v3563_v3, %v1075_v20  ;;  %v1089_v13 = vadd.f32 %v1088_v61, %v327_v45  ;;  %v3137_v20 = vld [vmem:[%s5408_s6 + $0x80] sm:$0xf] }
 0x458   :  { %v1080_v21 = vsel %vm1079_vm9, %v3563_v3, %v1076_v52  ;;  %3564 = vtanh.f32 %v1089_v13  ;;  %v3447_v3 = vld [vmem:[%s5408_s6 + $0xa0] sm:$0xf0] }
 0x459   :  { %v1085_v25 = vsel %vm1082_vm10, %v1084_v55, %v1080_v21  ;;  %v3150_v30 = vor.u32 %v3447_v3, %v3149_v32  ;;  %v3134_v55 = vor.u32 %v3442_v10, %v3131_v38  ;;  %v3129_v21 = vld [vmem:[%s5408_s6 + $0x78] sm:$0xf]  ;;  %1517 = vmatpush.bf16.msra.mxu2 %v3142_v6  ;;  %v3095_v32 = vld [vmem:[%s5408_s6 + $0x3c] sm:$0xf0]  ;;  %v3093_v3 = vld [vmem:[%s5408_s6 + $0x30] sm:$0xf] }
 0x45a   :  { %v1091_v59 = vsub.f32 1.0, %v1085_v25  ;;  %v1093_v58 = vmul.f32 %v1085_v25, %v4416_v8  ;;  %v3443_v25 = vld [vmem:[%s5408_s6 + $0x80] sm:$0xf0]  ;;  %v3434_v10 = vld [vmem:[%s5408_s6 + $0x38] sm:$0xf0] }
 0x45b   :  { %1547 = vmatpush.bf16.msrb.mxu3 %v3134_v55  ;;  %v3089_v6 = vld [vmem:[%s5408_s6 + $0x20] sm:$0xf] }
 0x45e   :  { %v3565_v0 = vpop.eup %3564 }
 0x45f   :  { %v1092_v40 = vmul.f32 %v3565_v0, %v1091_v59  ;;  %v3138_v0 = vor.u32 %v3444_v42, %v3137_v20  ;;  %v3432_v20 = vld [vmem:[%s5408_s6 + $0x28] sm:$0xf0] }
 0x461   :  { %v1094_v54 = vadd.f32 %v1093_v58, %v1092_v40  ;;  %v3439_v40 = vld [vmem:[%s5408_s6 + $0x64] sm:$0xf]  ;;  %v3119_v58 = vld [vmem:[%s5408_s6 + $0x6c] sm:$0xf0] }
 0x463   :  { %v4441_v23 = vsel %vm1095_vm11, %v1094_v54, %v4416_v8  ;;  %v1097_v41 = vsel %vm1095_vm11, %v1094_v54, 0.0 }
 0x464   :  { %v4444_v18 = vadd.f32 %v1097_v41, %v4419_v35  ;;  %v1103_v48 = vpack.c.bf16 %v4441_v23, %v4441_v23  ;;  %v3130_v41 = vor.u32 %v3443_v25, %v3129_v21  ;;  %v3090_v25 = vor.u32 %v3432_v20, %v3089_v6  ;;  %v3335_v6 = vld [vmem:[%s5409_s8 + $0x9c] sm:$0xf0]  ;;  %v3257_v20 = vld [vmem:[%s5411_s7 + $0xb0] sm:$0xf] }
 0x466   :  { %1112 = vmatmul.bf16.vlgmr.msrb.gmra.mxu0 %v1103_v48  ;;  %1125 = vmatmul.bf16.vlgmr.msrb.gmra.mxu1 %v1103_v48 }
 0x467   :  { %1138 = vmatmul.bf16.vlgmr.msrb.gmra.mxu2 %v1103_v48  ;;  %1574 = vmatpush.bf16.msrb.mxu0 %v3162_v47  ;;  %v3125_v48 = vld [vmem:[%s5408_s6 + $0x68] sm:$0xf] }
 0x468   :  { %1518 = vmatpush.bf16.msra.mxu2 %v3130_v41  ;;  %v3429_v41 = vld [vmem:[%s5408_s6 + $0x10] sm:$0xf0] }
 0x46b   :  { %1575 = vmatpush.bf16.msrb.mxu0 %v3150_v30  ;;  %v3098_v30 = vor.u32 %v3433_v16, %v3095_v32  ;;  %v3189_v16 = vld [vmem:[%s5411_s7 + $0x30] sm:$0xf]  ;;  %v3458_v32 = vld [vmem:[%s5411_s7 + $0x38] sm:$0xf0] }
 0x46f   :  { %1576 = vmatpush.bf16.msrb.mxu0 %v3138_v0  ;;  %v3071_v0 = vld [vmem:[%s5408_s6 + $0xc] sm:$0xf0] }
 0x4e3   :  { %v1113_v53 = vpop.f32.mrf.mxu0  ;;  %v1126_v44 = vpop.f32.mrf.mxu1 }
 0x4e4   :  { %v1143_v19 = vadd.f32 %v1113_v53, %v5432_v5  ;;  %v1163_v63 = vadd.f32 %v1126_v44, %v301_v22  ;;  %v3117_v53 = vld [vmem:[%s5408_s6 + $0x60] sm:$0xf]  ;;  %v3440_v44 = vld [vmem:[%s5408_s6 + $0x68] sm:$0xf0] }
 0x4e6   :  { %v3047_v8 = vmul.f32 -1.442695, %v1143_v19  ;;  %v3048_v39 = vmul.f32 -1.442695, %v1163_v63  ;;  %v4537_v19 = vld [vmem:[%s5406_s5] ss:$0 sm:$0xff] }
 0x4e8   :  { %3566 = vpow2.f32 %v3047_v8  ;;  %v3122_v8 = vor.u32 %v3439_v40, %v3119_v58  ;;  %v3077_v58 = vld [vmem:[%s5408_s6 + $0x8] sm:$0xf] }
 0x4e9   :  { %3568 = vpow2.f32 %v3048_v39 }
 0x4ea   :  { %v4451_v35 = vpop.f32.mrf.mxu2  ;;  %1548 = vmatpush.bf16.msrb.mxu3 %v3122_v8 }
 0x4eb   :  { %v1115_v7 = vpop.f32.mrf.mxu0  ;;  %v1128_v1 = vpop.f32.mrf.mxu1  ;;  %v1183_v63 = vadd.f32 %v4537_v19, %v4451_v35 }
 0x4ec   :  { %v3126_v1 = vor.u32 %v3441_v50, %v3125_v48  ;;  %v3069_v48 = vld [vmem:[%s5408_s6] sm:$0xf]  ;;  %v3428_v50 = vld [vmem:[%s5408_s6 + $0x8] sm:$0xf0] }
 0x4ee   :  { %v3567_v4 = vpop.eup %3566  ;;  %1577 = vmatpush.bf16.msrb.mxu0 %v3126_v1 }
 0x4ef   :  { %v3569_v11 = vpop.eup %3568  ;;  %v1147_v12 = vadd.f32 1.0, %v3567_v4  ;;  %v3436_v4 = vld [vmem:[%s5408_s6 + $0x4c] sm:$0xf] }
 0x4f0   :  { %v4453_v27 = vadd.f32 1.0, %v3569_v11  ;;  %v3107_v11 = vld [vmem:[%s5408_s6 + $0x54] sm:$0xf0] }
 0x4f1   :  { %3570 = vrcp.f32 %v1147_v12  ;;  %v1159_v51 = vand.u32 2147483648, %v1147_v12  ;;  %v1157_v13 = vand.u32 2147483647, %v1147_v12  ;;  %vm1153_vm13 = vweird.f32 %v1147_v12 }
 0x4f2   :  { %3572 = vrcp.f32 %v4453_v27  ;;  %v1141_v43 = vpop.f32.mrf.mxu2  ;;  %vm1173_vm1 = vweird.f32 %v4453_v27  ;;  %v1177_v2 = vand.u32 2147483647, %v4453_v27  ;;  %v3110_v47 = vor.u32 %v3436_v4, %v3107_v11  ;;  %1578 = vmatpush.bf16.msrb.mxu0 %v3114_v34  ;;  %v3473_v11 = vld [vmem:[%s5411_s7 + $0xb0] sm:$0xf0] }
 0x4f3   :  { %v1160_v22 = vor.u32 1.1754944e-38, %v1159_v51  ;;  %vm1158_vm15 = vcmp.eq.f32.partialorder %v1157_v13, 8.507059e+37  ;;  %v3118_v43 = vor.u32 %v3440_v44, %v3117_v53  ;;  %v3431_v51 = vld [vmem:[%s5408_s6 + $0x20] sm:$0xf0]  ;;  %v3086_v13 = vor.u32 %v3430_v26, %v3083_v33  ;;  %v3497_v53 = vld [vmem:[%s5409_s8 + $0xb0] sm:$0xf0] }
 0x4f4   :  { %vm1178_vm3 = vcmp.eq.f32.partialorder %v1177_v2, 8.507059e+37  ;;  %1549 = vmatpush.bf16.msrb.mxu3 %v3110_v47  ;;  %v3225_v2 = vld [vmem:[%s5411_s7 + $0x78] sm:$0xf]  ;;  %v3201_v47 = vld [vmem:[%s5411_s7 + $0x48] sm:$0xf] }
 0x4f5   :  { %1519 = vmatpush.bf16.msra.mxu2 %v3118_v43  ;;  %v3470_v43 = vld [vmem:[%s5411_s7 + $0x98] sm:$0xf0]  ;;  %v3226_v14 = vor.u32 %v3467_v24, %v3225_v2  ;;  %v3493_v33 = vld [vmem:[%s5409_s8 + $0x94] sm:$0xf]  ;;  %v3487_v2 = vld [vmem:[%s5409_s8 + $0x64] sm:$0xf] }
 0x4f6   :  { %v3494_v26 = vld [vmem:[%s5409_s8 + $0x98] sm:$0xf0]  ;;  %v5437_v24 = vld [vmem:[#allocation5_spill] sm:$0xff] }
 0x4f7   :  { %v3571_v37 = vpop.eup %3570 }
 0x4f8   :  { %v4483_v60 = vpop.eup %3572  ;;  %v1149_v46 = vmul.f32 %v3571_v37, %v1147_v12  ;;  %vm1154_vm12 = vweird.f32 %v3571_v37  ;;  %v1179_v12 = vand.u32 2147483648, %v4453_v27  ;;  %1550 = vmatpush.bf16.msrb.mxu3 %v3098_v30 }
 0x4f9   :  { %v1169_v15 = vmul.f32 %v4483_v60, %v4453_v27  ;;  %vm1155_vm14 = vmor %vm1153_vm13, %vm1154_vm12  ;;  %vm1174_vm0 = vweird.f32 %v4483_v60  ;;  %1520 = vmatpush.bf16.msra.mxu2 %v3106_v31  ;;  %v3190_v31 = vor.u32 %v3458_v32, %v3189_v16  ;;  %v3297_v32 = vld [vmem:[%s5409_s8 + $0x48] sm:$0xf]  ;;  %vm1287_vm13 = vcmp.gt.s32.totalorder %v4240_v28, 7 }
 0x4fa   :  { %v1150_v45 = vsub.f32 1.0, %v1149_v46  ;;  %vm4566_vm2 = vmor %vm1173_vm1, %vm1174_vm0  ;;  %v1180_v46 = vor.u32 1.1754944e-38, %v1179_v12  ;;  %v3269_v28 = vld [vmem:[%s5409_s8 + $0x8] sm:$0xf] }
 0x4fb   :  { %v1170_v61 = vsub.f32 1.0, %v1169_v15 }
 0x4fc   :  { %v1151_v52 = vmul.f32 %v3571_v37, %v1150_v45  ;;  %v3094_v45 = vor.u32 %v3434_v10, %v3093_v3  ;;  %1551 = vmatpush.bf16.msrb.mxu3 %v3086_v13  ;;  %v3177_v10 = vld [vmem:[%s5411_s7 + $0x18] sm:$0xf]  ;;  %v3452_v13 = vld [vmem:[%s5411_s7 + $0x8] sm:$0xf0] }
 0x4fd   :  { %v1171_v59 = vmul.f32 %v4483_v60, %v1170_v61  ;;  %v3081_v61 = vld [vmem:[%s5408_s6 + $0x18] sm:$0xf] }
 0x4fe   :  { %v1152_v54 = vadd.f32 %v3571_v37, %v1151_v52  ;;  %1521 = vmatpush.bf16.msra.mxu2 %v3094_v45  ;;  %v3082_v40 = vor.u32 %v3431_v51, %v3081_v61  ;;  %v4727_v61 = vor.u32 %v3493_v33, %v3335_v6  ;;  %v3285_v6 = vld [vmem:[%s5409_s8 + $0x30] sm:$0xf] }
 0x4ff   :  { %v1172_v39 = vadd.f32 %v4483_v60, %v1171_v59  ;;  %v3427_v59 = vld [vmem:[%s5408_s6 + $0x4] sm:$0xf] }
 0x500   :  { %v1156_v5 = vsel %vm1155_vm14, %v3571_v37, %v1152_v54 }
 0x501   :  { %v1161_v7 = vsel %vm1158_vm15, %v1160_v22, %v1156_v5  ;;  %v1176_v27 = vsel %vm4566_vm2, %v4483_v60, %v1172_v39  ;;  %v3435_v60 = vld [vmem:[%s5408_s6 + $0x40] sm:$0xf0]  ;;  %v3345_v22 = vld [vmem:[%s5409_s8 + $0xa8] sm:$0xf]  ;;  %v3078_v39 = vor.u32 %v3429_v41, %v3077_v58 }
 0x502   :  { %v1184_v35 = vmul.f32 %v1183_v63, %v1161_v7  ;;  %v1181_v15 = vsel %vm1178_vm3, %v1180_v46, %v1176_v27  ;;  %v3102_v38 = vor.u32 %v3435_v60, %v3101_v57  ;;  %v3074_v63 = vor.u32 %v3427_v59, %v3071_v0  ;;  %1522 = vmatpush.bf16.msra.mxu2 %v3082_v40  ;;  %v3461_v27 = vld [vmem:[%s5411_s7 + $0x50] sm:$0xf0]  ;;  %v3496_v57 = vld [vmem:[%s5409_s8 + $0xac] sm:$0xf]  ;;  %v3347_v60 = vld [vmem:[%s5409_s8 + $0xb4] sm:$0xf0] }
 0x503   :  { %v1187_v42 = vsub.f32 1.0, %v1181_v15  ;;  %v1189_v21 = vmul.f32 %v1181_v15, %v4441_v23  ;;  %v3070_v7 = vor.u32 %v3428_v50, %v3069_v48  ;;  %v4644_v4 = vor.u32 %v3497_v53, %v3345_v22  ;;  %v3425_v46 = vld [vmem:[%s5410_s1 + $0x10] sm:$0xff]  ;;  %v3455_v15 = vld [vmem:[%s5411_s7 + $0x20] sm:$0xf0]  ;;  %v3321_v40 = vld [vmem:[%s5409_s8 + $0x78] sm:$0xf] }
 0x504   :  { %v1185_v37 = vadd.f32 %v1184_v35, %v5435_v36  ;;  %1579 = vmatpush.bf16.msrb.mxu0 %v3102_v38  ;;  %1552 = vmatpush.bf16.msrb.mxu3 %v3074_v63  ;;  %v3237_v35 = vld [vmem:[%s5411_s7 + $0x90] sm:$0xf]  ;;  %v3464_v36 = vld [vmem:[%s5411_s7 + $0x68] sm:$0xf0]  ;;  %v3202_v34 = vor.u32 %v3461_v27, %v3201_v47  ;;  %v4698_v3 = vor.u32 %v3496_v57, %v3347_v60  ;;  %v5436_v59 = vld [vmem:[#allocation8_spill] sm:$0xff] }
 0x505   :  { %v3238_v17 = vor.u32 %v3470_v43, %v3237_v35  ;;  %v3178_v30 = vor.u32 %v3455_v15, %v3177_v10  ;;  %v3333_v38 = vld [vmem:[%s5409_s8 + $0x90] sm:$0xf]  ;;  %v303_v0 = vadd.f32 %v5436_v59, %v4208_v9  ;;  %v3491_v58 = vld [vmem:[%s5409_s8 + $0x80] sm:$0xf0]  ;;  %v3323_v9 = vld [vmem:[%s5409_s8 + $0x84] sm:$0xf0] }
 0x506   :  { %3574 = vtanh.f32 %v1185_v37  ;;  %1523 = vmatpush.bf16.msra.mxu2 %v3070_v7  ;;  %v3214_v37 = vor.u32 %v3464_v36, %v3213_v29  ;;  %v4716_v45 = vor.u32 %v3494_v26, %v3333_v38  ;;  %v4754_v50 = vor.u32 %v3491_v58, %v3321_v40  ;;  %v3245_v22 = vld [vmem:[%s5411_s7 + $0x98] sm:$0xf]  ;;  %v3471_v53 = vld [vmem:[%s5411_s7 + $0xa0] sm:$0xf0]  ;;  %v3469_v7 = vld [vmem:[%s5411_s7 + $0x94] sm:$0xf] }
 0x507   :  { %v3311_v36 = vld [vmem:[%s5409_s8 + $0x6c] sm:$0xf0]  ;;  %v3426_v27 = vld [vmem:[%s5410_s1 + $0x18] sm:$0xff]  ;;  %v3221_v57 = vld [vmem:[%s5411_s7 + $0x68] sm:$0xf] }
 0x508   :  { %1580 = vmatpush.bf16.msrb.mxu0 %v3090_v25  ;;  %v3251_v25 = vld [vmem:[%s5411_s7 + $0xb4] sm:$0xf0]  ;;  %v4800_v47 = vor.u32 %v3487_v2, %v3311_v36  ;;  %v3465_v15 = vld [vmem:[%s5411_s7 + $0x70] sm:$0xf0]  ;;  %v3287_v58 = vld [vmem:[%s5409_s8 + $0x3c] sm:$0xf0] }
 0x509   :  { %v3299_v38 = vld [vmem:[%s5409_s8 + $0x54] sm:$0xf0]  ;;  %v3481_v40 = vld [vmem:[%s5409_s8 + $0x34] sm:$0xf] }
 0x50c   :  { %v3575_v52 = vpop.eup %3574  ;;  %1581 = vmatpush.bf16.msrb.mxu0 %v3078_v39  ;;  %v3246_v39 = vor.u32 %v3471_v53, %v3245_v22  ;;  %v3479_v22 = vld [vmem:[%s5409_s8 + $0x20] sm:$0xf0]  ;;  %v3460_v53 = vld [vmem:[%s5411_s7 + $0x4c] sm:$0xf] }
 0x50d   :  { %v1188_v55 = vmul.f32 %v3575_v52, %v1187_v42  ;;  %v3474_v42 = vld [vmem:[%s5411_s7 + $0xb8] sm:$0xf0]  ;;  %v3165_v52 = vld [vmem:[%s5411_s7] sm:$0xf] }
 0x50e   :  { %v3258_v51 = vor.u32 %v3474_v42, %v3257_v20  ;;  %v3482_v20 = vld [vmem:[%s5409_s8 + $0x38] sm:$0xf0]  ;;  %v3222_v42 = vor.u32 %v3465_v15, %v3221_v57 }
 0x50f   :  { %v1190_v54 = vadd.f32 %v1189_v21, %v1188_v55  ;;  %v3166_v55 = vor.u32 %v3452_v13, %v3165_v52  ;;  %v3472_v21 = vld [vmem:[%s5411_s7 + $0xac] sm:$0xf]  ;;  %v4841_v52 = vor.u32 %v3482_v20, %v3285_v6  ;;  %v3463_v13 = vld [vmem:[%s5411_s7 + $0x64] sm:$0xf]  ;;  %v3454_v57 = vld [vmem:[%s5411_s7 + $0x1c] sm:$0xf] }
 0x510   :  { %1790 = vmatpush.bf16.msrb.mxu2 %v3258_v51  ;;  %v3254_v41 = vor.u32 %v3472_v21, %v3251_v25  ;;  %v3209_v21 = vld [vmem:[%s5411_s7 + $0x50] sm:$0xf] }
 0x511   :  { %v4637_v44 = vsel %vm1191_vm4, %v1190_v54, %v4441_v23  ;;  %v1193_v5 = vsel %vm1191_vm4, %v1190_v54, 0.0  ;;  %v3423_v23 = vld [vmem:[%s5410_s1] sm:$0xff]  ;;  %v3490_v54 = vld [vmem:[%s5409_s8 + $0x7c] sm:$0xf] }
 0x512   :  { %v1199_v8 = vpack.c.bf16 %v4637_v44, %v4637_v44  ;;  %v4642_v1 = vadd.f32 %v1193_v5, %v4444_v18  ;;  %1524 = vmatmul.bf16.vlgmr.msra.gmra.mxu2 %v3423_v23  ;;  %v3249_v18 = vld [vmem:[%s5411_s7 + $0xa8] sm:$0xf] }
 0x513   :  { %v3250_v12 = vor.u32 %v3473_v11, %v3249_v18  ;;  %v3309_v11 = vld [vmem:[%s5409_s8 + $0x60] sm:$0xf] }
 0x514   :  { %1208 = vmatmul.bf16.vlgmr.msra.gmra.mxu3 %v1199_v8  ;;  %1221 = vmatmul.bf16.vlgmr.msra.gmra.mxu0 %v1199_v8 }
 0x515   :  { %1234 = vmatmul.bf16.vlgmr.msra.gmra.mxu1 %v1199_v8  ;;  %2023 = vmatpush.bf16.msra.mxu3 %v4644_v4  ;;  %v4767_v8 = vor.u32 %v3490_v54, %v3323_v9  ;;  %v3273_v9 = vld [vmem:[%s5409_s8 + $0x18] sm:$0xf] }
 0x516   :  { %1764 = vmatpush.bf16.msrb.mxu1 %v3250_v12  ;;  %2036 = vmatpush.bf16.msra.mxu0 %v4698_v3  ;;  %v3488_v12 = vld [vmem:[%s5409_s8 + $0x68] sm:$0xf0] }
 0x517   :  { %1791 = vmatpush.bf16.msrb.mxu2 %v3246_v39  ;;  %v4783_v43 = vor.u32 %v3488_v12, %v3309_v11  ;;  %v3197_v39 = vld [vmem:[%s5411_s7 + $0x38] sm:$0xf] }
 0x519   :  { %2024 = vmatpush.bf16.msra.mxu3 %v4716_v45 }
 0x51a   :  { %1765 = vmatpush.bf16.msrb.mxu1 %v3238_v17  ;;  %2037 = vmatpush.bf16.msra.mxu0 %v4727_v61  ;;  %v3468_v17 = vld [vmem:[%s5411_s7 + $0x88] sm:$0xf0] }
 0x51d   :  { %2025 = vmatpush.bf16.msra.mxu3 %v4754_v50 }
 0x51e   :  { %1766 = vmatpush.bf16.msrb.mxu1 %v3226_v14  ;;  %2038 = vmatpush.bf16.msra.mxu0 %v4767_v8  ;;  %v274_v14 = vadd.f32 %v5437_v24, %v4200_v62  ;;  %v3466_v62 = vld [vmem:[%s5411_s7 + $0x7c] sm:$0xf]  ;;  %v3191_v24 = vld [vmem:[%s5411_s7 + $0x3c] sm:$0xf0] }
 0x521   :  { %2026 = vmatpush.bf16.msra.mxu3 %v4783_v43 }
 0x522   :  { %1529 = vmatmul.bf16.gmra.mxu2 %v3424_v56  ;;  %1767 = vmatpush.bf16.msrb.mxu1 %v3214_v37 }
 0x523   :  { %2039 = vmatpush.bf16.msra.mxu0 %v4800_v47 }
 0x524   :  { %1553 = vmatmul.bf16.vlgmr.msrb.gmra.mxu3 %v3423_v23  ;;  %1582 = vmatmul.bf16.vlgmr.msrb.gmra.mxu0 %v3423_v23  ;;  %v3239_v23 = vld [vmem:[%s5411_s7 + $0x9c] sm:$0xf0] }
 0x525   :  { %v3242_v35 = vor.u32 %v3469_v7, %v3239_v23  ;;  %v4882_v23 = vor.u32 %v3479_v22, %v3273_v9  ;;  %v3341_v9 = vld [vmem:[%s5409_s8 + $0x98] sm:$0xf]  ;;  %v3495_v22 = vld [vmem:[%s5409_s8 + $0xa0] sm:$0xf0] }
 0x526   :  { %1768 = vmatpush.bf16.msrb.mxu1 %v3202_v34  ;;  %v3227_v34 = vld [vmem:[%s5411_s7 + $0x84] sm:$0xf0] }
 0x52a   :  { %1769 = vmatpush.bf16.msrb.mxu1 %v3190_v31  ;;  %v3230_v31 = vor.u32 %v3466_v62, %v3227_v34  ;;  %v3476_v62 = vld [vmem:[%s5409_s8 + $0x8] sm:$0xf0] }
 0x52e   :  { %1770 = vmatpush.bf16.msrb.mxu1 %v3178_v30  ;;  %v3484_v30 = vld [vmem:[%s5409_s8 + $0x4c] sm:$0xf] }
 0x52f   :  { %v4838_v51 = vor.u32 %v3484_v30, %v3299_v38 }
 0x531   :  { %2040 = vmatpush.bf16.msra.mxu0 %v4838_v51 }
 0x532   :  { %1534 = vmatmul.bf16.gmra.mxu2 %v3425_v46  ;;  %1771 = vmatpush.bf16.msrb.mxu1 %v3166_v55  ;;  %v3215_v55 = vld [vmem:[%s5411_s7 + $0x6c] sm:$0xf0] }
 0x533   :  { %v3218_v59 = vor.u32 %v3463_v13, %v3215_v55  ;;  %v3451_v13 = vld [vmem:[%s5411_s7 + $0x4] sm:$0xf]  ;;  %v3167_v55 = vld [vmem:[%s5411_s7 + $0xc] sm:$0xf0] }
 0x534   :  { %1558 = vmatmul.bf16.gmra.mxu3 %v3424_v56  ;;  %1587 = vmatmul.bf16.gmra.mxu0 %v3424_v56  ;;  %v3233_v56 = vld [vmem:[%s5411_s7 + $0x80] sm:$0xf] }
 0x535   :  { %v3234_v29 = vor.u32 %v3468_v17, %v3233_v56  ;;  %v3275_v56 = vld [vmem:[%s5409_s8 + $0x24] sm:$0xf0]  ;;  %v3457_v17 = vld [vmem:[%s5411_s7 + $0x34] sm:$0xf] }
 0x536   :  { %1777 = vmatpush.bf16.msra.mxu1 %v3254_v41  ;;  %v3194_v36 = vor.u32 %v3457_v17, %v3191_v24 }
 0x537   :  { %1792 = vmatpush.bf16.msrb.mxu2 %v3234_v29 }
 0x53a   :  { %1778 = vmatpush.bf16.msra.mxu1 %v3242_v35  ;;  %v3478_v35 = vld [vmem:[%s5409_s8 + $0x1c] sm:$0xf] }
 0x53b   :  { %1793 = vmatpush.bf16.msrb.mxu2 %v3222_v42  ;;  %v4898_v2 = vor.u32 %v3478_v35, %v3275_v56  ;;  %v3492_v35 = vld [vmem:[%s5409_s8 + $0x88] sm:$0xf0] }
 0x53d   :  { %5438 = vst [vmem:[#allocation7_spill] sm:$0xff] %v4898_v2 }
 0x53e   :  { %1779 = vmatpush.bf16.msra.mxu1 %v3230_v31 }
 0x542   :  { %1539 = vmatmul.bf16.gmra.mxu2 %v3426_v27  ;;  %1780 = vmatpush.bf16.msra.mxu1 %v3218_v59  ;;  %v3353_v59 = vld [vmem:[%s5409_s8 + $0xb0] sm:$0xf] }
 0x544   :  { %1563 = vmatmul.bf16.gmra.mxu3 %v3425_v46  ;;  %1592 = vmatmul.bf16.gmra.mxu0 %v3425_v46  ;;  %v3485_v46 = vld [vmem:[%s5409_s8 + $0x50] sm:$0xf0] }
 0x545   :  { %v4820_v10 = vor.u32 %v3485_v46, %v3297_v32  ;;  %v3475_v32 = vld [vmem:[%s5409_s8 + $0x4] sm:$0xf]  ;;  %v3263_v46 = vld [vmem:[%s5409_s8 + $0xc] sm:$0xf0] }
 0x546   :  { %v4931_v15 = vor.u32 %v3475_v32, %v3263_v46 }
 0x547   :  { %2027 = vmatpush.bf16.msra.mxu3 %v4820_v10 }
 0x548   :  { %5440 = vst [vmem:[#allocation6_spill] sm:$0xff] %v4931_v15 }
 0x54b   :  { %2028 = vmatpush.bf16.msra.mxu3 %v4841_v52 }
 0x54f   :  { %2029 = vmatpush.bf16.msra.mxu3 %v4882_v23 }
 0x554   :  { %1568 = vmatmul.bf16.gmra.mxu3 %v3426_v27  ;;  %1597 = vmatmul.bf16.gmra.mxu0 %v3426_v27  ;;  %v3261_v27 = vld [vmem:[%s5409_s8] sm:$0xf] }
 0x591   :  { %v1222_v48 = vpop.f32.mrf.mxu0 }
 0x592   :  { %v1259_v5 = vadd.f32 %v1222_v48, %v303_v0  ;;  %v4765_v63 = vpop.f32.mrf.mxu1  ;;  %v3462_v0 = vld [vmem:[%s5411_s7 + $0x58] sm:$0xf0]  ;;  %v4864_v48 = vor.u32 %v3481_v40, %v3287_v58 }
 0x593   :  { %v3210_v41 = vor.u32 %v3462_v0, %v3209_v21  ;;  %v3498_v0 = vld [vmem:[%s5409_s8 + $0xb8] sm:$0xf0]  ;;  %v1279_v17 = vadd.f32 %v4537_v19, %v4765_v63  ;;  %v3317_v19 = vld [vmem:[%s5409_s8 + $0x68] sm:$0xf]  ;;  %v3489_v63 = vld [vmem:[%s5409_s8 + $0x70] sm:$0xf0] }
 0x594   :  { %v3050_v18 = vmul.f32 -1.442695, %v1259_v5  ;;  %v3203_v5 = vld [vmem:[%s5411_s7 + $0x54] sm:$0xf0]  ;;  %2041 = vmatpush.bf16.msra.mxu0 %v4864_v48  ;;  %v4959_v58 = vor.u32 %v3498_v0, %v3353_v59 }
 0x595   :  { %1794 = vmatpush.bf16.msrb.mxu2 %v3210_v41  ;;  %v3206_v11 = vor.u32 %v3460_v53, %v3203_v5 }
 0x596   :  { %3576 = vpow2.f32 %v3050_v18  ;;  %v3459_v18 = vld [vmem:[%s5411_s7 + $0x40] sm:$0xf0] }
 0x597   :  { %v1209_v37 = vpop.f32.mrf.mxu3  ;;  %v3198_v12 = vor.u32 %v3459_v18, %v3197_v39  ;;  %1781 = vmatpush.bf16.msra.mxu1 %v3206_v11  ;;  %v4971_v18 = vor.u32 %v3495_v22, %v3341_v9 }
 0x598   :  { %v1239_v16 = vadd.f32 %v1209_v37, %v274_v14  ;;  %v3185_v14 = vld [vmem:[%s5411_s7 + $0x20] sm:$0xf]  ;;  %v3456_v37 = vld [vmem:[%s5411_s7 + $0x28] sm:$0xf0]  ;;  %2042 = vmatpush.bf16.msra.mxu0 %v4898_v2 }
 0x599   :  { %v1224_v60 = vpop.f32.mrf.mxu0  ;;  %1795 = vmatpush.bf16.msrb.mxu2 %v3198_v12  ;;  %v3186_v31 = vor.u32 %v3456_v37, %v3185_v14  ;;  %v3329_v12 = vld [vmem:[%s5409_s8 + $0x80] sm:$0xf]  ;;  %v5441_v37 = vld [vmem:[#allocation9_spill] sm:$0xff] }
 0x59a   :  { %v3049_v26 = vmul.f32 -1.442695, %v1239_v16  ;;  %v1237_v33 = vpop.f32.mrf.mxu1  ;;  %v4916_v16 = vor.u32 %v3476_v62, %v3261_v27  ;;  %v3179_v60 = vld [vmem:[%s5411_s7 + $0x24] sm:$0xf0]  ;;  %v332_v27 = vadd.f32 %v5441_v37, %v4221_v49 }
 0x59b   :  { %1782 = vmatpush.bf16.msra.mxu1 %v3194_v36  ;;  %v3182_v38 = vor.u32 %v3454_v57, %v3179_v60  ;;  %v3453_v33 = vld [vmem:[%s5411_s7 + $0x10] sm:$0xf0]  ;;  %v4986_v36 = vor.u32 %v3492_v35, %v3329_v12 }
 0x59c   :  { %v3577_v25 = vpop.eup %3576  ;;  %3578 = vpow2.f32 %v3049_v26  ;;  %5439 = vst [vmem:[#allocation4_spill] sm:$0xff] %v4916_v16  ;;  %2030 = vmatpush.bf16.msra.mxu3 %v4916_v16  ;;  %v3173_v26 = vld [vmem:[%s5411_s7 + $0x8] sm:$0xf]  ;;  %2043 = vmatpush.bf16.msra.mxu0 %v4931_v15 }
 0x59d   :  { %v4861_v54 = vadd.f32 1.0, %v3577_v25  ;;  %1796 = vmatpush.bf16.msrb.mxu2 %v3186_v31  ;;  %v3174_v20 = vor.u32 %v3453_v33, %v3173_v26  ;;  %v3170_v25 = vor.u32 %v3451_v13, %v3167_v55  ;;  %v5003_v31 = vor.u32 %v3489_v63, %v3317_v19  ;;  %v3293_v26 = vld [vmem:[%s5409_s8 + $0x38] sm:$0xf]  ;;  %v3483_v33 = vld [vmem:[%s5409_s8 + $0x40] sm:$0xf0] }
 0x59e   :  { %v5026_v55 = vor.u32 %v3483_v33, %v3293_v26 }
 0x59f   :  { %v1211_v7 = vpop.f32.mrf.mxu3  ;;  %3580 = vrcp.f32 %v4861_v54  ;;  %1783 = vmatpush.bf16.msra.mxu1 %v3182_v38  ;;  %v1275_v62 = vand.u32 2147483648, %v4861_v54  ;;  %vm1269_vm10 = vweird.f32 %v4861_v54  ;;  %v1273_v32 = vand.u32 2147483647, %v4861_v54  ;;  %v3486_v38 = vld [vmem:[%s5409_s8 + $0x58] sm:$0xf0] }
 0x5a0   :  { %2132 = vmatpush.bf16.msrb.mxu3 %v4698_v3  ;;  %2145 = vmatpush.bf16.msrb.mxu0 %v4959_v58 }
 0x5a1   :  { %1797 = vmatpush.bf16.msrb.mxu2 %v3174_v20  ;;  %v1276_v57 = vor.u32 1.1754944e-38, %v1275_v62  ;;  %vm1274_vm12 = vcmp.eq.f32.partialorder %v1273_v32, 8.507059e+37  ;;  %v5104_v19 = vpop.f32.mrf.mxu0  ;;  %v1525_v32 = vpop.f32.mrf.mxu2 }
 0x5a2   :  { %v3579_v29 = vpop.eup %3578 }
 0x5a3   :  { %v1243_v34 = vadd.f32 1.0, %v3579_v29  ;;  %1784 = vmatpush.bf16.msra.mxu1 %v3170_v25  ;;  %v3480_v25 = vld [vmem:[%s5409_s8 + $0x28] sm:$0xf0] }
 0x5a4   :  { %2133 = vmatpush.bf16.msrb.mxu3 %v4727_v61  ;;  %2146 = vmatpush.bf16.msrb.mxu0 %v4971_v18 }
 0x5a5   :  { %3582 = vrcp.f32 %v1243_v34  ;;  %v4933_v30 = vpop.eup %3580  ;;  %2119 = vmatpush.bf16.msra.mxu2 %v4644_v4  ;;  %v1255_v53 = vand.u32 2147483648, %v1243_v34  ;;  %v1253_v39 = vand.u32 2147483647, %v1243_v34  ;;  %vm1249_vm6 = vweird.f32 %v1243_v34 }
 0x5a6   :  { %v1265_v6 = vmul.f32 %v4933_v30, %v4861_v54  ;;  %vm1270_vm9 = vweird.f32 %v4933_v30  ;;  %v3305_v54 = vld [vmem:[%s5409_s8 + $0x50] sm:$0xf] }
 0x5a7   :  { %v1256_v56 = vor.u32 1.1754944e-38, %v1255_v53  ;;  %vm1254_vm8 = vcmp.eq.f32.partialorder %v1253_v39, 8.507059e+37  ;;  %vm1271_vm11 = vmor %vm1269_vm10, %vm1270_vm9  ;;  %v1312_v53 = vpop.permute.xlu0 %1311  ;;  %v5108_v63 = vpop.f32.mrf.mxu3 }
 0x5a8   :  { %v1266_v40 = vsub.f32 1.0, %v1265_v6  ;;  %2134 = vmatpush.bf16.msrb.mxu3 %v4767_v8  ;;  %2147 = vmatpush.bf16.msrb.mxu0 %v4986_v36 }
 0x5a9   :  { %2120 = vmatpush.bf16.msra.mxu2 %v4716_v45 }
 0x5aa   :  { %v1267_v7 = vmul.f32 %v4933_v30, %v1266_v40 }
 0x5ab   :  { %v3583_v42 = vpop.eup %3582 }
 0x5ac   :  { %v1245_v21 = vmul.f32 %v3583_v42, %v1243_v34  ;;  %vm1250_vm5 = vweird.f32 %v3583_v42  ;;  %2135 = vmatpush.bf16.msrb.mxu3 %v4800_v47  ;;  %v1268_v14 = vadd.f32 %v4933_v30, %v1267_v7  ;;  %2148 = vmatpush.bf16.msrb.mxu0 %v5003_v31  ;;  %v1884_v7 = vld [vmem:[%s5413_s12] sm:$0xff] }
 0x5ad   :  { %vm1251_vm7 = vmor %vm1249_vm6, %vm1250_vm5  ;;  %2121 = vmatpush.bf16.msra.mxu2 %v4754_v50  ;;  %1889 = vperm.xlu1 %3501, %v1884_v7   ;;  %vm2785_vm14 = vcmp.gt.s32.totalorder %v1884_v7, 1 }
 0x5ae   :  { %v1246_v41 = vsub.f32 1.0, %v1245_v21  ;;  %v1272_v49 = vsel %vm1271_vm11, %v4933_v30, %v1268_v14  ;;  %v5014_v30 = vor.u32 %v3486_v38, %v3305_v54  ;;  %v3281_v21 = vld [vmem:[%s5409_s8 + $0x20] sm:$0xf] }
 0x5af   :  { %v1277_v60 = vsel %vm1274_vm12, %v1276_v57, %v1272_v49  ;;  %v5112_v49 = vpop.f32.mrf.mxu3  ;;  %v1527_v57 = vpop.f32.mrf.mxu2 }
 0x5b0   :  { %v1247_v5 = vmul.f32 %v3583_v42, %v1246_v41  ;;  %2136 = vmatpush.bf16.msrb.mxu3 %v4838_v51  ;;  %v1283_v6 = vsub.f32 1.0, %v1277_v60  ;;  %2149 = vmatpush.bf16.msrb.mxu0 %v5014_v30  ;;  %v1285_v13 = vmul.f32 %v1277_v60, %v4637_v44  ;;  %v5041_v41 = vor.u32 %v3480_v25, %v3281_v21 }
 0x5b1   :  { %2122 = vmatpush.bf16.msra.mxu2 %v4783_v43 }
 0x5b2   :  { %v1248_v11 = vadd.f32 %v3583_v42, %v1247_v5 }
 0x5b4   :  { %v1252_v24 = vsel %vm1251_vm7, %v3583_v42, %v1248_v11  ;;  %2137 = vmatpush.bf16.msrb.mxu3 %v4864_v48  ;;  %2150 = vmatpush.bf16.msrb.mxu0 %v5026_v55  ;;  %v2786_v11 = vsel %vm2785_vm14, %v1884_v7, 1 }
 0x5b5   :  { %v1257_v29 = vsel %vm1254_vm8, %v1256_v56, %v1252_v24  ;;  %2123 = vmatpush.bf16.msra.mxu2 %v4820_v10  ;;  %v2787_v12 = vcvt.s32.f32 %v2786_v11 }
 0x5b6   :  { %v1280_v34 = vmul.f32 %v1279_v17, %v1257_v29 }
 0x5b7   :  { %v2799_v17 = vand.u32 2147483648, %v2787_v12  ;;  %vm2793_vm15 = vweird.f32 %v2787_v12  ;;  %v2797_v14 = vand.u32 2147483647, %v2787_v12  ;;  %v5117_v54 = vpop.f32.mrf.mxu3  ;;  %v1530_v38 = vpop.f32.mrf.mxu2 }
 0x5b8   :  { %v1281_v46 = vadd.f32 %v1280_v34, %v332_v27  ;;  %2138 = vmatpush.bf16.msrb.mxu3 %v4898_v2  ;;  %2151 = vmatpush.bf16.msrb.mxu0 %v5041_v41 }
 0x5b9   :  { %2124 = vmatpush.bf16.msra.mxu2 %v4841_v52  ;;  %v2800_v37 = vor.u32 1.1754944e-38, %v2799_v17  ;;  %vm2798_vm2 = vcmp.eq.f32.partialorder %v2797_v14, 8.507059e+37 }
 0x5ba   :  { %3584 = vtanh.f32 %v1281_v46  ;;  %v1585_v46 = vpop.f32.mrf.mxu0 }
 0x5bb   :  { %3586 = vrcp.f32 %v2787_v12 }
 0x5bc   :  { %2139 = vmatpush.bf16.msrb.mxu3 %v4931_v15 }
 0x5bd   :  { %2125 = vmatpush.bf16.msra.mxu2 %v4882_v23 }
 0x5bf   :  { %v5122_v33 = vpop.f32.mrf.mxu3 }
 0x5c0   :  { %v3585_v20 = vpop.eup %3584 }
 0x5c1   :  { %v1284_v42 = vmul.f32 %v3585_v20, %v1283_v6  ;;  %2126 = vmatpush.bf16.msra.mxu2 %v4916_v16  ;;  %v3587_v35 = vpop.eup %3586  ;;  %v1532_v6 = vpop.f32.mrf.mxu2 }
 0x5c2   :  { %v2789_v56 = vmul.f32 %v3587_v35, %v2787_v12  ;;  %vm2794_vm0 = vweird.f32 %v3587_v35  ;;  %v1588_v60 = vpop.f32.mrf.mxu0 }
 0x5c3   :  { %v1286_v59 = vadd.f32 %v1285_v13, %v1284_v42  ;;  %vm2795_vm1 = vmor %vm2793_vm15, %vm2794_vm0 }
 0x5c4   :  { %v2790_v24 = vsub.f32 1.0, %v2789_v56 }
 0x5c5   :  { %v5039_v0 = vsel %vm1287_vm13, %v1286_v59, %v4637_v44  ;;  %v1289_v40 = vsel %vm1287_vm13, %v1286_v59, 0.0  ;;  %v3477_v44 = vld [vmem:[%s5409_s8 + $0x10] sm:$0xf0] }
 0x5c6   :  { %v5046_v9 = vpack.c.bf16 %v5039_v0, %v5039_v0  ;;  %v1290_v22 = vadd.f32 %v1289_v40, %v4642_v1  ;;  %v5058_v39 = vor.u32 %v3477_v44, %v3269_v28  ;;  %v2791_v29 = vmul.f32 %v3587_v35, %v2790_v24 }
 0x5c7   :  { %v5126_v42 = vpop.f32.mrf.mxu3 }
 0x5c8   :  { %2031 = vmatmul.bf16.vlgmr.msra.gmra.mxu3 %v5046_v9  ;;  %2044 = vmatmul.bf16.vlgmr.msra.gmra.mxu0 %v5046_v9  ;;  %v1314_v5 = vmul.f32 %v1312_v53, %v1290_v22  ;;  %5442 = vst [vmem:[#allocation8_spill] sm:$0xff] %v5058_v39  ;;  %v2792_v27 = vadd.f32 %v3587_v35, %v2791_v29  ;;  %v1356_v53 = vld [vmem:[%s5415_s9] sm:$0x7] }
 0x5c9   :  { %2241 = vmatpush.bf16.msra.mxu3 %v4959_v58  ;;  %2152 = vmatpush.bf16.msrb.mxu0 %v5058_v39  ;;  %v1535_v13 = vpop.f32.mrf.mxu2 }
 0x5ca   :  { %1315 = vst [vmem:[%s5412_s13] sm:$0xff] %v1314_v5  ;;  %v1603_v1 = vpack.c.bf16 %v1314_v5, %v1314_v5  ;;  %v2796_v62 = vsel %vm2795_vm1, %v3587_v35, %v2792_v27  ;;  %v1590_v26 = vpop.f32.mrf.mxu0  ;;  %v1358_v5 = vperm.slane %v1356_v53, 0 }
 0x5cb   :  { %v2801_v34 = vsel %vm2798_vm2, %v2800_v37, %v2796_v62  ;;  %v5132_v37 = vperm.slane %v1356_v53, 2 }
 0x5cc   :  { %1772 = vmatmul.bf16.vlgmr.msrb.gmra.mxu1 %v1603_v1  ;;  %1798 = vmatmul.bf16.vlgmr.msrb.gmra.mxu2 %v1603_v1  ;;  %v1536_v11 = vadd.f32 %v1535_v13, %v1358_v5  ;;  %v1526_v17 = vadd.f32 %v1525_v32, %v1358_v5  ;;  %v1528_v24 = vadd.f32 %v1527_v57, %v1358_v5 }
 0x5cd   :  { %2049 = vmatpush.bf16.msrb.mxu1 %v4959_v58  ;;  %2228 = vmatpush.bf16.msrb.mxu2 %v4698_v3  ;;  %v1531_v14 = vadd.f32 %v1530_v38, %v1358_v5  ;;  %v1533_v29 = vadd.f32 %v1532_v6, %v1358_v5  ;;  %v1586_v6 = vadd.f32 %v1585_v46, %v5132_v37 }
 0x5ce   :  { %2242 = vmatpush.bf16.msra.mxu3 %v4971_v18  ;;  %2311 = vmatpush.bf16.msra.mxu0 %v4644_v4 }
 0x5cf   :  { %2805 = vperm.xlu1 %3501, %v2801_v34   ;;  %v1566_v25 = vpop.f32.mrf.mxu3 }
 0x5d1   :  { %2050 = vmatpush.bf16.msrb.mxu1 %v4971_v18  ;;  %2229 = vmatpush.bf16.msrb.mxu2 %v4727_v61  ;;  %v1537_v59 = vpop.f32.mrf.mxu2 }
 0x5d2   :  { %2243 = vmatpush.bf16.msra.mxu3 %v4986_v36  ;;  %2312 = vmatpush.bf16.msra.mxu0 %v4716_v45  ;;  %v1593_v20 = vpop.f32.mrf.mxu0  ;;  %v1538_v12 = vadd.f32 %v1537_v59, %v1358_v5 }
 0x5d5   :  { %2051 = vmatpush.bf16.msrb.mxu1 %v4986_v36  ;;  %2230 = vmatpush.bf16.msrb.mxu2 %v4767_v8 }
 0x5d6   :  { %2244 = vmatpush.bf16.msra.mxu3 %v5003_v31  ;;  %2313 = vmatpush.bf16.msra.mxu0 %v4754_v50 }
 0x5d9   :  { %2052 = vmatpush.bf16.msrb.mxu1 %v5003_v31  ;;  %2231 = vmatpush.bf16.msrb.mxu2 %v4800_v47  ;;  %v1540_v22 = vpop.f32.mrf.mxu2 }
 0x5da   :  { %2245 = vmatpush.bf16.msra.mxu3 %v5014_v30  ;;  %2314 = vmatpush.bf16.msra.mxu0 %v4783_v43  ;;  %v1595_v21 = vpop.f32.mrf.mxu0  ;;  %v1541_v35 = vadd.f32 %v1540_v22, %v1358_v5  ;;  %v1594_v22 = vadd.f32 %v1593_v20, %v5132_v37 }
 0x5dc   :  { %1785 = vmatmul.bf16.vlgmr.msra.gmra.mxu1 %v1603_v1 }
 0x5dd   :  { %2053 = vmatpush.bf16.msrb.mxu1 %v5014_v30  ;;  %2232 = vmatpush.bf16.msrb.mxu2 %v4838_v51 }
 0x5de   :  { %2246 = vmatpush.bf16.msra.mxu3 %v5026_v55  ;;  %2315 = vmatpush.bf16.msra.mxu0 %v4820_v10 }
 0x5e1   :  { %2054 = vmatpush.bf16.msrb.mxu1 %v5026_v55  ;;  %2233 = vmatpush.bf16.msrb.mxu2 %v4864_v48  ;;  %v1542_v1 = vpop.f32.mrf.mxu2 }
 0x5e2   :  { %2247 = vmatpush.bf16.msra.mxu3 %v5041_v41  ;;  %2316 = vmatpush.bf16.msra.mxu0 %v4841_v52  ;;  %v1598_v40 = vpop.f32.mrf.mxu0  ;;  %v1543_v56 = vadd.f32 %v1542_v1, %v1358_v5  ;;  %v1596_v5 = vadd.f32 %v1595_v21, %v5132_v37 }
 0x5e5   :  { %2055 = vmatpush.bf16.msrb.mxu1 %v5041_v41  ;;  %2234 = vmatpush.bf16.msrb.mxu2 %v4898_v2 }
 0x5e6   :  { %2248 = vmatpush.bf16.msra.mxu3 %v5058_v39  ;;  %2317 = vmatpush.bf16.msra.mxu0 %v4882_v23 }
 0x5e9   :  { %2056 = vmatpush.bf16.msrb.mxu1 %v5058_v39  ;;  %2235 = vmatpush.bf16.msrb.mxu2 %v4931_v15 }
 0x5ea   :  { %2318 = vmatpush.bf16.msra.mxu0 %v4916_v16  ;;  %v1600_v28 = vpop.f32.mrf.mxu0 }
 0x5ec   :  { %2057 = vmatmul.bf16.vlgmr.msrb.gmra.mxu1 %v5046_v9  ;;  %v1569_v9 = vpop.f32.mrf.mxu3 }
 0x5ed   :  { %2215 = vmatpush.bf16.msra.mxu1 %v4644_v4 }
 0x5f1   :  { %2216 = vmatpush.bf16.msra.mxu1 %v4716_v45 }
 0x5f4   :  { %v1571_v44 = vpop.f32.mrf.mxu3 }
 0x5f5   :  { %2217 = vmatpush.bf16.msra.mxu1 %v4754_v50 }
 0x5f9   :  { %2218 = vmatpush.bf16.msra.mxu1 %v4783_v43 }
 0x5fd   :  { %2219 = vmatpush.bf16.msra.mxu1 %v4820_v10 }
 0x601   :  { %2220 = vmatpush.bf16.msra.mxu1 %v4841_v52 }
 0x605   :  { %2221 = vmatpush.bf16.msra.mxu1 %v4882_v23 }
 0x609   :  { %2222 = vmatpush.bf16.msra.mxu1 %v4916_v16 }
 0x60d   :  { %2324 = vmatpush.bf16.msrb.mxu1 %v4698_v3 }
 0x611   :  { %2325 = vmatpush.bf16.msrb.mxu1 %v4727_v61 }
 0x615   :  { %2326 = vmatpush.bf16.msrb.mxu1 %v4767_v8 }
 0x619   :  { %2327 = vmatpush.bf16.msrb.mxu1 %v4800_v47 }
 0x61d   :  { %2328 = vmatpush.bf16.msrb.mxu1 %v4838_v51 }
 0x621   :  { %2329 = vmatpush.bf16.msrb.mxu1 %v4864_v48 }
 0x625   :  { %2330 = vmatpush.bf16.msrb.mxu1 %v4898_v2 }
 0x629   :  { %2331 = vmatpush.bf16.msrb.mxu1 %v4931_v15 }
 0x645   :  { %v2045_v7 = vpop.f32.mrf.mxu0 }
 0x649   :  { %v1773_v27 = vpop.f32.mrf.mxu1 }
 0x64a   :  { %v1803_v62 = vadd.f32 %v1773_v27, %v1526_v17  ;;  %v5134_v34 = vadd.f32 %v1773_v27, %v1528_v24  ;;  %v5136_v15 = vadd.f32 %v1773_v27, %v1531_v14  ;;  %v5138_v16 = vadd.f32 %v1773_v27, %v1533_v29 }
 0x64b   :  { %v2032_v39 = vpop.f32.mrf.mxu3  ;;  %v5140_v2 = vadd.f32 %v1773_v27, %v1536_v11  ;;  %v5142_v13 = vadd.f32 %v1773_v27, %v1538_v12  ;;  %v5144_v59 = vadd.f32 %v1773_v27, %v1541_v35  ;;  %v5146_v32 = vadd.f32 %v1773_v27, %v1543_v56 }
 0x64c   :  { %v2062_v57 = vadd.f32 %v2032_v39, %v1803_v62  ;;  %v1589_v17 = vadd.f32 %v1588_v60, %v5132_v37  ;;  %v1591_v11 = vadd.f32 %v1590_v26, %v5132_v37  ;;  %v1599_v12 = vadd.f32 %v1598_v40, %v5132_v37 }
 0x64d   :  { %5443 = vst [vmem:[#allocation5_spill] sm:$0xff] %v5146_v32  ;;  %v2047_v38 = vpop.f32.mrf.mxu0  ;;  %v1601_v35 = vadd.f32 %v1600_v28, %v5132_v37  ;;  %v1359_v40 = vperm.slane %v1356_v53, 1 }
 0x64e   :  { %v3355_v1 = vmul.f32 -1.442695, %v2062_v57 }
 0x64f   :  { %v1799_v24 = vpop.f32.mrf.mxu2  ;;  %v1555_v27 = vadd.f32 %v5108_v63, %v1359_v40  ;;  %v1557_v38 = vadd.f32 %v5112_v49, %v1359_v40 }
 0x650   :  { %3588 = vpow2.f32 %v3355_v1  ;;  %v5155_v56 = vadd.f32 %v1799_v24, %v1586_v6  ;;  %v5157_v39 = vadd.f32 %v1799_v24, %v1594_v22  ;;  %v5159_v46 = vadd.f32 %v1799_v24, %v1596_v5 }
 0x651   :  { %v1775_v20 = vpop.f32.mrf.mxu1  ;;  %v5161_v14 = vadd.f32 %v1799_v24, %v1589_v17  ;;  %v5163_v21 = vadd.f32 %v1799_v24, %v1591_v11  ;;  %v5165_v60 = vadd.f32 %v1799_v24, %v1599_v12  ;;  %v5167_v26 = vadd.f32 %v1799_v24, %v1601_v35 }
 0x652   :  { %v1560_v6 = vadd.f32 %v5117_v54, %v1359_v40  ;;  %v1562_v22 = vadd.f32 %v5122_v33, %v1359_v40  ;;  %v1565_v5 = vadd.f32 %v5126_v42, %v1359_v40  ;;  %v1567_v1 = vadd.f32 %v1566_v25, %v1359_v40 }
 0x653   :  { %5444 = vst [vmem:[#allocation9_spill] sm:$0xff] %v5165_v60  ;;  %v2034_v29 = vpop.f32.mrf.mxu3  ;;  %v1570_v17 = vadd.f32 %v1569_v9, %v1359_v40  ;;  %v1572_v11 = vadd.f32 %v1571_v44, %v1359_v40 }
 0x654   :  { %5445 = vst [vmem:[#allocation10_spill] sm:$0xff] %v5167_v26 }
 0x656   :  { %v3589_v28 = vpop.eup %3588 }
 0x657   :  { %v2066_v62 = vadd.f32 1.0, %v3589_v28  ;;  %v1801_v57 = vpop.f32.mrf.mxu2 }
 0x659   :  { %3590 = vrcp.f32 %v2066_v62  ;;  %v1786_v12 = vpop.f32.mrf.mxu1  ;;  %vm2072_vm4 = vweird.f32 %v2066_v62 }
 0x65a   :  { %v1804_v53 = vadd.f32 %v1786_v12, %v1555_v27  ;;  %v5174_v35 = vadd.f32 %v1786_v12, %v1557_v38  ;;  %v5176_v20 = vadd.f32 %v1786_v12, %v1560_v6  ;;  %v5178_v63 = vadd.f32 %v1786_v12, %v1562_v22  ;;  %v5191_v38 = vld [vmem:[%s5414_s10] ss:$0 sm:$0xff] }
 0x65b   :  { %v5180_v29 = vadd.f32 %v1786_v12, %v1565_v5  ;;  %v5182_v49 = vadd.f32 %v1786_v12, %v1567_v1  ;;  %v5184_v33 = vadd.f32 %v1786_v12, %v1570_v17  ;;  %v5186_v42 = vadd.f32 %v1786_v12, %v1572_v11 }
 0x65c   :  { %v2082_v54 = vadd.f32 %v2045_v7, %v1804_v53  ;;  %v2078_v7 = vand.u32 2147483648, %v2066_v62  ;;  %v2076_v5 = vand.u32 2147483647, %v2066_v62 }
 0x65d   :  { %5446 = vst [vmem:[#allocation11_spill] sm:$0xff] %v5186_v42 }
 0x65e   :  { %v3356_v25 = vmul.f32 -1.442695, %v2082_v54  ;;  %v2079_v11 = vor.u32 1.1754944e-38, %v2078_v7  ;;  %vm2077_vm6 = vcmp.eq.f32.partialorder %v2076_v5, 8.507059e+37  ;;  %v1584_v54 = vadd.f32 %v5104_v19, %v5132_v37 }
 0x65f   :  { %v3591_v9 = vpop.eup %3590 }
 0x660   :  { %3592 = vpow2.f32 %v3356_v25  ;;  %v2068_v44 = vmul.f32 %v3591_v9, %v2066_v62  ;;  %vm2073_vm3 = vweird.f32 %v3591_v9 }
 0x661   :  { %v1788_v40 = vpop.f32.mrf.mxu1  ;;  %vm2074_vm5 = vmor %vm2072_vm4, %vm2073_vm3 }
 0x662   :  { %v2069_v28 = vsub.f32 1.0, %v2068_v44  ;;  %v1805_v40 = vadd.f32 %v1799_v24, %v1584_v54 }
 0x664   :  { %v2070_v27 = vmul.f32 %v3591_v9, %v2069_v28 }
 0x666   :  { %v3593_v57 = vpop.eup %3592  ;;  %v2071_v6 = vadd.f32 %v3591_v9, %v2070_v27 }
 0x667   :  { %v2086_v22 = vadd.f32 1.0, %v3593_v57 }
 0x668   :  { %v2075_v17 = vsel %vm2074_vm5, %v3591_v9, %v2071_v6 }
 0x669   :  { %3594 = vrcp.f32 %v2086_v22  ;;  %v2058_v1 = vpop.f32.mrf.mxu1  ;;  %v2080_v53 = vsel %vm2077_vm6, %v2079_v11, %v2075_v17  ;;  %v2098_v62 = vand.u32 2147483648, %v2086_v22  ;;  %v2096_v32 = vand.u32 2147483647, %v2086_v22  ;;  %v5197_v17 = vpop.permute.xlu1 %1889 }
 0x66a   :  { %v2102_v12 = vadd.f32 %v5191_v38, %v2058_v1  ;;  %vm2092_vm8 = vweird.f32 %v2086_v22  ;;  %vm2110_vm11 = vcmp.gt.s32.totalorder %v5197_v17, 0  ;;  %vm2206_vm4 = vcmp.gt.s32.totalorder %v5197_v17, 1 }
 0x66b   :  { %v2099_v6 = vor.u32 1.1754944e-38, %v2098_v62  ;;  %vm2097_vm10 = vcmp.eq.f32.partialorder %v2096_v32, 8.507059e+37  ;;  %v5448_v32 = vld [vmem:[#allocation8_spill] sm:$0xff] }
 0x66c   :  { %v2103_v25 = vmul.f32 %v2102_v12, %v2080_v53  ;;  %v5449_v12 = vld [vmem:[#allocation4_spill] sm:$0xff]  ;;  %v5450_v53 = vld [vmem:[#allocation6_spill] sm:$0xff] }
 0x66e   :  { %v2104_v27 = vadd.f32 %v2103_v25, %v1805_v40 }
 0x66f   :  { %v3595_v44 = vpop.eup %3594 }
 0x670   :  { %v2088_v28 = vmul.f32 %v3595_v44, %v2086_v22  ;;  %vm2093_vm7 = vweird.f32 %v3595_v44  ;;  %3596 = vtanh.f32 %v2104_v27 }
 0x671   :  { %v2060_v57 = vpop.f32.mrf.mxu1  ;;  %vm2094_vm9 = vmor %vm2092_vm8, %vm2093_vm7 }
 0x672   :  { %v2089_v26 = vsub.f32 1.0, %v2088_v28 }
 0x674   :  { %v2090_v42 = vmul.f32 %v3595_v44, %v2089_v26 }
 0x676   :  { %v2091_v9 = vadd.f32 %v3595_v44, %v2090_v42  ;;  %v3597_v37 = vpop.eup %3596 }
 0x678   :  { %v2095_v7 = vsel %vm2094_vm9, %v3595_v44, %v2091_v9 }
 0x679   :  { %v2100_v5 = vsel %vm2097_vm10, %v2099_v6, %v2095_v7 }
 0x67a   :  { %v2106_v19 = vsub.f32 1.0, %v2100_v5  ;;  %v2108_v24 = vmul.f32 %v2100_v5, %v5039_v0 }
 0x67c   :  { %v2107_v1 = vmul.f32 %v3597_v37, %v2106_v19 }
 0x67e   :  { %v2109_v26 = vadd.f32 %v2108_v24, %v2107_v1 }
 0x680   :  { %v5201_v11 = vsel %vm2110_vm11, %v2109_v26, %v5039_v0  ;;  %v5203_v42 = vsel %vm2110_vm11, %v2109_v26, 0.0  ;;  %v5447_v0 = vld [vmem:[#allocation7_spill] sm:$0xff] }
 0x681   :  { %v2118_v22 = vpack.c.bf16 %v5201_v11, %v5201_v11 }
 0x683   :  { %2127 = vmatmul.bf16.vlgmr.msra.gmra.mxu2 %v2118_v22  ;;  %2140 = vmatmul.bf16.vlgmr.msrb.gmra.mxu3 %v2118_v22 }
 0x684   :  { %2153 = vmatmul.bf16.vlgmr.msrb.gmra.mxu0 %v2118_v22  ;;  %2337 = vmatpush.bf16.msra.mxu2 %v4959_v58 }
 0x685   :  { %2407 = vmatpush.bf16.msrb.mxu3 %v4644_v4  ;;  %2420 = vmatpush.bf16.msrb.mxu0 %v4698_v3 }
 0x688   :  { %2338 = vmatpush.bf16.msra.mxu2 %v4971_v18 }
 0x689   :  { %2408 = vmatpush.bf16.msrb.mxu3 %v4716_v45  ;;  %2421 = vmatpush.bf16.msrb.mxu0 %v4727_v61 }
 0x68c   :  { %2339 = vmatpush.bf16.msra.mxu2 %v4986_v36 }
 0x68d   :  { %2409 = vmatpush.bf16.msrb.mxu3 %v4754_v50  ;;  %2422 = vmatpush.bf16.msrb.mxu0 %v4767_v8 }
 0x690   :  { %2340 = vmatpush.bf16.msra.mxu2 %v5003_v31 }
 0x691   :  { %2410 = vmatpush.bf16.msrb.mxu3 %v4783_v43  ;;  %2423 = vmatpush.bf16.msrb.mxu0 %v4800_v47 }
 0x694   :  { %2341 = vmatpush.bf16.msra.mxu2 %v5014_v30 }
 0x695   :  { %2411 = vmatpush.bf16.msrb.mxu3 %v4820_v10  ;;  %2424 = vmatpush.bf16.msrb.mxu0 %v4838_v51 }
 0x698   :  { %2342 = vmatpush.bf16.msra.mxu2 %v5026_v55 }
 0x699   :  { %2412 = vmatpush.bf16.msrb.mxu3 %v4841_v52  ;;  %2425 = vmatpush.bf16.msrb.mxu0 %v4864_v48 }
 0x69c   :  { %2343 = vmatpush.bf16.msra.mxu2 %v5041_v41 }
 0x69d   :  { %2413 = vmatpush.bf16.msrb.mxu3 %v4882_v23  ;;  %2426 = vmatpush.bf16.msrb.mxu0 %v5447_v0 }
 0x6a0   :  { %2344 = vmatpush.bf16.msra.mxu2 %v5448_v32 }
 0x6a1   :  { %2414 = vmatpush.bf16.msrb.mxu3 %v5449_v12  ;;  %2427 = vmatpush.bf16.msrb.mxu0 %v5450_v53 }
 0x701   :  { %v2154_v54 = vpop.f32.mrf.mxu0 }
 0x706   :  { %v2128_v25 = vpop.f32.mrf.mxu2  ;;  %v2141_v44 = vpop.f32.mrf.mxu3 }
 0x707   :  { %v2158_v40 = vadd.f32 %v2128_v25, %v5134_v34  ;;  %v2178_v28 = vadd.f32 %v2141_v44, %v5174_v35 }
 0x709   :  { %v3357_v27 = vmul.f32 -1.442695, %v2158_v40  ;;  %v3358_v57 = vmul.f32 -1.442695, %v2178_v28  ;;  %v2156_v62 = vpop.f32.mrf.mxu0 }
 0x70a   :  { %v2198_v62 = vadd.f32 %v5191_v38, %v2154_v54 }
 0x70b   :  { %3598 = vpow2.f32 %v3357_v27 }
 0x70c   :  { %3600 = vpow2.f32 %v3358_v57 }
 0x70e   :  { %v2130_v9 = vpop.f32.mrf.mxu2  ;;  %v2143_v6 = vpop.f32.mrf.mxu3 }
 0x711   :  { %v3599_v7 = vpop.eup %3598 }
 0x712   :  { %v3601_v5 = vpop.eup %3600  ;;  %v2162_v19 = vadd.f32 1.0, %v3599_v7 }
 0x713   :  { %v2182_v37 = vadd.f32 1.0, %v3601_v5 }
 0x714   :  { %3602 = vrcp.f32 %v2162_v19  ;;  %v2174_v25 = vand.u32 2147483648, %v2162_v19  ;;  %v2172_v40 = vand.u32 2147483647, %v2162_v19  ;;  %vm2168_vm13 = vweird.f32 %v2162_v19 }
 0x715   :  { %3604 = vrcp.f32 %v2182_v37  ;;  %v2194_v60 = vand.u32 2147483648, %v2182_v37  ;;  %vm2188_vm1 = vweird.f32 %v2182_v37 }
 0x716   :  { %v2175_v57 = vor.u32 1.1754944e-38, %v2174_v25  ;;  %vm2173_vm15 = vcmp.eq.f32.partialorder %v2172_v40, 8.507059e+37 }
 0x71a   :  { %v3603_v1 = vpop.eup %3602 }
 0x71b   :  { %v3605_v24 = vpop.eup %3604  ;;  %v2164_v26 = vmul.f32 %v3603_v1, %v2162_v19  ;;  %vm2169_vm12 = vweird.f32 %v3603_v1 }
 0x71c   :  { %v2184_v22 = vmul.f32 %v3605_v24, %v2182_v37  ;;  %vm2170_vm14 = vmor %vm2168_vm13, %vm2169_vm12  ;;  %vm2189_vm0 = vweird.f32 %v3605_v24  ;;  %vm2302_vm13 = vcmp.gt.s32.totalorder %v5197_v17, 2 }
 0x71d   :  { %v2165_v34 = vsub.f32 1.0, %v2164_v26  ;;  %v2192_v26 = vand.u32 2147483647, %v2182_v37  ;;  %vm2190_vm2 = vmor %vm2188_vm1, %vm2189_vm0 }
 0x71e   :  { %v2185_v35 = vsub.f32 1.0, %v2184_v22 }
 0x71f   :  { %v2166_v44 = vmul.f32 %v3603_v1, %v2165_v34  ;;  %vm2193_vm3 = vcmp.eq.f32.partialorder %v2192_v26, 8.507059e+37 }
 0x720   :  { %v2186_v28 = vmul.f32 %v3605_v24, %v2185_v35  ;;  %v2195_v35 = vor.u32 1.1754944e-38, %v2194_v60 }
 0x721   :  { %v2167_v27 = vadd.f32 %v3603_v1, %v2166_v44 }
 0x722   :  { %v2187_v7 = vadd.f32 %v3605_v24, %v2186_v28 }
 0x723   :  { %v2171_v9 = vsel %vm2170_vm14, %v3603_v1, %v2167_v27 }
 0x724   :  { %v2176_v6 = vsel %vm2173_vm15, %v2175_v57, %v2171_v9  ;;  %v2191_v34 = vsel %vm2190_vm2, %v3605_v24, %v2187_v7 }
 0x725   :  { %v2199_v5 = vmul.f32 %v2198_v62, %v2176_v6  ;;  %v2196_v19 = vsel %vm2193_vm3, %v2195_v35, %v2191_v34 }
 0x726   :  { %v2202_v25 = vsub.f32 1.0, %v2196_v19  ;;  %v2204_v54 = vmul.f32 %v2196_v19, %v5201_v11 }
 0x727   :  { %v2200_v22 = vadd.f32 %v2199_v5, %v5155_v56 }
 0x729   :  { %3606 = vtanh.f32 %v2200_v22 }
 0x72f   :  { %v3607_v44 = vpop.eup %3606 }
 0x730   :  { %v2203_v1 = vmul.f32 %v3607_v44, %v2202_v25 }
 0x732   :  { %v2205_v40 = vadd.f32 %v2204_v54, %v2203_v1 }
 0x734   :  { %v5238_v28 = vsel %vm2206_vm4, %v2205_v40, %v5201_v11  ;;  %v2208_v37 = vsel %vm2206_vm4, %v2205_v40, 0.0 }
 0x735   :  { %v5241_v56 = vadd.f32 %v2208_v37, %v5203_v42  ;;  %v2214_v60 = vpack.c.bf16 %v5238_v28, %v5238_v28 }
 0x737   :  { %2223 = vmatmul.bf16.vlgmr.msra.gmra.mxu1 %v2214_v60  ;;  %2236 = vmatmul.bf16.vlgmr.msrb.gmra.mxu2 %v2214_v60 }
 0x738   :  { %2249 = vmatmul.bf16.vlgmr.msra.gmra.mxu3 %v2214_v60  ;;  %2433 = vmatpush.bf16.msra.mxu1 %v4959_v58 }
 0x739   :  { %2503 = vmatpush.bf16.msrb.mxu2 %v4644_v4  ;;  %2516 = vmatpush.bf16.msra.mxu3 %v4698_v3 }
 0x73c   :  { %2434 = vmatpush.bf16.msra.mxu1 %v4971_v18 }
 0x73d   :  { %2504 = vmatpush.bf16.msrb.mxu2 %v4716_v45  ;;  %2517 = vmatpush.bf16.msra.mxu3 %v4727_v61 }
 0x740   :  { %2435 = vmatpush.bf16.msra.mxu1 %v4986_v36 }
 0x741   :  { %2505 = vmatpush.bf16.msrb.mxu2 %v4754_v50  ;;  %2518 = vmatpush.bf16.msra.mxu3 %v4767_v8 }
 0x744   :  { %2436 = vmatpush.bf16.msra.mxu1 %v5003_v31 }
 0x745   :  { %2506 = vmatpush.bf16.msrb.mxu2 %v4783_v43  ;;  %2519 = vmatpush.bf16.msra.mxu3 %v4800_v47 }
 0x748   :  { %2437 = vmatpush.bf16.msra.mxu1 %v5014_v30 }
 0x749   :  { %2507 = vmatpush.bf16.msrb.mxu2 %v4820_v10  ;;  %2520 = vmatpush.bf16.msra.mxu3 %v4838_v51 }
 0x74c   :  { %2438 = vmatpush.bf16.msra.mxu1 %v5026_v55 }
 0x74d   :  { %2508 = vmatpush.bf16.msrb.mxu2 %v4841_v52  ;;  %2521 = vmatpush.bf16.msra.mxu3 %v4864_v48 }
 0x750   :  { %2439 = vmatpush.bf16.msra.mxu1 %v5041_v41 }
 0x751   :  { %2509 = vmatpush.bf16.msrb.mxu2 %v4882_v23  ;;  %2522 = vmatpush.bf16.msra.mxu3 %v5447_v0 }
 0x754   :  { %2440 = vmatpush.bf16.msra.mxu1 %v5448_v32 }
 0x755   :  { %2510 = vmatpush.bf16.msrb.mxu2 %v5449_v12  ;;  %2523 = vmatpush.bf16.msra.mxu3 %v5450_v53 }
 0x7b4   :  { %v2224_v11 = vpop.f32.mrf.mxu1 }
 0x7b5   :  { %v2254_v42 = vadd.f32 %v2224_v11, %v5136_v15 }
 0x7b7   :  { %v3359_v24 = vmul.f32 -1.442695, %v2254_v42 }
 0x7b9   :  { %3608 = vpow2.f32 %v3359_v24 }
 0x7ba   :  { %v2237_v27 = vpop.f32.mrf.mxu2 }
 0x7bb   :  { %v2274_v57 = vadd.f32 %v2237_v27, %v5176_v20  ;;  %v2250_v62 = vpop.f32.mrf.mxu3 }
 0x7bc   :  { %v2226_v9 = vpop.f32.mrf.mxu1  ;;  %v2294_v24 = vadd.f32 %v5191_v38, %v2250_v62 }
 0x7bd   :  { %v3360_v6 = vmul.f32 -1.442695, %v2274_v57 }
 0x7bf   :  { %v3609_v7 = vpop.eup %3608  ;;  %3610 = vpow2.f32 %v3360_v6 }
 0x7c0   :  { %v2258_v5 = vadd.f32 1.0, %v3609_v7 }
 0x7c2   :  { %3612 = vrcp.f32 %v2258_v5  ;;  %v2239_v26 = vpop.f32.mrf.mxu2  ;;  %v2270_v44 = vand.u32 2147483648, %v2258_v5  ;;  %v2268_v1 = vand.u32 2147483647, %v2258_v5  ;;  %vm2264_vm6 = vweird.f32 %v2258_v5 }
 0x7c3   :  { %v2252_v22 = vpop.f32.mrf.mxu3 }
 0x7c4   :  { %v2271_v60 = vor.u32 1.1754944e-38, %v2270_v44  ;;  %vm2269_vm8 = vcmp.eq.f32.partialorder %v2268_v1, 8.507059e+37 }
 0x7c5   :  { %v3611_v34 = vpop.eup %3610 }
 0x7c6   :  { %v2278_v35 = vadd.f32 1.0, %v3611_v34 }
 0x7c8   :  { %v3613_v19 = vpop.eup %3612  ;;  %3614 = vrcp.f32 %v2278_v35  ;;  %v2290_v9 = vand.u32 2147483648, %v2278_v35  ;;  %v2288_v7 = vand.u32 2147483647, %v2278_v35  ;;  %vm2284_vm10 = vweird.f32 %v2278_v35 }
 0x7c9   :  { %v2260_v25 = vmul.f32 %v3613_v19, %v2258_v5  ;;  %vm2265_vm5 = vweird.f32 %v3613_v19 }
 0x7ca   :  { %vm2266_vm7 = vmor %vm2264_vm6, %vm2265_vm5  ;;  %v2291_v34 = vor.u32 1.1754944e-38, %v2290_v9  ;;  %vm2289_vm12 = vcmp.eq.f32.partialorder %v2288_v7, 8.507059e+37  ;;  %vm2398_vm6 = vcmp.gt.s32.totalorder %v5197_v17, 3 }
 0x7cb   :  { %v2261_v15 = vsub.f32 1.0, %v2260_v25 }
 0x7cd   :  { %v2262_v54 = vmul.f32 %v3613_v19, %v2261_v15 }
 0x7ce   :  { %v3615_v20 = vpop.eup %3614 }
 0x7cf   :  { %v2280_v40 = vmul.f32 %v3615_v20, %v2278_v35  ;;  %v2263_v37 = vadd.f32 %v3613_v19, %v2262_v54  ;;  %vm2285_vm9 = vweird.f32 %v3615_v20 }
 0x7d0   :  { %vm2286_vm11 = vmor %vm2284_vm10, %vm2285_vm9 }
 0x7d1   :  { %v2281_v11 = vsub.f32 1.0, %v2280_v40  ;;  %v2267_v42 = vsel %vm2266_vm7, %v3613_v19, %v2263_v37 }
 0x7d2   :  { %v2272_v27 = vsel %vm2269_vm8, %v2271_v60, %v2267_v42 }
 0x7d3   :  { %v2282_v57 = vmul.f32 %v3615_v20, %v2281_v11  ;;  %v2295_v6 = vmul.f32 %v2294_v24, %v2272_v27 }
 0x7d5   :  { %v2283_v26 = vadd.f32 %v3615_v20, %v2282_v57  ;;  %v2296_v22 = vadd.f32 %v2295_v6, %v5161_v14 }
 0x7d7   :  { %v2287_v5 = vsel %vm2286_vm11, %v3615_v20, %v2283_v26  ;;  %3616 = vtanh.f32 %v2296_v22 }
 0x7d8   :  { %v2292_v25 = vsel %vm2289_vm12, %v2291_v34, %v2287_v5 }
 0x7d9   :  { %v2298_v19 = vsub.f32 1.0, %v2292_v25  ;;  %v2300_v62 = vmul.f32 %v2292_v25, %v5238_v28 }
 0x7dd   :  { %v3617_v15 = vpop.eup %3616 }
 0x7de   :  { %v2299_v44 = vmul.f32 %v3617_v15, %v2298_v19 }
 0x7e0   :  { %v2301_v54 = vadd.f32 %v2300_v62, %v2299_v44 }
 0x7e2   :  { %v2304_v1 = vsel %vm2302_vm13, %v2301_v54, 0.0  ;;  %v5276_v40 = vsel %vm2302_vm13, %v2301_v54, %v5238_v28 }
 0x7e3   :  { %v5279_v14 = vadd.f32 %v2304_v1, %v5241_v56  ;;  %v2310_v35 = vpack.c.bf16 %v5276_v40, %v5276_v40 }
 0x7e5   :  { %2319 = vmatmul.bf16.vlgmr.msra.gmra.mxu0 %v2310_v35  ;;  %2332 = vmatmul.bf16.vlgmr.msrb.gmra.mxu1 %v2310_v35 }
 0x7e6   :  { %2345 = vmatmul.bf16.vlgmr.msra.gmra.mxu2 %v2310_v35  ;;  %2529 = vmatpush.bf16.msra.mxu0 %v4959_v58 }
 0x7e7   :  { %2599 = vmatpush.bf16.msrb.mxu1 %v4644_v4  ;;  %2612 = vmatpush.bf16.msra.mxu2 %v4698_v3 }
 0x7ea   :  { %2530 = vmatpush.bf16.msra.mxu0 %v4971_v18 }
 0x7eb   :  { %2600 = vmatpush.bf16.msrb.mxu1 %v4716_v45  ;;  %2613 = vmatpush.bf16.msra.mxu2 %v4727_v61 }
 0x7ee   :  { %2531 = vmatpush.bf16.msra.mxu0 %v4986_v36 }
 0x7ef   :  { %2601 = vmatpush.bf16.msrb.mxu1 %v4754_v50  ;;  %2614 = vmatpush.bf16.msra.mxu2 %v4767_v8 }
 0x7f2   :  { %2532 = vmatpush.bf16.msra.mxu0 %v5003_v31 }
 0x7f3   :  { %2602 = vmatpush.bf16.msrb.mxu1 %v4783_v43  ;;  %2615 = vmatpush.bf16.msra.mxu2 %v4800_v47 }
 0x7f6   :  { %2533 = vmatpush.bf16.msra.mxu0 %v5014_v30 }
 0x7f7   :  { %2603 = vmatpush.bf16.msrb.mxu1 %v4820_v10  ;;  %2616 = vmatpush.bf16.msra.mxu2 %v4838_v51 }
 0x7fa   :  { %2534 = vmatpush.bf16.msra.mxu0 %v5026_v55 }
 0x7fb   :  { %2604 = vmatpush.bf16.msrb.mxu1 %v4841_v52  ;;  %2617 = vmatpush.bf16.msra.mxu2 %v4864_v48 }
 0x7fe   :  { %2535 = vmatpush.bf16.msra.mxu0 %v5041_v41 }
 0x7ff   :  { %2605 = vmatpush.bf16.msrb.mxu1 %v4882_v23  ;;  %2618 = vmatpush.bf16.msra.mxu2 %v5447_v0 }
 0x802   :  { %2536 = vmatpush.bf16.msra.mxu0 %v5448_v32 }
 0x803   :  { %2606 = vmatpush.bf16.msrb.mxu1 %v5449_v12  ;;  %2619 = vmatpush.bf16.msra.mxu2 %v5450_v53 }
 0x862   :  { %v2320_v28 = vpop.f32.mrf.mxu0  ;;  %v2333_v56 = vpop.f32.mrf.mxu1 }
 0x863   :  { %v2350_v20 = vadd.f32 %v2320_v28, %v5138_v16  ;;  %v2370_v37 = vadd.f32 %v2333_v56, %v5178_v63 }
 0x865   :  { %v3361_v60 = vmul.f32 -1.442695, %v2350_v20  ;;  %v3362_v11 = vmul.f32 -1.442695, %v2370_v37 }
 0x867   :  { %3618 = vpow2.f32 %v3361_v60 }
 0x868   :  { %3620 = vpow2.f32 %v3362_v11 }
 0x869   :  { %v2346_v42 = vpop.f32.mrf.mxu2 }
 0x86a   :  { %v2322_v24 = vpop.f32.mrf.mxu0  ;;  %v2335_v27 = vpop.f32.mrf.mxu1  ;;  %v2390_v28 = vadd.f32 %v5191_v38, %v2346_v42 }
 0x86d   :  { %v3619_v57 = vpop.eup %3618 }
 0x86e   :  { %v3621_v9 = vpop.eup %3620  ;;  %v2354_v6 = vadd.f32 1.0, %v3619_v57 }
 0x86f   :  { %v2374_v7 = vadd.f32 1.0, %v3621_v9 }
 0x870   :  { %3622 = vrcp.f32 %v2354_v6  ;;  %v2366_v19 = vand.u32 2147483648, %v2354_v6  ;;  %v2364_v44 = vand.u32 2147483647, %v2354_v6  ;;  %vm2360_vm15 = vweird.f32 %v2354_v6 }
 0x871   :  { %3624 = vrcp.f32 %v2374_v7  ;;  %v2348_v26 = vpop.f32.mrf.mxu2  ;;  %v2386_v37 = vand.u32 2147483648, %v2374_v7  ;;  %vm2380_vm3 = vweird.f32 %v2374_v7  ;;  %v2384_v11 = vand.u32 2147483647, %v2374_v7 }
 0x872   :  { %v2367_v1 = vor.u32 1.1754944e-38, %v2366_v19  ;;  %vm2365_vm1 = vcmp.eq.f32.partialorder %v2364_v44, 8.507059e+37 }
 0x873   :  { %v2387_v57 = vor.u32 1.1754944e-38, %v2386_v37  ;;  %vm2385_vm5 = vcmp.eq.f32.partialorder %v2384_v11, 8.507059e+37 }
 0x876   :  { %v3623_v22 = vpop.eup %3622 }
 0x877   :  { %v3625_v34 = vpop.eup %3624  ;;  %v2356_v5 = vmul.f32 %v3623_v22, %v2354_v6  ;;  %vm2361_vm14 = vweird.f32 %v3623_v22 }
 0x878   :  { %v2376_v16 = vmul.f32 %v3625_v34, %v2374_v7  ;;  %vm2362_vm0 = vmor %vm2360_vm15, %vm2361_vm14  ;;  %vm2381_vm2 = vweird.f32 %v3625_v34  ;;  %vm2494_vm15 = vcmp.gt.s32.totalorder %v5197_v17, 4 }
 0x879   :  { %v2357_v25 = vsub.f32 1.0, %v2356_v5  ;;  %vm2382_vm4 = vmor %vm2380_vm3, %vm2381_vm2 }
 0x87a   :  { %v2377_v63 = vsub.f32 1.0, %v2376_v16 }
 0x87b   :  { %v2358_v15 = vmul.f32 %v3623_v22, %v2357_v25 }
 0x87c   :  { %v2378_v62 = vmul.f32 %v3625_v34, %v2377_v63 }
 0x87d   :  { %v2359_v54 = vadd.f32 %v3623_v22, %v2358_v15 }
 0x87e   :  { %v2379_v56 = vadd.f32 %v3625_v34, %v2378_v62 }
 0x87f   :  { %v2363_v35 = vsel %vm2362_vm0, %v3623_v22, %v2359_v54 }
 0x880   :  { %v2368_v20 = vsel %vm2365_vm1, %v2367_v1, %v2363_v35  ;;  %v2383_v27 = vsel %vm2382_vm4, %v3625_v34, %v2379_v56 }
 0x881   :  { %v2391_v60 = vmul.f32 %v2390_v28, %v2368_v20  ;;  %v2388_v9 = vsel %vm2385_vm5, %v2387_v57, %v2383_v27 }
 0x882   :  { %v2394_v6 = vsub.f32 1.0, %v2388_v9  ;;  %v2396_v42 = vmul.f32 %v2388_v9, %v5276_v40 }
 0x883   :  { %v2392_v24 = vadd.f32 %v2391_v60, %v5163_v21 }
 0x885   :  { %3626 = vtanh.f32 %v2392_v24 }
 0x88b   :  { %v3627_v26 = vpop.eup %3626 }
 0x88c   :  { %v2395_v22 = vmul.f32 %v3627_v26, %v2394_v6 }
 0x88e   :  { %v2397_v5 = vadd.f32 %v2396_v42, %v2395_v22 }
 0x890   :  { %v2400_v16 = vsel %vm2398_vm6, %v2397_v5, 0.0  ;;  %v5314_v25 = vsel %vm2398_vm6, %v2397_v5, %v5276_v40 }
 0x891   :  { %v5317_v7 = vadd.f32 %v2400_v16, %v5279_v14  ;;  %v2406_v21 = vpack.c.bf16 %v5314_v25, %v5314_v25 }
 0x893   :  { %2415 = vmatmul.bf16.vlgmr.msrb.gmra.mxu3 %v2406_v21  ;;  %2428 = vmatmul.bf16.vlgmr.msrb.gmra.mxu0 %v2406_v21 }
 0x894   :  { %2441 = vmatmul.bf16.vlgmr.msra.gmra.mxu1 %v2406_v21  ;;  %2625 = vmatpush.bf16.msrb.mxu3 %v4959_v58 }
 0x895   :  { %2695 = vmatpush.bf16.msrb.mxu0 %v4644_v4  ;;  %2708 = vmatpush.bf16.msra.mxu1 %v4698_v3 }
 0x898   :  { %2626 = vmatpush.bf16.msrb.mxu3 %v4971_v18 }
 0x899   :  { %2696 = vmatpush.bf16.msrb.mxu0 %v4716_v45  ;;  %2709 = vmatpush.bf16.msra.mxu1 %v4727_v61 }
 0x89c   :  { %2627 = vmatpush.bf16.msrb.mxu3 %v4986_v36 }
 0x89d   :  { %2697 = vmatpush.bf16.msrb.mxu0 %v4754_v50  ;;  %2710 = vmatpush.bf16.msra.mxu1 %v4767_v8 }
 0x8a0   :  { %2628 = vmatpush.bf16.msrb.mxu3 %v5003_v31 }
 0x8a1   :  { %2698 = vmatpush.bf16.msrb.mxu0 %v4783_v43  ;;  %2711 = vmatpush.bf16.msra.mxu1 %v4800_v47 }
 0x8a4   :  { %2629 = vmatpush.bf16.msrb.mxu3 %v5014_v30 }
 0x8a5   :  { %2699 = vmatpush.bf16.msrb.mxu0 %v4820_v10  ;;  %2712 = vmatpush.bf16.msra.mxu1 %v4838_v51 }
 0x8a8   :  { %2630 = vmatpush.bf16.msrb.mxu3 %v5026_v55 }
 0x8a9   :  { %2700 = vmatpush.bf16.msrb.mxu0 %v4841_v52  ;;  %2713 = vmatpush.bf16.msra.mxu1 %v4864_v48 }
 0x8ac   :  { %2631 = vmatpush.bf16.msrb.mxu3 %v5041_v41 }
 0x8ad   :  { %2701 = vmatpush.bf16.msrb.mxu0 %v4882_v23  ;;  %2714 = vmatpush.bf16.msra.mxu1 %v5447_v0 }
 0x8b0   :  { %2632 = vmatpush.bf16.msrb.mxu3 %v5448_v32 }
 0x8b1   :  { %2702 = vmatpush.bf16.msrb.mxu0 %v5449_v12  ;;  %2715 = vmatpush.bf16.msra.mxu1 %v5450_v53 }
 0x910   :  { %v2429_v4 = vpop.f32.mrf.mxu0 }
 0x911   :  { %v2466_v3 = vadd.f32 %v2429_v4, %v5180_v29  ;;  %v2442_v45 = vpop.f32.mrf.mxu1 }
 0x912   :  { %v2486_v54 = vadd.f32 %v5191_v38, %v2442_v45 }
 0x913   :  { %v3364_v61 = vmul.f32 -1.442695, %v2466_v3 }
 0x915   :  { %3628 = vpow2.f32 %v3364_v61 }
 0x916   :  { %v2416_v50 = vpop.f32.mrf.mxu3 }
 0x917   :  { %v2446_v8 = vadd.f32 %v2416_v50, %v5140_v2 }
 0x918   :  { %v2431_v43 = vpop.f32.mrf.mxu0 }
 0x919   :  { %v3363_v47 = vmul.f32 -1.442695, %v2446_v8  ;;  %v2444_v10 = vpop.f32.mrf.mxu1 }
 0x91b   :  { %v3629_v51 = vpop.eup %3628  ;;  %3630 = vpow2.f32 %v3363_v47 }
 0x91c   :  { %v2470_v52 = vadd.f32 1.0, %v3629_v51 }
 0x91e   :  { %v2418_v48 = vpop.f32.mrf.mxu3  ;;  %3632 = vrcp.f32 %v2470_v52  ;;  %v2482_v56 = vand.u32 2147483648, %v2470_v52  ;;  %vm2476_vm12 = vweird.f32 %v2470_v52  ;;  %v2480_v37 = vand.u32 2147483647, %v2470_v52 }
 0x920   :  { %v2483_v24 = vor.u32 1.1754944e-38, %v2482_v56  ;;  %vm2481_vm14 = vcmp.eq.f32.partialorder %v2480_v37, 8.507059e+37 }
 0x921   :  { %v3631_v23 = vpop.eup %3630 }
 0x922   :  { %v2450_v0 = vadd.f32 1.0, %v3631_v23 }
 0x924   :  { %3634 = vrcp.f32 %v2450_v0  ;;  %v3633_v12 = vpop.eup %3632  ;;  %v2462_v63 = vand.u32 2147483648, %v2450_v0  ;;  %v2460_v2 = vand.u32 2147483647, %v2450_v0  ;;  %vm2456_vm8 = vweird.f32 %v2450_v0 }
 0x925   :  { %v2472_v53 = vmul.f32 %v3633_v12, %v2470_v52  ;;  %vm2477_vm11 = vweird.f32 %v3633_v12 }
 0x926   :  { %v2463_v62 = vor.u32 1.1754944e-38, %v2462_v63  ;;  %vm2461_vm10 = vcmp.eq.f32.partialorder %v2460_v2, 8.507059e+37  ;;  %vm2478_vm13 = vmor %vm2476_vm12, %vm2477_vm11 }
 0x927   :  { %v2473_v14 = vsub.f32 1.0, %v2472_v53 }
 0x929   :  { %v2474_v15 = vmul.f32 %v3633_v12, %v2473_v14 }
 0x92a   :  { %v3635_v29 = vpop.eup %3634 }
 0x92b   :  { %v2452_v40 = vmul.f32 %v3635_v29, %v2450_v0  ;;  %vm2457_vm7 = vweird.f32 %v3635_v29  ;;  %v2475_v35 = vadd.f32 %v3633_v12, %v2474_v15 }
 0x92c   :  { %vm2458_vm9 = vmor %vm2456_vm8, %vm2457_vm7  ;;  %vm2590_vm8 = vcmp.gt.s32.totalorder %v5197_v17, 5 }
 0x92d   :  { %v2453_v34 = vsub.f32 1.0, %v2452_v40  ;;  %v2479_v11 = vsel %vm2478_vm13, %v3633_v12, %v2475_v35 }
 0x92e   :  { %v2484_v27 = vsel %vm2481_vm14, %v2483_v24, %v2479_v11 }
 0x92f   :  { %v2454_v19 = vmul.f32 %v3635_v29, %v2453_v34  ;;  %v2490_v57 = vsub.f32 1.0, %v2484_v27  ;;  %v2492_v6 = vmul.f32 %v2484_v27, %v5314_v25 }
 0x931   :  { %v2455_v44 = vadd.f32 %v3635_v29, %v2454_v19 }
 0x933   :  { %v2459_v1 = vsel %vm2458_vm9, %v3635_v29, %v2455_v44 }
 0x934   :  { %v2464_v28 = vsel %vm2461_vm10, %v2463_v62, %v2459_v1 }
 0x935   :  { %v2487_v20 = vmul.f32 %v2486_v54, %v2464_v28 }
 0x937   :  { %v2488_v60 = vadd.f32 %v2487_v20, %v5157_v39 }
 0x939   :  { %3636 = vtanh.f32 %v2488_v60 }
 0x93f   :  { %v3637_v9 = vpop.eup %3636 }
 0x940   :  { %v2491_v26 = vmul.f32 %v3637_v9, %v2490_v57 }
 0x942   :  { %v2493_v22 = vadd.f32 %v2492_v6, %v2491_v26 }
 0x944   :  { %v5352_v42 = vsel %vm2494_vm15, %v2493_v22, %v5314_v25  ;;  %v2496_v5 = vsel %vm2494_vm15, %v2493_v22, 0.0 }
 0x945   :  { %v5355_v16 = vadd.f32 %v2496_v5, %v5317_v7  ;;  %v2502_v39 = vpack.c.bf16 %v5352_v42, %v5352_v42 }
 0x947   :  { %2511 = vmatmul.bf16.vlgmr.msrb.gmra.mxu2 %v2502_v39  ;;  %2524 = vmatmul.bf16.vlgmr.msra.gmra.mxu3 %v2502_v39 }
 0x948   :  { %2537 = vmatmul.bf16.vlgmr.msra.gmra.mxu0 %v2502_v39  ;;  %2721 = vmatpush.bf16.msrb.mxu2 %v4959_v58 }
 0x94c   :  { %2722 = vmatpush.bf16.msrb.mxu2 %v4971_v18 }
 0x950   :  { %2723 = vmatpush.bf16.msrb.mxu2 %v4986_v36 }
 0x954   :  { %2724 = vmatpush.bf16.msrb.mxu2 %v5003_v31 }
 0x958   :  { %2725 = vmatpush.bf16.msrb.mxu2 %v5014_v30 }
 0x95c   :  { %2726 = vmatpush.bf16.msrb.mxu2 %v5026_v55 }
 0x960   :  { %2727 = vmatpush.bf16.msrb.mxu2 %v5041_v41 }
 0x964   :  { %2728 = vmatpush.bf16.msrb.mxu2 %v5448_v32 }
 0x9c5   :  { %v2538_v25 = vpop.f32.mrf.mxu0 }
 0x9c6   :  { %v2582_v0 = vadd.f32 %v5191_v38, %v2538_v25 }
 0x9ca   :  { %v2512_v7 = vpop.f32.mrf.mxu2  ;;  %v2525_v21 = vpop.f32.mrf.mxu3 }
 0x9cb   :  { %v2542_v4 = vadd.f32 %v2512_v7, %v5142_v13  ;;  %v2562_v58 = vadd.f32 %v2525_v21, %v5182_v49 }
 0x9cd   :  { %v3365_v18 = vmul.f32 -1.442695, %v2542_v4  ;;  %v3366_v3 = vmul.f32 -1.442695, %v2562_v58  ;;  %v2540_v36 = vpop.f32.mrf.mxu0 }
 0x9cf   :  { %3638 = vpow2.f32 %v3365_v18 }
 0x9d0   :  { %3640 = vpow2.f32 %v3366_v3 }
 0x9d2   :  { %v2514_v31 = vpop.f32.mrf.mxu2  ;;  %v2527_v30 = vpop.f32.mrf.mxu3 }
 0x9d5   :  { %v3639_v45 = vpop.eup %3638 }
 0x9d6   :  { %v3641_v55 = vpop.eup %3640  ;;  %v2546_v61 = vadd.f32 1.0, %v3639_v45 }
 0x9d7   :  { %v2566_v41 = vadd.f32 1.0, %v3641_v55 }
 0x9d8   :  { %3642 = vrcp.f32 %v2546_v61  ;;  %v2558_v47 = vand.u32 2147483648, %v2546_v61  ;;  %v2556_v51 = vand.u32 2147483647, %v2546_v61  ;;  %vm2552_vm1 = vweird.f32 %v2546_v61 }
 0x9d9   :  { %3644 = vrcp.f32 %v2566_v41  ;;  %v2578_v14 = vand.u32 2147483648, %v2566_v41  ;;  %vm2572_vm5 = vweird.f32 %v2566_v41  ;;  %v2576_v34 = vand.u32 2147483647, %v2566_v41 }
 0x9da   :  { %v2559_v23 = vor.u32 1.1754944e-38, %v2558_v47  ;;  %vm2557_vm3 = vcmp.eq.f32.partialorder %v2556_v51, 8.507059e+37 }
 0x9db   :  { %v2579_v2 = vor.u32 1.1754944e-38, %v2578_v14  ;;  %vm2577_vm7 = vcmp.eq.f32.partialorder %v2576_v34, 8.507059e+37  ;;  %v5452_v34 = vld [vmem:[#allocation5_spill] sm:$0xff] }
 0x9de   :  { %v3643_v32 = vpop.eup %3642 }
 0x9df   :  { %v3645_v50 = vpop.eup %3644  ;;  %v2548_v8 = vmul.f32 %v3643_v32, %v2546_v61  ;;  %vm2553_vm0 = vweird.f32 %v3643_v32 }
 0x9e0   :  { %v2568_v43 = vmul.f32 %v3645_v50, %v2566_v41  ;;  %vm2554_vm2 = vmor %vm2552_vm1, %vm2553_vm0  ;;  %vm2573_vm4 = vweird.f32 %v3645_v50  ;;  %vm2686_vm1 = vcmp.gt.s32.totalorder %v5197_v17, 6 }
 0x9e1   :  { %v2549_v13 = vsub.f32 1.0, %v2548_v8  ;;  %vm2574_vm6 = vmor %vm2572_vm5, %vm2573_vm4 }
 0x9e2   :  { %v2569_v49 = vsub.f32 1.0, %v2568_v43  ;;  %v5451_v43 = vld [vmem:[#allocation9_spill] sm:$0xff] }
 0x9e3   :  { %v2550_v10 = vmul.f32 %v3643_v32, %v2549_v13 }
 0x9e4   :  { %v2570_v52 = vmul.f32 %v3645_v50, %v2569_v49 }
 0x9e5   :  { %v2551_v48 = vadd.f32 %v3643_v32, %v2550_v10 }
 0x9e6   :  { %v2571_v29 = vadd.f32 %v3645_v50, %v2570_v52 }
 0x9e7   :  { %v2555_v12 = vsel %vm2554_vm2, %v3643_v32, %v2551_v48 }
 0x9e8   :  { %v2560_v53 = vsel %vm2557_vm3, %v2559_v23, %v2555_v12  ;;  %v2575_v19 = vsel %vm2574_vm6, %v3645_v50, %v2571_v29 }
 0x9e9   :  { %v2583_v40 = vmul.f32 %v2582_v0, %v2560_v53  ;;  %v2580_v15 = vsel %vm2577_vm7, %v2579_v2, %v2575_v19  ;;  %v5453_v19 = vld [vmem:[#allocation11_spill] sm:$0xff] }
 0x9ea   :  { %v2586_v44 = vsub.f32 1.0, %v2580_v15  ;;  %v2588_v54 = vmul.f32 %v2580_v15, %v5352_v42 }
 0x9eb   :  { %v2584_v63 = vadd.f32 %v2583_v40, %v5159_v46 }
 0x9ed   :  { %3646 = vtanh.f32 %v2584_v63 }
 0x9f3   :  { %v3647_v62 = vpop.eup %3646 }
 0x9f4   :  { %v2587_v1 = vmul.f32 %v3647_v62, %v2586_v44 }
 0x9f6   :  { %v2589_v35 = vadd.f32 %v2588_v54, %v2587_v1 }
 0x9f8   :  { %v5374_v28 = vsel %vm2590_vm8, %v2589_v35, %v5352_v42  ;;  %v2592_v56 = vsel %vm2590_vm8, %v2589_v35, 0.0 }
 0x9f9   :  { %v5377_v46 = vadd.f32 %v2592_v56, %v5355_v16  ;;  %v2598_v20 = vpack.c.bf16 %v5374_v28, %v5374_v28 }
 0x9fb   :  { %2607 = vmatmul.bf16.vlgmr.msrb.gmra.mxu1 %v2598_v20  ;;  %2620 = vmatmul.bf16.vlgmr.msra.gmra.mxu2 %v2598_v20 }
 0x9fc   :  { %2633 = vmatmul.bf16.vlgmr.msrb.gmra.mxu3 %v2598_v20 }
 0xa78   :  { %v2608_v37 = vpop.f32.mrf.mxu1 }
 0xa79   :  { %v2638_v60 = vadd.f32 %v2608_v37, %v5144_v59 }
 0xa7b   :  { %v3367_v11 = vmul.f32 -1.442695, %v2638_v60 }
 0xa7d   :  { %3648 = vpow2.f32 %v3367_v11 }
 0xa7e   :  { %v2621_v24 = vpop.f32.mrf.mxu2 }
 0xa7f   :  { %v2658_v27 = vadd.f32 %v2621_v24, %v5184_v33  ;;  %v2634_v57 = vpop.f32.mrf.mxu3 }
 0xa80   :  { %v2610_v9 = vpop.f32.mrf.mxu1  ;;  %v2678_v45 = vadd.f32 %v5191_v38, %v2634_v57 }
 0xa81   :  { %v3368_v6 = vmul.f32 -1.442695, %v2658_v27 }
 0xa83   :  { %v3649_v26 = vpop.eup %3648  ;;  %3650 = vpow2.f32 %v3368_v6 }
 0xa84   :  { %v2642_v22 = vadd.f32 1.0, %v3649_v26 }
 0xa86   :  { %3652 = vrcp.f32 %v2642_v22  ;;  %v2623_v42 = vpop.f32.mrf.mxu2  ;;  %v2654_v21 = vand.u32 2147483648, %v2642_v22  ;;  %v2652_v58 = vand.u32 2147483647, %v2642_v22  ;;  %vm2648_vm10 = vweird.f32 %v2642_v22 }
 0xa87   :  { %v2636_v5 = vpop.f32.mrf.mxu3 }
 0xa88   :  { %v2655_v36 = vor.u32 1.1754944e-38, %v2654_v21  ;;  %vm2653_vm12 = vcmp.eq.f32.partialorder %v2652_v58, 8.507059e+37 }
 0xa89   :  { %v3651_v16 = vpop.eup %3650 }
 0xa8a   :  { %v2662_v39 = vadd.f32 1.0, %v3651_v16 }
 0xa8c   :  { %v3653_v25 = vpop.eup %3652  ;;  %3654 = vrcp.f32 %v2662_v39  ;;  %v2674_v41 = vand.u32 2147483648, %v2662_v39  ;;  %v2672_v50 = vand.u32 2147483647, %v2662_v39  ;;  %vm2668_vm14 = vweird.f32 %v2662_v39 }
 0xa8d   :  { %v2644_v7 = vmul.f32 %v3653_v25, %v2642_v22  ;;  %vm2649_vm9 = vweird.f32 %v3653_v25 }
 0xa8e   :  { %vm2650_vm11 = vmor %vm2648_vm10, %vm2649_vm9  ;;  %v2675_v47 = vor.u32 1.1754944e-38, %v2674_v41  ;;  %vm2673_vm0 = vcmp.eq.f32.partialorder %v2672_v50, 8.507059e+37  ;;  %vm2782_vm10 = vcmp.gt.s32.totalorder %v5197_v17, 7 }
 0xa8f   :  { %v2645_v59 = vsub.f32 1.0, %v2644_v7 }
 0xa91   :  { %v2646_v4 = vmul.f32 %v3653_v25, %v2645_v59 }
 0xa92   :  { %v3655_v33 = vpop.eup %3654 }
 0xa93   :  { %v2664_v18 = vmul.f32 %v3655_v33, %v2662_v39  ;;  %v2647_v3 = vadd.f32 %v3653_v25, %v2646_v4  ;;  %vm2669_vm13 = vweird.f32 %v3655_v33  ;;  %v3669_v39 = vld [vmem:[%s5414_s10] ss:$0 sm:$0xff] }
 0xa94   :  { %vm2670_vm15 = vmor %vm2668_vm14, %vm2669_vm13 }
 0xa95   :  { %v2665_v31 = vsub.f32 1.0, %v2664_v18  ;;  %v2651_v30 = vsel %vm2650_vm11, %v3653_v25, %v2647_v3 }
 0xa96   :  { %v2656_v55 = vsel %vm2653_vm12, %v2655_v36, %v2651_v30 }
 0xa97   :  { %v2666_v61 = vmul.f32 %v3655_v33, %v2665_v31  ;;  %v2679_v32 = vmul.f32 %v2678_v45, %v2656_v55 }
 0xa99   :  { %v2667_v8 = vadd.f32 %v3655_v33, %v2666_v61  ;;  %v2680_v13 = vadd.f32 %v2679_v32, %v5451_v43 }
 0xa9b   :  { %v2671_v49 = vsel %vm2670_vm15, %v3655_v33, %v2667_v8  ;;  %3656 = vtanh.f32 %v2680_v13  ;;  %v5454_v33 = vld [vmem:[#allocation10_spill] sm:$0xff]  ;;  %v2806_v8 = vpop.permute.xlu1 %2805 }
 0xa9c   :  { %v2676_v10 = vsel %vm2673_vm0, %v2675_v47, %v2671_v49 }
 0xa9d   :  { %v2682_v51 = vsub.f32 1.0, %v2676_v10  ;;  %v2684_v38 = vmul.f32 %v2676_v10, %v5374_v28 }
 0xaa1   :  { %v3657_v52 = vpop.eup %3656 }
 0xaa2   :  { %v2683_v48 = vmul.f32 %v3657_v52, %v2682_v51 }
 0xaa4   :  { %v2685_v23 = vadd.f32 %v2684_v38, %v2683_v48 }
 0xaa6   :  { %v2687_v0 = vsel %vm2686_vm1, %v2685_v23, %v5374_v28  ;;  %v2688_v12 = vsel %vm2686_vm1, %v2685_v23, 0.0 }
 0xaa7   :  { %v5389_v53 = vadd.f32 %v2688_v12, %v5377_v46  ;;  %v2694_v29 = vpack.c.bf16 %v2687_v0, %v2687_v0 }
 0xaa9   :  { %2703 = vmatmul.bf16.vlgmr.msrb.gmra.mxu0 %v2694_v29  ;;  %2716 = vmatmul.bf16.vlgmr.msra.gmra.mxu1 %v2694_v29 }
 0xaaa   :  { %2729 = vmatmul.bf16.vlgmr.msrb.gmra.mxu2 %v2694_v29 }
 0xb26   :  { %v2704_v40 = vpop.f32.mrf.mxu0  ;;  %v2717_v14 = vpop.f32.mrf.mxu1 }
 0xb27   :  { %v2734_v63 = vadd.f32 %v2704_v40, %v5452_v34  ;;  %v2754_v2 = vadd.f32 %v2717_v14, %v5453_v19 }
 0xb29   :  { %v3369_v15 = vmul.f32 -1.442695, %v2734_v63  ;;  %v3370_v44 = vmul.f32 -1.442695, %v2754_v2 }
 0xb2b   :  { %3658 = vpow2.f32 %v3369_v15 }
 0xb2c   :  { %3660 = vpow2.f32 %v3370_v44 }
 0xb2d   :  { %v2730_v62 = vpop.f32.mrf.mxu2 }
 0xb2e   :  { %v2706_v54 = vpop.f32.mrf.mxu0  ;;  %v2719_v1 = vpop.f32.mrf.mxu1  ;;  %v2774_v25 = vadd.f32 %v3669_v39, %v2730_v62 }
 0xb31   :  { %v3659_v35 = vpop.eup %3658 }
 0xb32   :  { %v3661_v28 = vpop.eup %3660  ;;  %v2738_v56 = vadd.f32 1.0, %v3659_v35 }
 0xb33   :  { %v2758_v46 = vadd.f32 1.0, %v3661_v28 }
 0xb34   :  { %3662 = vrcp.f32 %v2738_v56  ;;  %v2750_v9 = vand.u32 2147483648, %v2738_v56  ;;  %v2748_v26 = vand.u32 2147483647, %v2738_v56  ;;  %vm2744_vm3 = vweird.f32 %v2738_v56 }
 0xb35   :  { %3664 = vrcp.f32 %v2758_v46  ;;  %v2732_v20 = vpop.f32.mrf.mxu2  ;;  %v2770_v21 = vand.u32 2147483648, %v2758_v46  ;;  %vm2764_vm7 = vweird.f32 %v2758_v46  ;;  %v2768_v58 = vand.u32 2147483647, %v2758_v46 }
 0xb36   :  { %v2751_v5 = vor.u32 1.1754944e-38, %v2750_v9  ;;  %vm2749_vm5 = vcmp.eq.f32.partialorder %v2748_v26, 8.507059e+37 }
 0xb37   :  { %v2771_v36 = vor.u32 1.1754944e-38, %v2770_v21  ;;  %vm2769_vm9 = vcmp.eq.f32.partialorder %v2768_v58, 8.507059e+37 }
 0xb3a   :  { %v3663_v37 = vpop.eup %3662 }
 0xb3b   :  { %v3665_v60 = vpop.eup %3664  ;;  %v2740_v11 = vmul.f32 %v3663_v37, %v2738_v56  ;;  %vm2745_vm2 = vweird.f32 %v3663_v37 }
 0xb3c   :  { %v2760_v24 = vmul.f32 %v3665_v60, %v2758_v46  ;;  %vm2746_vm4 = vmor %vm2744_vm3, %vm2745_vm2  ;;  %vm2765_vm6 = vweird.f32 %v3665_v60 }
 0xb3d   :  { %v2741_v27 = vsub.f32 1.0, %v2740_v11  ;;  %vm2766_vm8 = vmor %vm2764_vm7, %vm2765_vm6 }
 0xb3e   :  { %v2761_v57 = vsub.f32 1.0, %v2760_v24 }
 0xb3f   :  { %v2742_v6 = vmul.f32 %v3663_v37, %v2741_v27 }
 0xb40   :  { %v2762_v22 = vmul.f32 %v3665_v60, %v2761_v57 }
 0xb41   :  { %v2743_v42 = vadd.f32 %v3663_v37, %v2742_v6 }
 0xb42   :  { %v2763_v7 = vadd.f32 %v3665_v60, %v2762_v22 }
 0xb43   :  { %v2747_v16 = vsel %vm2746_vm4, %v3663_v37, %v2743_v42 }
 0xb44   :  { %v2752_v59 = vsel %vm2749_vm5, %v2751_v5, %v2747_v16  ;;  %v2767_v3 = vsel %vm2766_vm8, %v3665_v60, %v2763_v7 }
 0xb45   :  { %v2775_v4 = vmul.f32 %v2774_v25, %v2752_v59  ;;  %v2772_v31 = vsel %vm2769_vm9, %v2771_v36, %v2767_v3 }
 0xb46   :  { %v2778_v30 = vsub.f32 1.0, %v2772_v31  ;;  %v2780_v61 = vmul.f32 %v2772_v31, %v2687_v0 }
 0xb47   :  { %v2776_v18 = vadd.f32 %v2775_v4, %v5454_v33 }
 0xb49   :  { %3666 = vtanh.f32 %v2776_v18 }
 0xb4f   :  { %v3667_v45 = vpop.eup %3666 }
 0xb50   :  { %v2779_v55 = vmul.f32 %v3667_v45, %v2778_v30 }
 0xb52   :  { %v2781_v41 = vadd.f32 %v2780_v61, %v2779_v55 }
 0xb54   :  { %v2783_v32 = vsel %vm2782_vm10, %v2781_v41, 0.0 }
 0xb55   :  { %v2784_v50 = vadd.f32 %v2783_v32, %v5389_v53 }
 0xb57   :  { %v2808_v43 = vmul.f32 %v2806_v8, %v2784_v50 }
 0xb59   :  { %2809 = vst [vmem:[%s5416_s14] sm:$0xff] %v2808_v43 }

</bundles_post_ra>
